<compile_context>
chip_gen: v5e
topology: v5e:2x2
jax: 0.10.0
libtpu: 0.0.40
codegen_flags: <defaults>
</compile_context>

<pallas_src>
import numpy as np
import jax
import jax.numpy as jnp
from jax import lax
from jax.experimental import pallas as pl
from jax.experimental.pallas import tpu as pltpu

BN_EPS = 1e-5


def _make_fused_encoder_kernel(H, W, channels):
    """channels = [Cin0, C1, ..., C_num_layers]; returns the fused kernel body."""
    num_layers = len(channels) - 1

    def kernel(*refs):
        # refs = (x_ref, w_0..w_{L-1}, shift_ref, out_ref, pad_0[, pad_1[, pad_2]])
        x_ref = refs[0]
        w_refs = refs[1:1 + num_layers]
        s_ref = refs[1 + num_layers]
        out_ref = refs[2 + num_layers]
        pad_refs = refs[3 + num_layers:]

        # Zero the padded scratch buffers (scratch is per-core and persists across
        # grid steps, so this must run every step; a few tens of KiB of dense vst is
        # negligible).  Interiors are overwritten below; the 1-pixel borders stay
        # zero and provide the conv padding.
        for p in pad_refs:
            p[...] = jnp.zeros(p.shape, p.dtype)

        # Layer-0 input -> interior of the first padded buffer (in-kernel padding).
        pad_refs[0][pl.ds(1, H), pl.ds(1, W), :] = x_ref[0].astype(pad_refs[0].dtype)

        src = 0  # which pad buffer currently holds the layer input
        for l in range(num_layers):
            cin = channels[l]
            cout = channels[l + 1]
            xp = pad_refs[src][...]                      # (H+2, W+2, cin) f32, VMEM

            # Seed the accumulator with the fused (conv-bias + BN) shift so the
            # per-layer epilogue is just a ReLU.
            acc = jnp.broadcast_to(s_ref[pl.ds(l, 1), :], (H * W, cout))
            # 3x3 conv as 9 shifted (H*W, cin) @ (cin, cout) MXU matmuls,
            # bf16 operands, f32 accumulation.
            for dy in range(3):
                for dx in range(3):
                    patch = xp[dy:dy + H, dx:dx + W, :].reshape(H * W, cin)
                    acc = acc + jnp.dot(patch.astype(jnp.bfloat16),
                                        w_refs[l][dy, dx, :, :],
                                        preferred_element_type=jnp.float32)

            y = jnp.maximum(acc, 0.0)

            if l == num_layers - 1:
                # (H*W, C) -> (1, H, W, C) only re-chunks leading (untiled) dims:
                # layout-preserving, no relayout cost.
                out_ref[...] = y.reshape(1, H, W, cout).astype(out_ref.dtype)
            else:
                dst = 1 + (l % 2)                        # ping-pong between pad buffers
                pad_refs[dst][pl.ds(1, H), pl.ds(1, W), :] = (
                    y.reshape(H, W, cout).astype(pad_refs[dst].dtype))
                src = dst

    return kernel


def encoder_forward(x_nchw, params):
    """Encoder.forward: NCHW in, NCHW out. One fused Pallas kernel for all layers."""
    num_layers = len(params)
    N, Cin0, H, W = x_nchw.shape
    channels = [Cin0] + [int(p["w"].shape[-1]) for p in params]
    C_last = channels[-1]
    assert len(set(channels[1:])) == 1, "Encoder layers share dim_internal"

    x = jnp.transpose(x_nchw, (0, 2, 3, 1))              # NCHW -> NHWC (f32)

    # Inputs: x, all folded bf16 weights, then one stacked (L, C) shift operand.
    inputs = [x]
    in_specs = [pl.BlockSpec((1, H, W, Cin0), lambda n: (n, 0, 0, 0))]
    for l, p in enumerate(params):
        cin, cout = channels[l], channels[l + 1]
        inputs.append(p["w"])
        in_specs.append(pl.BlockSpec((3, 3, cin, cout), lambda n: (0, 0, 0, 0)))
    shifts = jnp.stack([p["shift"] for p in params], axis=0)   # (L, C_last) f32
    inputs.append(shifts)
    in_specs.append(pl.BlockSpec((num_layers, C_last), lambda n: (0, 0)))

    # Padded activation scratch: one buffer for the layer-0 input, plus up to two
    # ping-pong buffers for intermediate activations (all VMEM-resident).
    scratch_shapes = [pltpu.VMEM((H + 2, W + 2, Cin0), jnp.float32)]
    n_interm = min(num_layers - 1, 2)
    if n_interm:
        scratch_shapes += [pltpu.VMEM((H + 2, W + 2, C_last), jnp.float32)] * n_interm

    out = pl.pallas_call(
        _make_fused_encoder_kernel(H, W, channels),
        out_shape=jax.ShapeDtypeStruct((N, H, W, C_last), jnp.float32),
        grid_spec=pltpu.PrefetchScalarGridSpec(
            num_scalar_prefetch=0,
            grid=(N,),
            in_specs=in_specs,
            out_specs=pl.BlockSpec((1, H, W, C_last), lambda n: (n, 0, 0, 0)),
            scratch_shapes=scratch_shapes,
        ),
        compiler_params=pltpu.CompilerParams(
            dimension_semantics=("parallel",)),
    )(*inputs)

    return jnp.transpose(out, (0, 3, 1, 2))               # NHWC -> NCHW


def init_encoder_params(key, dim_input, dim_internal, num_layers):
    """Deterministic params mirroring the PyTorch module's __init__ (eval-mode BN),
    with BN scale pre-folded into the conv weights and weights cast to bf16."""
    params = []
    cin = dim_input
    for _ in range(num_layers):
        key, kw = jax.random.split(key)
        fan_in = cin * 3 * 3
        # msra_fill (He normal), conv bias = 0
        w = jax.random.normal(kw, (3, 3, cin, dim_internal), jnp.float32) * jnp.sqrt(2.0 / fan_in)
        b = jnp.zeros((dim_internal,), jnp.float32)
        # BatchNorm2d fresh init: gamma=1, beta=0, running_mean=0, running_var=1
        gamma = jnp.ones((dim_internal,), jnp.float32)
        beta = jnp.zeros((dim_internal,), jnp.float32)
        running_mean = jnp.zeros((dim_internal,), jnp.float32)
        running_var = jnp.ones((dim_internal,), jnp.float32)
        scale = gamma / jnp.sqrt(running_var + BN_EPS)
        shift = beta + (b - running_mean) * scale
        w_folded = (w * scale[None, None, None, :]).astype(jnp.bfloat16)
        params.append({"w": w_folded, "shift": shift})
        cin = dim_internal
    return params


def encoder_reference(x_nchw, params):
    """Pure-JAX reference with identical quantization (bf16 operands, f32 accum)."""
    a = jnp.transpose(x_nchw, (0, 2, 3, 1))               # NHWC, f32
    for layer in params:
        y = lax.conv_general_dilated(
            a.astype(jnp.bfloat16), layer["w"],
            window_strides=(1, 1), padding="SAME",
            dimension_numbers=("NHWC", "HWIO", "NHWC"),
            preferred_element_type=jnp.float32)
        a = jnp.maximum(y + layer["shift"][None, None, None, :], 0.0)  # stays f32
    return jnp.transpose(a, (0, 3, 1, 2))


if __name__ == "__main__":
    # Shapes consistent with Encoder(dim_input=4, dim_internal=32, num_layers=2)
    batch, dim_input, dim_internal, num_layers = 2, 4, 32, 2
    H = W = 16

    key = jax.random.PRNGKey(0)
    key, kx = jax.random.split(key)
    x = jax.random.normal(kx, (batch, dim_input, H, W), jnp.float32)  # NCHW

    params = init_encoder_params(key, dim_input, dim_internal, num_layers)

    out = jax.block_until_ready(encoder_forward(x, params))
    ref = jax.block_until_ready(encoder_reference(x, params))

    assert out.shape == (batch, dim_internal, H, W)
    np.testing.assert_allclose(np.asarray(out), np.asarray(ref), rtol=1e-3, atol=1e-3)

    print("KERNEL_OK")
</pallas_src>

<mosaic_0001>
module attributes {stable_mosaic.version = 11 : i64} {
  func.func @kernel(%arg0: i32, %arg1: memref<1x16x16x4xf32, #tpu.memory_space<vmem>>, %arg2: memref<3x3x4x32xbf16, #tpu.memory_space<vmem>>, %arg3: memref<3x3x32x32xbf16, #tpu.memory_space<vmem>>, %arg4: memref<2x32xf32, #tpu.memory_space<vmem>>, %arg5: memref<1x16x16x32xf32, #tpu.memory_space<vmem>>, %arg6: memref<18x18x4xf32, #tpu.memory_space<vmem>>, %arg7: memref<18x18x32xf32, #tpu.memory_space<vmem>>) attributes {dimension_semantics = [#tpu.dimension_semantics<parallel>], iteration_bounds = array<i64: 2>, scalar_prefetch = 0 : i64, scratch_operands = 2 : i64, tpu.core_type = #tpu.core_type<tc>, window_params = [{transform_indices = @transform_0, window_bounds = array<i64: 1, 16, 16, 4>}, {pipeline_mode = #tpu.pipeline_mode<synchronous>, transform_indices = @transform_1, window_bounds = array<i64: 3, 3, 4, 32>}, {pipeline_mode = #tpu.pipeline_mode<synchronous>, transform_indices = @transform_2, window_bounds = array<i64: 3, 3, 32, 32>}, {pipeline_mode = #tpu.pipeline_mode<synchronous>, transform_indices = @transform_3, window_bounds = array<i64: 2, 32>}, {transform_indices = @transform_4, window_bounds = array<i64: 1, 16, 16, 32>}]} {
    %cst = arith.constant 0.000000e+00 : f32
    %0 = vector.broadcast %cst : f32 to vector<18x18x4xf32>
    %c0 = arith.constant 0 : index
    %c0_0 = arith.constant 0 : index
    %c0_1 = arith.constant 0 : index
    %1 = vector.load %arg6[%c0, %c0_0, %c0_1] : memref<18x18x4xf32, #tpu.memory_space<vmem>>, vector<18x18x4xf32>
    tpu.vector_store %arg6[%c0, %c0_0, %c0_1], %0 {strides = array<i32>} : memref<18x18x4xf32, #tpu.memory_space<vmem>>, vector<18x18x4xf32>,
    %cst_2 = arith.constant 0.000000e+00 : f32
    %2 = vector.broadcast %cst_2 : f32 to vector<18x18x32xf32>
    %c0_3 = arith.constant 0 : index
    %c0_4 = arith.constant 0 : index
    %c0_5 = arith.constant 0 : index
    %3 = vector.load %arg7[%c0_3, %c0_4, %c0_5] : memref<18x18x32xf32, #tpu.memory_space<vmem>>, vector<18x18x32xf32>
    tpu.vector_store %arg7[%c0_3, %c0_4, %c0_5], %2 {strides = array<i32>} : memref<18x18x32xf32, #tpu.memory_space<vmem>>, vector<18x18x32xf32>,
    %c0_6 = arith.constant 0 : index
    %c0_7 = arith.constant 0 : index
    %c0_8 = arith.constant 0 : index
    %c0_9 = arith.constant 0 : index
    %4 = vector.load %arg1[%c0_6, %c0_7, %c0_8, %c0_9] : memref<1x16x16x4xf32, #tpu.memory_space<vmem>>, vector<1x16x16x4xf32>
    %5 = vector.shape_cast %4 : vector<1x16x16x4xf32> to vector<16x16x4xf32>
    %c1 = arith.constant 1 : index
    %c1_10 = arith.constant 1 : index
    %c0_11 = arith.constant 0 : index
    %6 = vector.load %arg6[%c1, %c1_10, %c0_11] : memref<18x18x4xf32, #tpu.memory_space<vmem>>, vector<16x16x4xf32>
    tpu.vector_store %arg6[%c1, %c1_10, %c0_11], %5 {strides = array<i32>} : memref<18x18x4xf32, #tpu.memory_space<vmem>>, vector<16x16x4xf32>,
    %c0_12 = arith.constant 0 : index
    %c0_13 = arith.constant 0 : index
    %c0_14 = arith.constant 0 : index
    %7 = vector.load %arg6[%c0_12, %c0_13, %c0_14] : memref<18x18x4xf32, #tpu.memory_space<vmem>>, vector<18x18x4xf32>
    %c0_15 = arith.constant 0 : index
    %c0_16 = arith.constant 0 : index
    %8 = vector.load %arg4[%c0_15, %c0_16] : memref<2x32xf32, #tpu.memory_space<vmem>>, vector<1x32xf32>
    %9 = vector.shape_cast %8 : vector<1x32xf32> to vector<1x32xf32>
    %10 = vector.broadcast %9 : vector<1x32xf32> to vector<256x32xf32>
    %11 = vector.extract_strided_slice %7 {offsets = [0, 0, 0], sizes = [16, 16, 4], strides = [1, 1, 1]} : vector<18x18x4xf32> to vector<16x16x4xf32>
    %12 = vector.shape_cast %11 : vector<16x16x4xf32> to vector<256x4xf32>
    %13 = arith.truncf %12 : vector<256x4xf32> to vector<256x4xbf16>
    %c0_17 = arith.constant 0 : index
    %c0_18 = arith.constant 0 : index
    %c0_19 = arith.constant 0 : index
    %c0_20 = arith.constant 0 : index
    %14 = vector.load %arg2[%c0_17, %c0_18, %c0_19, %c0_20] : memref<3x3x4x32xbf16, #tpu.memory_space<vmem>>, vector<1x1x4x32xbf16>
    %15 = vector.shape_cast %14 : vector<1x1x4x32xbf16> to vector<4x32xbf16>
    %cst_21 = arith.constant dense<0.000000e+00> : vector<256x32xf32>
    %16 = tpu.matmul %13, %15, %cst_21 {dimension_numbers = #tpu.dot_dimension_numbers<[1], [0], [0], [1], [0, 0, 1, 1], [], []>} : vector<256x4xbf16>, vector<4x32xbf16>, vector<256x32xf32> -> vector<256x32xf32>
    %17 = arith.addf %10, %16 : vector<256x32xf32>
    %18 = vector.extract_strided_slice %7 {offsets = [0, 1, 0], sizes = [16, 16, 4], strides = [1, 1, 1]} : vector<18x18x4xf32> to vector<16x16x4xf32>
    %19 = vector.shape_cast %18 : vector<16x16x4xf32> to vector<256x4xf32>
    %20 = arith.truncf %19 : vector<256x4xf32> to vector<256x4xbf16>
    %c0_22 = arith.constant 0 : index
    %c1_23 = arith.constant 1 : index
    %c0_24 = arith.constant 0 : index
    %c0_25 = arith.constant 0 : index
    %21 = vector.load %arg2[%c0_22, %c1_23, %c0_24, %c0_25] : memref<3x3x4x32xbf16, #tpu.memory_space<vmem>>, vector<1x1x4x32xbf16>
    %22 = vector.shape_cast %21 : vector<1x1x4x32xbf16> to vector<4x32xbf16>
    %cst_26 = arith.constant dense<0.000000e+00> : vector<256x32xf32>
    %23 = tpu.matmul %20, %22, %cst_26 {dimension_numbers = #tpu.dot_dimension_numbers<[1], [0], [0], [1], [0, 0, 1, 1], [], []>} : vector<256x4xbf16>, vector<4x32xbf16>, vector<256x32xf32> -> vector<256x32xf32>
    %24 = arith.addf %17, %23 : vector<256x32xf32>
    %25 = vector.extract_strided_slice %7 {offsets = [0, 2, 0], sizes = [16, 16, 4], strides = [1, 1, 1]} : vector<18x18x4xf32> to vector<16x16x4xf32>
    %26 = vector.shape_cast %25 : vector<16x16x4xf32> to vector<256x4xf32>
    %27 = arith.truncf %26 : vector<256x4xf32> to vector<256x4xbf16>
    %c0_27 = arith.constant 0 : index
    %c2 = arith.constant 2 : index
    %c0_28 = arith.constant 0 : index
    %c0_29 = arith.constant 0 : index
    %28 = vector.load %arg2[%c0_27, %c2, %c0_28, %c0_29] : memref<3x3x4x32xbf16, #tpu.memory_space<vmem>>, vector<1x1x4x32xbf16>
    %29 = vector.shape_cast %28 : vector<1x1x4x32xbf16> to vector<4x32xbf16>
    %cst_30 = arith.constant dense<0.000000e+00> : vector<256x32xf32>
    %30 = tpu.matmul %27, %29, %cst_30 {dimension_numbers = #tpu.dot_dimension_numbers<[1], [0], [0], [1], [0, 0, 1, 1], [], []>} : vector<256x4xbf16>, vector<4x32xbf16>, vector<256x32xf32> -> vector<256x32xf32>
    %31 = arith.addf %24, %30 : vector<256x32xf32>
    %32 = vector.extract_strided_slice %7 {offsets = [1, 0, 0], sizes = [16, 16, 4], strides = [1, 1, 1]} : vector<18x18x4xf32> to vector<16x16x4xf32>
    %33 = vector.shape_cast %32 : vector<16x16x4xf32> to vector<256x4xf32>
    %34 = arith.truncf %33 : vector<256x4xf32> to vector<256x4xbf16>
    %c1_31 = arith.constant 1 : index
    %c0_32 = arith.constant 0 : index
    %c0_33 = arith.constant 0 : index
    %c0_34 = arith.constant 0 : index
    %35 = vector.load %arg2[%c1_31, %c0_32, %c0_33, %c0_34] : memref<3x3x4x32xbf16, #tpu.memory_space<vmem>>, vector<1x1x4x32xbf16>
    %36 = vector.shape_cast %35 : vector<1x1x4x32xbf16> to vector<4x32xbf16>
    %cst_35 = arith.constant dense<0.000000e+00> : vector<256x32xf32>
    %37 = tpu.matmul %34, %36, %cst_35 {dimension_numbers = #tpu.dot_dimension_numbers<[1], [0], [0], [1], [0, 0, 1, 1], [], []>} : vector<256x4xbf16>, vector<4x32xbf16>, vector<256x32xf32> -> vector<256x32xf32>
    %38 = arith.addf %31, %37 : vector<256x32xf32>
    %39 = vector.extract_strided_slice %7 {offsets = [1, 1, 0], sizes = [16, 16, 4], strides = [1, 1, 1]} : vector<18x18x4xf32> to vector<16x16x4xf32>
    %40 = vector.shape_cast %39 : vector<16x16x4xf32> to vector<256x4xf32>
    %41 = arith.truncf %40 : vector<256x4xf32> to vector<256x4xbf16>
    %c1_36 = arith.constant 1 : index
    %c1_37 = arith.constant 1 : index
    %c0_38 = arith.constant 0 : index
    %c0_39 = arith.constant 0 : index
    %42 = vector.load %arg2[%c1_36, %c1_37, %c0_38, %c0_39] : memref<3x3x4x32xbf16, #tpu.memory_space<vmem>>, vector<1x1x4x32xbf16>
    %43 = vector.shape_cast %42 : vector<1x1x4x32xbf16> to vector<4x32xbf16>
    %cst_40 = arith.constant dense<0.000000e+00> : vector<256x32xf32>
    %44 = tpu.matmul %41, %43, %cst_40 {dimension_numbers = #tpu.dot_dimension_numbers<[1], [0], [0], [1], [0, 0, 1, 1], [], []>} : vector<256x4xbf16>, vector<4x32xbf16>, vector<256x32xf32> -> vector<256x32xf32>
    %45 = arith.addf %38, %44 : vector<256x32xf32>
    %46 = vector.extract_strided_slice %7 {offsets = [1, 2, 0], sizes = [16, 16, 4], strides = [1, 1, 1]} : vector<18x18x4xf32> to vector<16x16x4xf32>
    %47 = vector.shape_cast %46 : vector<16x16x4xf32> to vector<256x4xf32>
    %48 = arith.truncf %47 : vector<256x4xf32> to vector<256x4xbf16>
    %c1_41 = arith.constant 1 : index
    %c2_42 = arith.constant 2 : index
    %c0_43 = arith.constant 0 : index
    %c0_44 = arith.constant 0 : index
    %49 = vector.load %arg2[%c1_41, %c2_42, %c0_43, %c0_44] : memref<3x3x4x32xbf16, #tpu.memory_space<vmem>>, vector<1x1x4x32xbf16>
    %50 = vector.shape_cast %49 : vector<1x1x4x32xbf16> to vector<4x32xbf16>
    %cst_45 = arith.constant dense<0.000000e+00> : vector<256x32xf32>
    %51 = tpu.matmul %48, %50, %cst_45 {dimension_numbers = #tpu.dot_dimension_numbers<[1], [0], [0], [1], [0, 0, 1, 1], [], []>} : vector<256x4xbf16>, vector<4x32xbf16>, vector<256x32xf32> -> vector<256x32xf32>
    %52 = arith.addf %45, %51 : vector<256x32xf32>
    %53 = vector.extract_strided_slice %7 {offsets = [2, 0, 0], sizes = [16, 16, 4], strides = [1, 1, 1]} : vector<18x18x4xf32> to vector<16x16x4xf32>
    %54 = vector.shape_cast %53 : vector<16x16x4xf32> to vector<256x4xf32>
    %55 = arith.truncf %54 : vector<256x4xf32> to vector<256x4xbf16>
    %c2_46 = arith.constant 2 : index
    %c0_47 = arith.constant 0 : index
    %c0_48 = arith.constant 0 : index
    %c0_49 = arith.constant 0 : index
    %56 = vector.load %arg2[%c2_46, %c0_47, %c0_48, %c0_49] : memref<3x3x4x32xbf16, #tpu.memory_space<vmem>>, vector<1x1x4x32xbf16>
    %57 = vector.shape_cast %56 : vector<1x1x4x32xbf16> to vector<4x32xbf16>
    %cst_50 = arith.constant dense<0.000000e+00> : vector<256x32xf32>
    %58 = tpu.matmul %55, %57, %cst_50 {dimension_numbers = #tpu.dot_dimension_numbers<[1], [0], [0], [1], [0, 0, 1, 1], [], []>} : vector<256x4xbf16>, vector<4x32xbf16>, vector<256x32xf32> -> vector<256x32xf32>
    %59 = arith.addf %52, %58 : vector<256x32xf32>
    %60 = vector.extract_strided_slice %7 {offsets = [2, 1, 0], sizes = [16, 16, 4], strides = [1, 1, 1]} : vector<18x18x4xf32> to vector<16x16x4xf32>
    %61 = vector.shape_cast %60 : vector<16x16x4xf32> to vector<256x4xf32>
    %62 = arith.truncf %61 : vector<256x4xf32> to vector<256x4xbf16>
    %c2_51 = arith.constant 2 : index
    %c1_52 = arith.constant 1 : index
    %c0_53 = arith.constant 0 : index
    %c0_54 = arith.constant 0 : index
    %63 = vector.load %arg2[%c2_51, %c1_52, %c0_53, %c0_54] : memref<3x3x4x32xbf16, #tpu.memory_space<vmem>>, vector<1x1x4x32xbf16>
    %64 = vector.shape_cast %63 : vector<1x1x4x32xbf16> to vector<4x32xbf16>
    %cst_55 = arith.constant dense<0.000000e+00> : vector<256x32xf32>
    %65 = tpu.matmul %62, %64, %cst_55 {dimension_numbers = #tpu.dot_dimension_numbers<[1], [0], [0], [1], [0, 0, 1, 1], [], []>} : vector<256x4xbf16>, vector<4x32xbf16>, vector<256x32xf32> -> vector<256x32xf32>
    %66 = arith.addf %59, %65 : vector<256x32xf32>
    %67 = vector.extract_strided_slice %7 {offsets = [2, 2, 0], sizes = [16, 16, 4], strides = [1, 1, 1]} : vector<18x18x4xf32> to vector<16x16x4xf32>
    %68 = vector.shape_cast %67 : vector<16x16x4xf32> to vector<256x4xf32>
    %69 = arith.truncf %68 : vector<256x4xf32> to vector<256x4xbf16>
    %c2_56 = arith.constant 2 : index
    %c2_57 = arith.constant 2 : index
    %c0_58 = arith.constant 0 : index
    %c0_59 = arith.constant 0 : index
    %70 = vector.load %arg2[%c2_56, %c2_57, %c0_58, %c0_59] : memref<3x3x4x32xbf16, #tpu.memory_space<vmem>>, vector<1x1x4x32xbf16>
    %71 = vector.shape_cast %70 : vector<1x1x4x32xbf16> to vector<4x32xbf16>
    %cst_60 = arith.constant dense<0.000000e+00> : vector<256x32xf32>
    %72 = tpu.matmul %69, %71, %cst_60 {dimension_numbers = #tpu.dot_dimension_numbers<[1], [0], [0], [1], [0, 0, 1, 1], [], []>} : vector<256x4xbf16>, vector<4x32xbf16>, vector<256x32xf32> -> vector<256x32xf32>
    %73 = arith.addf %66, %72 : vector<256x32xf32>
    %cst_61 = arith.constant 0.000000e+00 : f32
    %74 = vector.broadcast %cst_61 : f32 to vector<256x32xf32>
    %75 = arith.maximumf %73, %74 : vector<256x32xf32>
    %76 = vector.shape_cast %75 : vector<256x32xf32> to vector<16x16x32xf32>
    %c1_62 = arith.constant 1 : index
    %c1_63 = arith.constant 1 : index
    %c0_64 = arith.constant 0 : index
    %77 = vector.load %arg7[%c1_62, %c1_63, %c0_64] : memref<18x18x32xf32, #tpu.memory_space<vmem>>, vector<16x16x32xf32>
    tpu.vector_store %arg7[%c1_62, %c1_63, %c0_64], %76 {strides = array<i32>} : memref<18x18x32xf32, #tpu.memory_space<vmem>>, vector<16x16x32xf32>,
    %c0_65 = arith.constant 0 : index
    %c0_66 = arith.constant 0 : index
    %c0_67 = arith.constant 0 : index
    %78 = vector.load %arg7[%c0_65, %c0_66, %c0_67] : memref<18x18x32xf32, #tpu.memory_space<vmem>>, vector<18x18x32xf32>
    %c1_68 = arith.constant 1 : index
    %c0_69 = arith.constant 0 : index
    %79 = vector.load %arg4[%c1_68, %c0_69] : memref<2x32xf32, #tpu.memory_space<vmem>>, vector<1x32xf32>
    %80 = vector.shape_cast %79 : vector<1x32xf32> to vector<1x32xf32>
    %81 = vector.broadcast %80 : vector<1x32xf32> to vector<256x32xf32>
    %82 = vector.extract_strided_slice %78 {offsets = [0, 0, 0], sizes = [16, 16, 32], strides = [1, 1, 1]} : vector<18x18x32xf32> to vector<16x16x32xf32>
    %83 = vector.shape_cast %82 : vector<16x16x32xf32> to vector<256x32xf32>
    %84 = arith.truncf %83 : vector<256x32xf32> to vector<256x32xbf16>
    %c0_70 = arith.constant 0 : index
    %c0_71 = arith.constant 0 : index
    %c0_72 = arith.constant 0 : index
    %c0_73 = arith.constant 0 : index
    %85 = vector.load %arg3[%c0_70, %c0_71, %c0_72, %c0_73] : memref<3x3x32x32xbf16, #tpu.memory_space<vmem>>, vector<1x1x32x32xbf16>
    %86 = vector.shape_cast %85 : vector<1x1x32x32xbf16> to vector<32x32xbf16>
    %cst_74 = arith.constant dense<0.000000e+00> : vector<256x32xf32>
    %87 = tpu.matmul %84, %86, %cst_74 {dimension_numbers = #tpu.dot_dimension_numbers<[1], [0], [0], [1], [0, 0, 1, 1], [], []>} : vector<256x32xbf16>, vector<32x32xbf16>, vector<256x32xf32> -> vector<256x32xf32>
    %88 = arith.addf %81, %87 : vector<256x32xf32>
    %89 = vector.extract_strided_slice %78 {offsets = [0, 1, 0], sizes = [16, 16, 32], strides = [1, 1, 1]} : vector<18x18x32xf32> to vector<16x16x32xf32>
    %90 = vector.shape_cast %89 : vector<16x16x32xf32> to vector<256x32xf32>
    %91 = arith.truncf %90 : vector<256x32xf32> to vector<256x32xbf16>
    %c0_75 = arith.constant 0 : index
    %c1_76 = arith.constant 1 : index
    %c0_77 = arith.constant 0 : index
    %c0_78 = arith.constant 0 : index
    %92 = vector.load %arg3[%c0_75, %c1_76, %c0_77, %c0_78] : memref<3x3x32x32xbf16, #tpu.memory_space<vmem>>, vector<1x1x32x32xbf16>
    %93 = vector.shape_cast %92 : vector<1x1x32x32xbf16> to vector<32x32xbf16>
    %cst_79 = arith.constant dense<0.000000e+00> : vector<256x32xf32>
    %94 = tpu.matmul %91, %93, %cst_79 {dimension_numbers = #tpu.dot_dimension_numbers<[1], [0], [0], [1], [0, 0, 1, 1], [], []>} : vector<256x32xbf16>, vector<32x32xbf16>, vector<256x32xf32> -> vector<256x32xf32>
    %95 = arith.addf %88, %94 : vector<256x32xf32>
    %96 = vector.extract_strided_slice %78 {offsets = [0, 2, 0], sizes = [16, 16, 32], strides = [1, 1, 1]} : vector<18x18x32xf32> to vector<16x16x32xf32>
    %97 = vector.shape_cast %96 : vector<16x16x32xf32> to vector<256x32xf32>
    %98 = arith.truncf %97 : vector<256x32xf32> to vector<256x32xbf16>
    %c0_80 = arith.constant 0 : index
    %c2_81 = arith.constant 2 : index
    %c0_82 = arith.constant 0 : index
    %c0_83 = arith.constant 0 : index
    %99 = vector.load %arg3[%c0_80, %c2_81, %c0_82, %c0_83] : memref<3x3x32x32xbf16, #tpu.memory_space<vmem>>, vector<1x1x32x32xbf16>
    %100 = vector.shape_cast %99 : vector<1x1x32x32xbf16> to vector<32x32xbf16>
    %cst_84 = arith.constant dense<0.000000e+00> : vector<256x32xf32>
    %101 = tpu.matmul %98, %100, %cst_84 {dimension_numbers = #tpu.dot_dimension_numbers<[1], [0], [0], [1], [0, 0, 1, 1], [], []>} : vector<256x32xbf16>, vector<32x32xbf16>, vector<256x32xf32> -> vector<256x32xf32>
    %102 = arith.addf %95, %101 : vector<256x32xf32>
    %103 = vector.extract_strided_slice %78 {offsets = [1, 0, 0], sizes = [16, 16, 32], strides = [1, 1, 1]} : vector<18x18x32xf32> to vector<16x16x32xf32>
    %104 = vector.shape_cast %103 : vector<16x16x32xf32> to vector<256x32xf32>
    %105 = arith.truncf %104 : vector<256x32xf32> to vector<256x32xbf16>
    %c1_85 = arith.constant 1 : index
    %c0_86 = arith.constant 0 : index
    %c0_87 = arith.constant 0 : index
    %c0_88 = arith.constant 0 : index
    %106 = vector.load %arg3[%c1_85, %c0_86, %c0_87, %c0_88] : memref<3x3x32x32xbf16, #tpu.memory_space<vmem>>, vector<1x1x32x32xbf16>
    %107 = vector.shape_cast %106 : vector<1x1x32x32xbf16> to vector<32x32xbf16>
    %cst_89 = arith.constant dense<0.000000e+00> : vector<256x32xf32>
    %108 = tpu.matmul %105, %107, %cst_89 {dimension_numbers = #tpu.dot_dimension_numbers<[1], [0], [0], [1], [0, 0, 1, 1], [], []>} : vector<256x32xbf16>, vector<32x32xbf16>, vector<256x32xf32> -> vector<256x32xf32>
    %109 = arith.addf %102, %108 : vector<256x32xf32>
    %110 = vector.extract_strided_slice %78 {offsets = [1, 1, 0], sizes = [16, 16, 32], strides = [1, 1, 1]} : vector<18x18x32xf32> to vector<16x16x32xf32>
    %111 = vector.shape_cast %110 : vector<16x16x32xf32> to vector<256x32xf32>
    %112 = arith.truncf %111 : vector<256x32xf32> to vector<256x32xbf16>
    %c1_90 = arith.constant 1 : index
    %c1_91 = arith.constant 1 : index
    %c0_92 = arith.constant 0 : index
    %c0_93 = arith.constant 0 : index
    %113 = vector.load %arg3[%c1_90, %c1_91, %c0_92, %c0_93] : memref<3x3x32x32xbf16, #tpu.memory_space<vmem>>, vector<1x1x32x32xbf16>
    %114 = vector.shape_cast %113 : vector<1x1x32x32xbf16> to vector<32x32xbf16>
    %cst_94 = arith.constant dense<0.000000e+00> : vector<256x32xf32>
    %115 = tpu.matmul %112, %114, %cst_94 {dimension_numbers = #tpu.dot_dimension_numbers<[1], [0], [0], [1], [0, 0, 1, 1], [], []>} : vector<256x32xbf16>, vector<32x32xbf16>, vector<256x32xf32> -> vector<256x32xf32>
    %116 = arith.addf %109, %115 : vector<256x32xf32>
    %117 = vector.extract_strided_slice %78 {offsets = [1, 2, 0], sizes = [16, 16, 32], strides = [1, 1, 1]} : vector<18x18x32xf32> to vector<16x16x32xf32>
    %118 = vector.shape_cast %117 : vector<16x16x32xf32> to vector<256x32xf32>
    %119 = arith.truncf %118 : vector<256x32xf32> to vector<256x32xbf16>
    %c1_95 = arith.constant 1 : index
    %c2_96 = arith.constant 2 : index
    %c0_97 = arith.constant 0 : index
    %c0_98 = arith.constant 0 : index
    %120 = vector.load %arg3[%c1_95, %c2_96, %c0_97, %c0_98] : memref<3x3x32x32xbf16, #tpu.memory_space<vmem>>, vector<1x1x32x32xbf16>
    %121 = vector.shape_cast %120 : vector<1x1x32x32xbf16> to vector<32x32xbf16>
    %cst_99 = arith.constant dense<0.000000e+00> : vector<256x32xf32>
    %122 = tpu.matmul %119, %121, %cst_99 {dimension_numbers = #tpu.dot_dimension_numbers<[1], [0], [0], [1], [0, 0, 1, 1], [], []>} : vector<256x32xbf16>, vector<32x32xbf16>, vector<256x32xf32> -> vector<256x32xf32>
    %123 = arith.addf %116, %122 : vector<256x32xf32>
    %124 = vector.extract_strided_slice %78 {offsets = [2, 0, 0], sizes = [16, 16, 32], strides = [1, 1, 1]} : vector<18x18x32xf32> to vector<16x16x32xf32>
    %125 = vector.shape_cast %124 : vector<16x16x32xf32> to vector<256x32xf32>
    %126 = arith.truncf %125 : vector<256x32xf32> to vector<256x32xbf16>
    %c2_100 = arith.constant 2 : index
    %c0_101 = arith.constant 0 : index
    %c0_102 = arith.constant 0 : index
    %c0_103 = arith.constant 0 : index
    %127 = vector.load %arg3[%c2_100, %c0_101, %c0_102, %c0_103] : memref<3x3x32x32xbf16, #tpu.memory_space<vmem>>, vector<1x1x32x32xbf16>
    %128 = vector.shape_cast %127 : vector<1x1x32x32xbf16> to vector<32x32xbf16>
    %cst_104 = arith.constant dense<0.000000e+00> : vector<256x32xf32>
    %129 = tpu.matmul %126, %128, %cst_104 {dimension_numbers = #tpu.dot_dimension_numbers<[1], [0], [0], [1], [0, 0, 1, 1], [], []>} : vector<256x32xbf16>, vector<32x32xbf16>, vector<256x32xf32> -> vector<256x32xf32>
    %130 = arith.addf %123, %129 : vector<256x32xf32>
    %131 = vector.extract_strided_slice %78 {offsets = [2, 1, 0], sizes = [16, 16, 32], strides = [1, 1, 1]} : vector<18x18x32xf32> to vector<16x16x32xf32>
    %132 = vector.shape_cast %131 : vector<16x16x32xf32> to vector<256x32xf32>
    %133 = arith.truncf %132 : vector<256x32xf32> to vector<256x32xbf16>
    %c2_105 = arith.constant 2 : index
    %c1_106 = arith.constant 1 : index
    %c0_107 = arith.constant 0 : index
    %c0_108 = arith.constant 0 : index
    %134 = vector.load %arg3[%c2_105, %c1_106, %c0_107, %c0_108] : memref<3x3x32x32xbf16, #tpu.memory_space<vmem>>, vector<1x1x32x32xbf16>
    %135 = vector.shape_cast %134 : vector<1x1x32x32xbf16> to vector<32x32xbf16>
    %cst_109 = arith.constant dense<0.000000e+00> : vector<256x32xf32>
    %136 = tpu.matmul %133, %135, %cst_109 {dimension_numbers = #tpu.dot_dimension_numbers<[1], [0], [0], [1], [0, 0, 1, 1], [], []>} : vector<256x32xbf16>, vector<32x32xbf16>, vector<256x32xf32> -> vector<256x32xf32>
    %137 = arith.addf %130, %136 : vector<256x32xf32>
    %138 = vector.extract_strided_slice %78 {offsets = [2, 2, 0], sizes = [16, 16, 32], strides = [1, 1, 1]} : vector<18x18x32xf32> to vector<16x16x32xf32>
    %139 = vector.shape_cast %138 : vector<16x16x32xf32> to vector<256x32xf32>
    %140 = arith.truncf %139 : vector<256x32xf32> to vector<256x32xbf16>
    %c2_110 = arith.constant 2 : index
    %c2_111 = arith.constant 2 : index
    %c0_112 = arith.constant 0 : index
    %c0_113 = arith.constant 0 : index
    %141 = vector.load %arg3[%c2_110, %c2_111, %c0_112, %c0_113] : memref<3x3x32x32xbf16, #tpu.memory_space<vmem>>, vector<1x1x32x32xbf16>
    %142 = vector.shape_cast %141 : vector<1x1x32x32xbf16> to vector<32x32xbf16>
    %cst_114 = arith.constant dense<0.000000e+00> : vector<256x32xf32>
    %143 = tpu.matmul %140, %142, %cst_114 {dimension_numbers = #tpu.dot_dimension_numbers<[1], [0], [0], [1], [0, 0, 1, 1], [], []>} : vector<256x32xbf16>, vector<32x32xbf16>, vector<256x32xf32> -> vector<256x32xf32>
    %144 = arith.addf %137, %143 : vector<256x32xf32>
    %cst_115 = arith.constant 0.000000e+00 : f32
    %145 = vector.broadcast %cst_115 : f32 to vector<256x32xf32>
    %146 = arith.maximumf %144, %145 : vector<256x32xf32>
    %147 = vector.shape_cast %146 : vector<256x32xf32> to vector<1x16x16x32xf32>
    %c0_116 = arith.constant 0 : index
    %c0_117 = arith.constant 0 : index
    %c0_118 = arith.constant 0 : index
    %c0_119 = arith.constant 0 : index
    %148 = vector.load %arg5[%c0_116, %c0_117, %c0_118, %c0_119] : memref<1x16x16x32xf32, #tpu.memory_space<vmem>>, vector<1x16x16x32xf32>
    tpu.vector_store %arg5[%c0_116, %c0_117, %c0_118, %c0_119], %147 {strides = array<i32>} : memref<1x16x16x32xf32, #tpu.memory_space<vmem>>, vector<1x16x16x32xf32>,
    return
  }
  func.func @transform_0(%arg0: i32) -> (i32, i32, i32, i32) {
    %c0_i32 = arith.constant 0 : i32
    %c0_i32_0 = arith.constant 0 : i32
    %c0_i32_1 = arith.constant 0 : i32
    %c0_i32_2 = arith.constant 0 : i32
    return %arg0, %c0_i32, %c0_i32_0, %c0_i32_1 : i32, i32, i32, i32
  }
  func.func @transform_1(%arg0: i32) -> (i32, i32, i32, i32) {
    %c0_i32 = arith.constant 0 : i32
    %c0_i32_0 = arith.constant 0 : i32
    %c0_i32_1 = arith.constant 0 : i32
    %c0_i32_2 = arith.constant 0 : i32
    %c0_i32_3 = arith.constant 0 : i32
    return %c0_i32, %c0_i32_0, %c0_i32_1, %c0_i32_2 : i32, i32, i32, i32
  }
  func.func @transform_2(%arg0: i32) -> (i32, i32, i32, i32) {
    %c0_i32 = arith.constant 0 : i32
    %c0_i32_0 = arith.constant 0 : i32
    %c0_i32_1 = arith.constant 0 : i32
    %c0_i32_2 = arith.constant 0 : i32
    %c0_i32_3 = arith.constant 0 : i32
    return %c0_i32, %c0_i32_0, %c0_i32_1, %c0_i32_2 : i32, i32, i32, i32
  }
  func.func @transform_3(%arg0: i32) -> (i32, i32) {
    %c0_i32 = arith.constant 0 : i32
    %c0_i32_0 = arith.constant 0 : i32
    %c0_i32_1 = arith.constant 0 : i32
    return %c0_i32, %c0_i32_0 : i32, i32
  }
  func.func @transform_4(%arg0: i32) -> (i32, i32, i32, i32) {
    %c0_i32 = arith.constant 0 : i32
    %c0_i32_0 = arith.constant 0 : i32
    %c0_i32_1 = arith.constant 0 : i32
    %c0_i32_2 = arith.constant 0 : i32
    return %arg0, %c0_i32, %c0_i32_0, %c0_i32_1 : i32, i32, i32, i32
  }
}

</mosaic_0001>

<bundles_post_ra>
// kernel: tpu_custom_call.1
= control target key start
LH: loop header
LB: loop body
LE: loop exit
PB: predicated region body
PF: predicated region fallthrough
CT: control target
= control target key end

     0   :  { %9 = vsyncpa [#allocation5], 0  ;;  %s7041_s0 = inlined_call_operand.vmem [shape: f32[2,16,16,4], index: 0, kind: input, shape index: {}]   ;;  %s7042_s1 = inlined_call_operand.vmem [shape: bf16[3,3,4,32], index: 1, kind: input, shape index: {}]   ;;  %s7043_s2 = inlined_call_operand.vmem [shape: bf16[3,3,32,32], index: 2, kind: input, shape index: {}]   ;;  %s7044_s3 = inlined_call_operand.vmem [shape: f32[2,32], index: 3, kind: input, shape index: {}]   ;;  %s7045_s4 = inlined_call_operand.hbm [shape: f32[2,16,16,32], index: 4, kind: output, shape index: {}]  }
   0x1   :  { %11 = vsyncpa [#allocation5 + $0x1], 0  ;;  %s4684_s15 = smov 0   ;;  %s4686_s16 = smov 0  }
   0x2   :  { %s4688_s17 = smov 0   ;;  %s4690_s18 = smov 0  }
   0x3 LB: > { %s4705_s19 = sadd.s32 4294967295, %s4654_s18   ;;  %s4114_s20 = sadd.s32 4294967294, %s4654_s18   ;;  %s4654_s18 = sphi %s4690_s18, %s7326_s18   ;;  %s4650_s17 = sphi %s4688_s17, %s7325_s17   ;;  %s4646_s16 = sphi %s4686_s16, %s7324_s16   ;;  %s4642_s15 = sphi %s4684_s15, %s7323_s15  }
   0x4   : > { %s4709_s21 = sadd.s32 1, %s4654_s18   ;;  %s113_s22 = sadd.s32 1, %s4650_s17 }
   0x5   : > { %s110_s23 = ssub.s32 %s4654_s18, %s4709_s21  ;;  %p123_p0 = scmp.ne.s32.totalorder %s4650_s17, %s4646_s16 }
   0x6   : > { %p111_p1 = scmp.eq.s32.totalorder %s110_s23, 0  ;;  %p124_p2 = scmp.eq.s32.totalorder %s4705_s19, 1 }
   0x7   : > { %p129_p3 = scmp.ne.s32.totalorder %s4646_s16, %s4642_s15  ;;  %p130_p4 = scmp.eq.s32.totalorder %s4114_s20, 1 }
   0x8   : > { %s4720_s24 = scalar_select %p111_p1, %s4650_s17, %s113_s22  }
   0x9   : > { %p4722_p5 = por %p124_p2, %p123_p0  ;;  %p4726_p6 = por %p130_p4, %p129_p3 }
   0xa   : > { %p4117_p7 = scmp.ge.s32.totalorder %s4654_s18, 1  ;;  %p165_p8 = scmp.lt.s32.totalorder %s4654_s18, 3 }
   0xc   : > { %p166_p9 = pnand %p4117_p7, %p165_p8 }
   0xe   : > { %169 = sbr.rel (%p166_p9) target bundleno = 1496 (0x5d8), region = 36 }
  0x13   : > { %v446_v0 = vld [vmem:[%s7042_s1] sm:$0x3]  ;;  %vm495_vm0 = vcmask 1041408   ;;  %vm197_vm1 = vcmask 31744   ;;  %v7046_v2 = vmov 0.0   ;;  %p191_p10 = scmp.lt.s32.totalorder %s4705_s19, 1 }
  0x14   : > { %v497_v1 = vsel %vm495_vm0, %v446_v0, 0  ;;  %198 = vst.msk [vmem:[#allocation2] sm:$0xff] %vm197_vm1, %v7046_v2  ;;  %v4137_v6 = vld [vmem:[%s7042_s1 + $0x2] sm:$0x3]  ;;  %v4154_v8 = vld [vmem:[%s7042_s1 + $0x4] sm:$0x3] }
  0x15   : > { %506 = vmatpush.bf16.msra.mxu0 %v497_v1  ;;  %199 = vst.msk [vmem:[#allocation2 + $0x8] sm:$0xff] %vm197_vm1, %v7046_v2  ;;  %4546 = vmatpush.bf16.msra.mxu2 %v497_v1  ;;  %v848_v7 = vsel %vm495_vm0, %v4137_v6, 0  ;;  %v4171_v9 = vld [vmem:[%s7042_s1 + $0x6] sm:$0x3]  ;;  %s192_s9 = scalar_select %p191_p10, %s4705_s19, 1  ;;  %v1151_v10 = vsel %vm495_vm0, %v4154_v8, 0 }
  0x16   : > { %202 = vst.msk [vmem:[#allocation2 + $0x18] sm:$0xff] %vm197_vm1, %v7046_v2  ;;  %4547 = vmatpush.bf16.msra.mxu3 %v848_v7  ;;  %857 = vmatpush.bf16.msra.mxu1 %v848_v7  ;;  %v1281_v11 = vsel %vm495_vm0, %v4171_v9, 0  ;;  %vm200_vm2 = vcmask 25600   ;;  %v4188_v14 = vld [vmem:[%s7042_s1 + $0x8] sm:$0x3]  ;;  %vm668_vm3 = vcmask 1046528  }
  0x17   : > { %203 = vst.msk [vmem:[#allocation2 + $0x20] sm:$0xff] %vm197_vm1, %v7046_v2  ;;  %s4526_s10 = sshll.u32 %s192_s9, 8  ;;  %v1421_v15 = vsel %vm495_vm0, %v4188_v14, 0  ;;  %vm971_vm4 = vcmask 1045504   ;;  %vm253_vm5 = vcmask 261120   ;;  %vm256_vm6 = vcmask 254976  }
  0x18   : > { %205 = vst.msk [vmem:[#allocation2 + $0x30] sm:$0xff] %vm197_vm1, %v7046_v2  ;;  %s4824_s13 = scalar_lea.vmem %s7041_s0, %s4526_s10  ;;  %s4545_s22 = sshll.u32 %s4705_s19, 8 }
  0x19   : > { %206 = vst.msk [vmem:[#allocation2 + $0x38] sm:$0xff] %vm197_vm1, %v7046_v2  ;;  %1160 = vmatpush.bf16.msrb.mxu2 %v1151_v10  ;;  %v323_v12 = vld [vmem:[%s4824_s13 + $0x70] sm:$0xff]  ;;  %v324_v13 = vld [vmem:[%s4824_s13 + $0x78] sm:$0xff]  ;;  %1430 = vmatpush.bf16.msrb.mxu0 %v1421_v15  ;;  %v309_v33 = vld [vmem:[%s4824_s13] sm:$0xff]  ;;  %s4048_s28 = scalar_lea.hbm %s7045_s4, %s4545_s22  ;;  %s4612_s9 = scalar_lea.hbm %s7045_s4, 512 }
  0x1a   : > { %208 = vst.msk [vmem:[#allocation2 + $0x48] sm:$0xff] %vm197_vm1, %v7046_v2  ;;  %1290 = vmatpush.bf16.msrb.mxu3 %v1281_v11  ;;  %v310_v34 = vld [vmem:[%s4824_s13 + $0x8] sm:$0xff]  ;;  %v325_v35 = vld [vmem:[%s4824_s13 + $0x80] sm:$0xff]  ;;  %v311_v37 = vld [vmem:[%s4824_s13 + $0x10] sm:$0xff]  ;;  %s4051_s30 = sshll.u32 %s4048_s28, 4  ;;  %s4052_s30 = int_to_ptr.hbm [resolvable:$true] %s4051_s30 }
  0x1b   : > { %v4750_v3 = vld [vmem:[#allocation2] sm:$0xff]  ;;  %209 = vst.msk [vmem:[#allocation2 + $0x50] sm:$0xff] %vm197_vm1, %v7046_v2  ;;  %v326_v36 = vld [vmem:[%s4824_s13 + $0x88] sm:$0xff]  ;;  %v312_v38 = vld [vmem:[%s4824_s13 + $0x18] sm:$0xff]  ;;  %s4606_s5 = sshra.s32 %s4052_s30, 4  ;;  %s4607_s5 = int_to_ptr.hbm [resolvable:$true] %s4606_s5 }
  0x1c   : > { %v4754_v4 = vld [vmem:[#allocation2 + $0x8] sm:$0xff]  ;;  %211 = vst.msk [vmem:[#allocation2 + $0x60] sm:$0xff] %vm197_vm1, %v7046_v2  ;;  %v669_v16 = vrot.slane %v4750_v3, 1  ;;  %v327_v39 = vld [vmem:[%s4824_s13 + $0x90] sm:$0xff]  ;;  %v328_v40 = vld [vmem:[%s4824_s13 + $0x98] sm:$0xff]  ;;  %s4608_s6 = scalar_lea.hbm %s4607_s5, 256  ;;  %p4613_p0 = scmp.lt.s32.totalorder %s4607_s5, %s7045_s4 }
  0x1d   : > { %v430_v5 = vpack.c.bf16 %v4754_v4, %v4750_v3  ;;  %212 = vst.msk [vmem:[#allocation2 + $0x68] sm:$0xff] %vm197_vm1, %v7046_v2  ;;  %v670_v17 = vrot.slane %v4754_v4, 1  ;;  %v313_v41 = vld [vmem:[%s4824_s13 + $0x20] sm:$0xff]  ;;  %v314_v42 = vld [vmem:[%s4824_s13 + $0x28] sm:$0xff]  ;;  %v316_v6 = vld [vmem:[%s4824_s13 + $0x38] sm:$0xff]  ;;  %p4609_p11 = scmp.ne.s32.totalorder %s4607_s5, %s4608_s6  ;;  %p4614_p1 = scmp.lt.s32.totalorder %s4612_s9, %s4608_s6 }
  0x1e   : > { %214 = vst.msk [vmem:[#allocation2 + $0x78] sm:$0xff] %vm197_vm1, %v7046_v2  ;;  %v329_v47 = vld [vmem:[%s4824_s13 + $0xa0] sm:$0xff]  ;;  %v330_v52 = vld [vmem:[%s4824_s13 + $0xa8] sm:$0xff] }
  0x1f   : > { %4121 = vmatmul.msk.bf16.vlgmr.msra.gmra.mxu0 %vm197_vm1, %v430_v5  ;;  %215 = vst.msk [vmem:[#allocation2 + $0x80] sm:$0xff] %vm197_vm1, %v7046_v2  ;;  %v671_v27 = vsel %vm668_vm3, %v669_v16, %v670_v17  ;;  %v315_v5 = vld [vmem:[%s4824_s13 + $0x30] sm:$0xff]  ;;  %p4610_p12 = pnand %p4609_p11, %p4722_p5  ;;  %p4615_p2 = por %p4614_p1, %p4613_p0 }
  0x20   : > { %217 = vst.msk [vmem:[#allocation2 + $0x90] sm:$0xff] %vm197_vm1, %v7046_v2 }
  0x21   : > { %218 = vst.msk [vmem:[#allocation2 + $0x98] sm:$0xff] %vm197_vm1, %v7046_v2  ;;  %p4611_p13 = pneg %p4610_p12 }
  0x22   : > { %220 = vst.msk [vmem:[#allocation2 + $0xa8] sm:$0xff] %vm197_vm1, %v7046_v2 }
  0x23   : > { %221 = vst.msk [vmem:[#allocation2 + $0xb0] sm:$0xff] %vm197_vm1, %v7046_v2  ;;  %p4616_p3 = pnand %p4615_p2, %p4611_p13 }
  0x24   : > { %223 = vst.msk [vmem:[#allocation2 + $0xc0] sm:$0xff] %vm197_vm1, %v7046_v2 }
  0x25   : > { %224 = vst.msk [vmem:[#allocation2 + $0xc8] sm:$0xff] %vm197_vm1, %v7046_v2 }
  0x26   : > { %226 = vst.msk [vmem:[#allocation2 + $0xd8] sm:$0xff] %vm197_vm1, %v7046_v2 }
  0x27   : > { %227 = vst.msk [vmem:[#allocation2 + $0xe0] sm:$0xff] %vm197_vm1, %v7046_v2 }
  0x28   : > { %229 = vst.msk [vmem:[#allocation2 + $0xf0] sm:$0xff] %vm197_vm1, %v7046_v2 }
  0x29   : > { %230 = vst.msk [vmem:[#allocation2 + $0xf8] sm:$0xff] %vm197_vm1, %v7046_v2 }
  0x2a   : > { %232 = vst.msk [vmem:[#allocation2 + $0x108] sm:$0xff] %vm197_vm1, %v7046_v2 }
  0x2b   : > { %233 = vst.msk [vmem:[#allocation2 + $0x110] sm:$0xff] %vm197_vm1, %v7046_v2 }
  0x2c   : > { %235 = vst.msk [vmem:[#allocation2 + $0x120] sm:$0xff] %vm197_vm1, %v7046_v2 }
  0x2d   : > { %236 = vst.msk [vmem:[#allocation2 + $0x128] sm:$0xff] %vm197_vm1, %v7046_v2 }
  0x2e   : > { %238 = vst.msk [vmem:[#allocation2 + $0x138] sm:$0xff] %vm197_vm1, %v7046_v2 }
  0x2f   : > { %239 = vst.msk [vmem:[#allocation2 + $0x140] sm:$0xff] %vm197_vm1, %v7046_v2 }
  0x30   : > { %241 = vst.msk [vmem:[#allocation2 + $0x150] sm:$0xff] %vm197_vm1, %v7046_v2 }
  0x31   : > { %242 = vst.msk [vmem:[#allocation2 + $0x158] sm:$0xff] %vm197_vm1, %v7046_v2 }
  0x32   : > { %244 = vst.msk [vmem:[#allocation2 + $0x168] sm:$0xff] %vm197_vm1, %v7046_v2 }
  0x33   : > { %245 = vst.msk [vmem:[#allocation2 + $0x170] sm:$0xff] %vm197_vm1, %v7046_v2 }
  0x34   : > { %247 = vst.msk [vmem:[#allocation2 + $0x180] sm:$0xff] %vm197_vm1, %v7046_v2 }
  0x35   : > { %248 = vst.msk [vmem:[#allocation2 + $0x188] sm:$0xff] %vm197_vm1, %v7046_v2 }
  0x36   : > { %250 = vst.msk [vmem:[#allocation2 + $0x198] sm:$0xff] %vm197_vm1, %v7046_v2 }
  0x37   : > { %251 = vst.msk [vmem:[#allocation2 + $0x1a0] sm:$0xff] %vm197_vm1, %v7046_v2 }
  0x38   : > { %225 = vst.msk [vmem:[#allocation2 + $0xd0] sm:$0x3] %vm200_vm2, %v7046_v2 }
  0x39   : > { %356 = vst.msk [vmem:[#allocation2 + $0xc1] sm:$0xff] %vm197_vm1, %v323_v12 }
  0x3a   : > { %357 = vst.msk [vmem:[#allocation2 + $0xc9] sm:$0xff] %vm197_vm1, %v324_v13 }
  0x3b   : > { %201 = vst.msk [vmem:[#allocation2 + $0x10] sm:$0x3] %vm200_vm2, %v7046_v2 }
  0x3c   : > { %204 = vst.msk [vmem:[#allocation2 + $0x28] sm:$0x3] %vm200_vm2, %v7046_v2 }
  0x3d   : > { %207 = vst.msk [vmem:[#allocation2 + $0x40] sm:$0x3] %vm200_vm2, %v7046_v2 }
  0x3e   : > { %210 = vst.msk [vmem:[#allocation2 + $0x58] sm:$0x3] %vm200_vm2, %v7046_v2 }
  0x3f   : > { %213 = vst.msk [vmem:[#allocation2 + $0x70] sm:$0x3] %vm200_vm2, %v7046_v2 }
  0x40   : > { %v4856_v18 = vld [vmem:[#allocation2 + $0xc0] sm:$0xff]  ;;  %216 = vst.msk [vmem:[#allocation2 + $0x88] sm:$0x3] %vm200_vm2, %v7046_v2 }
  0x41   : > { %v4860_v19 = vld [vmem:[#allocation2 + $0xc8] sm:$0xff]  ;;  %v709_v20 = vrot.slane %v4856_v18, 1  ;;  %219 = vst.msk [vmem:[#allocation2 + $0xa0] sm:$0x3] %vm200_vm2, %v7046_v2  ;;  %v4872_v23 = vld [vmem:[#allocation2 + $0xd0] sm:$0x3] }
  0x42   : > { %v4867_v21 = vpack.c.bf16 %v4860_v19, %v4856_v18  ;;  %v710_v22 = vrot.slane %v4860_v19, 1  ;;  %222 = vst.msk [vmem:[#allocation2 + $0xb8] sm:$0x3] %vm200_vm2, %v7046_v2  ;;  %v712_v24 = vrot.slane %v4872_v23, 1  ;;  %v4877_v25 = vld [vmem:[#allocation2 + $0x10] sm:$0x3] }
  0x43   : > { %228 = vst.msk [vmem:[#allocation2 + $0xe8] sm:$0x3] %vm200_vm2, %v7046_v2  ;;  %v672_v28 = vrot.slane %v4877_v25, 1 }
  0x44   : > { %7129 = vst [vmem:[#allocation7_spill] sm:$0xff] %v4867_v21  ;;  %4129 = vmatmul.msk.bf16.vlgmr.msra.gmra.mxu2 %vm197_vm1, %v4867_v21  ;;  %v711_v26 = vsel %vm668_vm3, %v709_v20, %v710_v22  ;;  %v713_v29 = vsel %vm668_vm3, %v710_v22, %v712_v24  ;;  %v331_v20 = vld [vmem:[%s4824_s13 + $0xb0] sm:$0xff]  ;;  %v332_v22 = vld [vmem:[%s4824_s13 + $0xb8] sm:$0xff] }
  0x45   : > { %231 = vst.msk [vmem:[#allocation2 + $0x100] sm:$0x3] %vm200_vm2, %v7046_v2  ;;  %v4891_v30 = vpack.c.bf16 %v713_v29, %v711_v26  ;;  %v673_v31 = vsel %vm668_vm3, %v670_v17, %v672_v28 }
  0x46   : > { %234 = vst.msk [vmem:[#allocation2 + $0x118] sm:$0x3] %vm200_vm2, %v7046_v2  ;;  %v781_v32 = vpack.c.bf16 %v673_v31, %v671_v27 }
  0x47   : > { %237 = vst.msk [vmem:[#allocation2 + $0x130] sm:$0x3] %vm200_vm2, %v7046_v2  ;;  %4146 = vmatmul.msk.bf16.vlgmr.msra.gmra.mxu3 %vm197_vm1, %v4891_v30 }
  0x48   : > { %7130 = vst [vmem:[#allocation8_spill] sm:$0xff] %v4891_v30  ;;  %4138 = vmatmul.msk.bf16.vlgmr.msra.gmra.mxu1 %vm197_vm1, %v781_v32 }
  0x49   : > { %240 = vst.msk [vmem:[#allocation2 + $0x148] sm:$0x3] %vm200_vm2, %v7046_v2 }
  0x4a   : > { %243 = vst.msk [vmem:[#allocation2 + $0x160] sm:$0x3] %vm200_vm2, %v7046_v2 }
  0x4b   : > { %246 = vst.msk [vmem:[#allocation2 + $0x178] sm:$0x3] %vm200_vm2, %v7046_v2 }
  0x4c   : > { %249 = vst.msk [vmem:[#allocation2 + $0x190] sm:$0x3] %vm200_vm2, %v7046_v2 }
  0x4d   : > { %252 = vst.msk [vmem:[#allocation2 + $0x1a8] sm:$0x3] %vm200_vm2, %v7046_v2 }
  0x4e   : > { %342 = vst.msk [vmem:[#allocation2 + $0x19] sm:$0xff] %vm197_vm1, %v309_v33 }
  0x4f   : > { %343 = vst.msk [vmem:[#allocation2 + $0x21] sm:$0xff] %vm197_vm1, %v310_v34  ;;  %v317_v34 = vld [vmem:[%s4824_s13 + $0x40] sm:$0xff] }
  0x50   : > { %358 = vst.msk [vmem:[#allocation2 + $0xd9] sm:$0xff] %vm197_vm1, %v325_v35 }
  0x51   : > { %359 = vst.msk [vmem:[#allocation2 + $0xe1] sm:$0xff] %vm197_vm1, %v326_v36  ;;  %v318_v36 = vld [vmem:[%s4824_s13 + $0x48] sm:$0xff] }
  0x52   : > { %344 = vst.msk [vmem:[#allocation2 + $0x31] sm:$0xff] %vm197_vm1, %v311_v37 }
  0x53   : > { %345 = vst.msk [vmem:[#allocation2 + $0x39] sm:$0xff] %vm197_vm1, %v312_v38 }
  0x54   : > { %360 = vst.msk [vmem:[#allocation2 + $0xf1] sm:$0xff] %vm197_vm1, %v327_v39 }
  0x55   : > { %v4924_v43 = vld [vmem:[#allocation2 + $0x18] sm:$0xff]  ;;  %361 = vst.msk [vmem:[#allocation2 + $0xf9] sm:$0xff] %vm197_vm1, %v328_v40 }
  0x56   : > { %v4927_v44 = vld [vmem:[#allocation2 + $0x20] sm:$0xff]  ;;  %v674_v45 = vrot.slane %v4924_v43, 1  ;;  %v4930_v46 = vld [vmem:[#allocation2 + $0x28] sm:$0x3]  ;;  %346 = vst.msk [vmem:[#allocation2 + $0x49] sm:$0xff] %vm197_vm1, %v313_v41 }
  0x57   : > { %v4936_v48 = vpack.c.bf16 %v4927_v44, %v4924_v43  ;;  %v675_v49 = vrot.slane %v4927_v44, 1  ;;  %v4939_v50 = vld [vmem:[#allocation2 + $0xd8] sm:$0xff]  ;;  %v677_v51 = vrot.slane %v4930_v46, 1  ;;  %347 = vst.msk [vmem:[#allocation2 + $0x51] sm:$0xff] %vm197_vm1, %v314_v42 }
  0x58   : > { %v4944_v53 = vld [vmem:[#allocation2 + $0xe0] sm:$0xff]  ;;  %v714_v54 = vrot.slane %v4939_v50, 1  ;;  %v4947_v55 = vld [vmem:[#allocation2 + $0xe8] sm:$0x3]  ;;  %362 = vst.msk [vmem:[#allocation2 + $0x109] sm:$0xff] %vm197_vm1, %v329_v47 }
  0x59   : > { %4122 = vmatmul.msk.bf16.gmra.mxu0 %vm197_vm1, %v4936_v48  ;;  %v4953_v56 = vpack.c.bf16 %v4944_v53, %v4939_v50  ;;  %v715_v57 = vrot.slane %v4944_v53, 1  ;;  %v717_v58 = vrot.slane %v4947_v55, 1  ;;  %v676_v59 = vsel %vm668_vm3, %v674_v45, %v675_v49  ;;  %363 = vst.msk [vmem:[#allocation2 + $0x111] sm:$0xff] %vm197_vm1, %v330_v52  ;;  %v4984_v10 = vld [vmem:[#allocation2 + $0x30] sm:$0xff] }
  0x5a   : > { %v678_v60 = vsel %vm668_vm3, %v675_v49, %v677_v51  ;;  %v4973_v1 = vld [vmem:[#allocation2 + $0x40] sm:$0x3]  ;;  %348 = vst.msk [vmem:[#allocation2 + $0x61] sm:$0xff] %vm197_vm1, %v315_v5  ;;  %v4986_v11 = vld [vmem:[#allocation2 + $0x38] sm:$0xff]  ;;  %v679_v12 = vrot.slane %v4984_v10, 1 }
  0x5b   : > { %7131 = vst [vmem:[#allocation9_spill] sm:$0xff] %v4953_v56  ;;  %4130 = vmatmul.msk.bf16.gmra.mxu2 %vm197_vm1, %v4953_v56  ;;  %v716_v61 = vsel %vm668_vm3, %v714_v54, %v715_v57  ;;  %v718_v62 = vsel %vm668_vm3, %v715_v57, %v717_v58  ;;  %v4965_v63 = vpack.c.bf16 %v678_v60, %v676_v59  ;;  %v4977_v7 = vld [vmem:[#allocation2 + $0xf0] sm:$0xff]  ;;  %v680_v13 = vrot.slane %v4986_v11, 1  ;;  %v333_v54 = vld [vmem:[%s4824_s13 + $0xc0] sm:$0xff]  ;;  %v334_v57 = vld [vmem:[%s4824_s13 + $0xc8] sm:$0xff] }
  0x5c   : > { %v4967_v0 = vpack.c.bf16 %v718_v62, %v716_v61  ;;  %v4979_v8 = vld [vmem:[#allocation2 + $0xf8] sm:$0xff]  ;;  %v4981_v9 = vld [vmem:[#allocation2 + $0x100] sm:$0x3]  ;;  %349 = vst.msk [vmem:[#allocation2 + $0x69] sm:$0xff] %vm197_vm1, %v316_v6  ;;  %v682_v14 = vrot.slane %v4973_v1, 1  ;;  %v719_v15 = vrot.slane %v4977_v7, 1  ;;  %v4999_v24 = vpack.c.bf16 %v4986_v11, %v4984_v10 }
  0x5d   : > { %4139 = vmatmul.msk.bf16.gmra.mxu1 %vm197_vm1, %v4965_v63  ;;  %v720_v16 = vrot.slane %v4979_v8, 1  ;;  %v722_v17 = vrot.slane %v4981_v9, 1  ;;  %364 = vst.msk [vmem:[#allocation2 + $0x121] sm:$0xff] %vm197_vm1, %v331_v20  ;;  %v681_v26 = vsel %vm668_vm3, %v679_v12, %v680_v13  ;;  %v5007_v28 = vpack.c.bf16 %v4979_v8, %v4977_v7  ;;  %v5035_v40 = vld [vmem:[#allocation2 + $0x48] sm:$0xff] }
  0x5e   : > { %7132 = vst [vmem:[#allocation10_spill] sm:$0xff] %v4967_v0  ;;  %4147 = vmatmul.msk.bf16.gmra.mxu3 %vm197_vm1, %v4967_v0  ;;  %v683_v27 = vsel %vm668_vm3, %v680_v13, %v682_v14  ;;  %v5024_v35 = vld [vmem:[#allocation2 + $0x58] sm:$0x3]  ;;  %v5037_v41 = vld [vmem:[#allocation2 + $0x50] sm:$0xff]  ;;  %v684_v42 = vrot.slane %v5035_v40, 1 }
  0x5f   : > { %365 = vst.msk [vmem:[#allocation2 + $0x129] sm:$0xff] %vm197_vm1, %v332_v22  ;;  %v721_v29 = vsel %vm668_vm3, %v719_v15, %v720_v16  ;;  %v723_v31 = vsel %vm668_vm3, %v720_v16, %v722_v17  ;;  %v5013_v32 = vpack.c.bf16 %v683_v27, %v681_v26  ;;  %v5028_v37 = vld [vmem:[#allocation2 + $0x108] sm:$0xff]  ;;  %v685_v45 = vrot.slane %v5037_v41, 1  ;;  %v319_v13 = vld [vmem:[%s4824_s13 + $0x50] sm:$0xff]  ;;  %v320_v15 = vld [vmem:[%s4824_s13 + $0x58] sm:$0xff] }
  0x60   : > { %7133 = vst [vmem:[#allocation11_spill] sm:$0xff] %v5007_v28  ;;  %v5015_v33 = vpack.c.bf16 %v723_v31, %v721_v29  ;;  %v5030_v38 = vld [vmem:[#allocation2 + $0x110] sm:$0xff]  ;;  %v5032_v39 = vld [vmem:[#allocation2 + $0x118] sm:$0x3]  ;;  %v687_v47 = vrot.slane %v5024_v35, 1  ;;  %v724_v49 = vrot.slane %v5028_v37, 1  ;;  %v5049_v58 = vpack.c.bf16 %v5037_v41, %v5035_v40 }
  0x61   : > { %350 = vst.msk [vmem:[#allocation2 + $0x79] sm:$0xff] %vm197_vm1, %v317_v34  ;;  %v725_v51 = vrot.slane %v5030_v38, 1  ;;  %v727_v52 = vrot.slane %v5032_v39, 1  ;;  %v686_v59 = vsel %vm668_vm3, %v684_v42, %v685_v45  ;;  %v5057_v61 = vpack.c.bf16 %v5030_v38, %v5028_v37  ;;  %v5085_v22 = vld [vmem:[#allocation2 + $0x60] sm:$0xff] }
  0x62   : > { %7134 = vst [vmem:[#allocation12_spill] sm:$0xff] %v5015_v33  ;;  %v688_v60 = vsel %vm668_vm3, %v685_v45, %v687_v47  ;;  %v689_v27 = vrot.slane %v5085_v22, 1  ;;  %v335_v45 = vld [vmem:[%s4824_s13 + $0xd0] sm:$0xff]  ;;  %v336_v47 = vld [vmem:[%s4824_s13 + $0xd8] sm:$0xff] }
  0x63   : > { %7135 = vst [vmem:[#allocation13_spill] sm:$0xff] %v5030_v38  ;;  %v726_v62 = vsel %vm668_vm3, %v724_v49, %v725_v51  ;;  %v728_v5 = vsel %vm668_vm3, %v725_v51, %v727_v52  ;;  %v5063_v6 = vpack.c.bf16 %v688_v60, %v686_v59  ;;  %v5074_v14 = vld [vmem:[#allocation2 + $0x70] sm:$0x3]  ;;  %v5087_v26 = vld [vmem:[#allocation2 + $0x68] sm:$0xff] }
  0x64   : > { %7136 = vst [vmem:[#allocation14_spill] sm:$0xff] %v5032_v39  ;;  %v5065_v12 = vpack.c.bf16 %v728_v5, %v726_v62  ;;  %v5078_v16 = vld [vmem:[#allocation2 + $0x120] sm:$0xff]  ;;  %v690_v29 = vrot.slane %v5087_v26, 1  ;;  %v692_v31 = vrot.slane %v5074_v14, 1  ;;  %v5099_v49 = vpack.c.bf16 %v5087_v26, %v5085_v22 }
  0x65   : > { %351 = vst.msk [vmem:[#allocation2 + $0x81] sm:$0xff] %vm197_vm1, %v318_v36  ;;  %v729_v34 = vrot.slane %v5078_v16, 1  ;;  %v321_v5 = vld [vmem:[%s4824_s13 + $0x60] sm:$0xff] }
  0x66   : > { %366 = vst.msk [vmem:[#allocation2 + $0x139] sm:$0xff] %vm197_vm1, %v333_v54  ;;  %v5080_v17 = vld [vmem:[#allocation2 + $0x128] sm:$0xff]  ;;  %v5082_v20 = vld [vmem:[#allocation2 + $0x130] sm:$0x3]  ;;  %v691_v51 = vsel %vm668_vm3, %v689_v27, %v690_v29  ;;  %v693_v52 = vsel %vm668_vm3, %v690_v29, %v692_v31 }
  0x67   : > { %367 = vst.msk [vmem:[#allocation2 + $0x141] sm:$0xff] %vm197_vm1, %v334_v57  ;;  %v730_v36 = vrot.slane %v5080_v17, 1  ;;  %v732_v42 = vrot.slane %v5082_v20, 1  ;;  %v5107_v54 = vpack.c.bf16 %v5080_v17, %v5078_v16  ;;  %v5113_v60 = vpack.c.bf16 %v693_v52, %v691_v51 }
  0x68   : > { %7137 = vst [vmem:[#allocation15_spill] sm:$0xff] %v5057_v61 }
  0x69   : > { %4123 = vmatmul.msk.bf16.gmra.mxu0 %vm197_vm1, %v4999_v24  ;;  %7138 = vst [vmem:[#allocation16_spill] sm:$0xff] %v5065_v12  ;;  %v731_v57 = vsel %vm668_vm3, %v729_v34, %v730_v36  ;;  %v733_v59 = vsel %vm668_vm3, %v730_v36, %v732_v42  ;;  %v5135_v34 = vld [vmem:[#allocation2 + $0x78] sm:$0xff] }
  0x6a   : > { %352 = vst.msk [vmem:[#allocation2 + $0x91] sm:$0xff] %vm197_vm1, %v319_v13  ;;  %v5115_v62 = vpack.c.bf16 %v733_v59, %v731_v57  ;;  %v694_v42 = vrot.slane %v5135_v34, 1  ;;  %v337_v59 = vld [vmem:[%s4824_s13 + $0xe0] sm:$0xff] }
  0x6b   : > { %4131 = vmatmul.msk.bf16.gmra.mxu2 %vm197_vm1, %v5007_v28  ;;  %7139 = vst [vmem:[#allocation17_spill] sm:$0xff] %v5078_v16 }
  0x6c   : > { %7140 = vst [vmem:[#allocation18_spill] sm:$0xff] %v5080_v17  ;;  %v5124_v13 = vld [vmem:[#allocation2 + $0x88] sm:$0x3]  ;;  %v5137_v36 = vld [vmem:[#allocation2 + $0x80] sm:$0xff] }
  0x6d   : > { %4140 = vmatmul.msk.bf16.gmra.mxu1 %vm197_vm1, %v5013_v32  ;;  %7141 = vst [vmem:[#allocation19_spill] sm:$0xff] %v5082_v20  ;;  %v5128_v27 = vld [vmem:[#allocation2 + $0x138] sm:$0xff]  ;;  %v975_v20 = vrot.slane %v4877_v25, 2 }
  0x6e   : > { %4148 = vmatmul.msk.bf16.gmra.mxu3 %vm197_vm1, %v5015_v33  ;;  %353 = vst.msk [vmem:[#allocation2 + $0x99] sm:$0xff] %vm197_vm1, %v320_v15  ;;  %v322_v15 = vld [vmem:[%s4824_s13 + $0x68] sm:$0xff]  ;;  %v5130_v29 = vld [vmem:[#allocation2 + $0x140] sm:$0xff]  ;;  %v734_v51 = vrot.slane %v5128_v27, 1 }
  0x6f   : > { %368 = vst.msk [vmem:[#allocation2 + $0x151] sm:$0xff] %vm197_vm1, %v335_v45  ;;  %v5132_v31 = vld [vmem:[#allocation2 + $0x148] sm:$0x3]  ;;  %v695_v45 = vrot.slane %v5137_v36, 1  ;;  %v735_v52 = vrot.slane %v5130_v29, 1 }
  0x70   : > { %369 = vst.msk [vmem:[#allocation2 + $0x159] sm:$0xff] %vm197_vm1, %v336_v47  ;;  %v697_v47 = vrot.slane %v5124_v13, 1  ;;  %v737_v57 = vrot.slane %v5132_v31, 1 }
  0x71   : > { %7142 = vst [vmem:[#allocation20_spill] sm:$0xff] %v5107_v54  ;;  %v696_v2 = vsel %vm668_vm3, %v694_v42, %v695_v45 }
  0x72   : > { %7143 = vst [vmem:[#allocation21_spill] sm:$0xff] %v5115_v62 }
  0x73   : > { %354 = vst.msk [vmem:[#allocation2 + $0xa9] sm:$0xff] %vm197_vm1, %v321_v5  ;;  %v338_v5 = vld [vmem:[%s4824_s13 + $0xe8] sm:$0xff] }
  0x74   : > { %7144 = vst [vmem:[#allocation22_spill] sm:$0xff] %v5128_v27 }
  0x75   : > { %7145 = vst [vmem:[#allocation23_spill] sm:$0xff] %v5130_v29  ;;  %v5173_v42 = vld [vmem:[#allocation2 + $0xa0] sm:$0x3] }
  0x76   : > { %7146 = vst [vmem:[#allocation24_spill] sm:$0xff] %v5132_v31  ;;  %v736_v31 = vsel %vm668_vm3, %v734_v51, %v735_v52 }
  0x77   : > { %355 = vst.msk [vmem:[#allocation2 + $0xb1] sm:$0xff] %vm197_vm1, %v322_v15  ;;  %v5149_v15 = vpack.c.bf16 %v5137_v36, %v5135_v34  ;;  %v5179_v51 = vld [vmem:[#allocation2 + $0x160] sm:$0x3] }
  0x78   : > { %370 = vst.msk [vmem:[#allocation2 + $0x169] sm:$0xff] %vm197_vm1, %v337_v59 }
  0x79   : > { %4124 = vmatmul.msk.bf16.gmra.mxu0 %vm197_vm1, %v5049_v58  ;;  %371 = vst.msk [vmem:[#allocation2 + $0x171] sm:$0xff] %vm197_vm1, %v338_v5 }
  0x7a   : > { %7151 = vst [vmem:[#allocation29_spill] sm:$0xff] %v5179_v51 }
  0x7b   : > { %4132 = vmatmul.msk.bf16.gmra.mxu2 %vm197_vm1, %v5057_v61  ;;  %v738_v61 = vsel %vm668_vm3, %v735_v52, %v737_v57  ;;  %v702_v52 = vrot.slane %v5173_v42, 1 }
  0x7c   : > { %v5165_v59 = vpack.c.bf16 %v738_v61, %v736_v31  ;;  %v5183_v61 = vld [vmem:[#allocation2 + $0x98] sm:$0xff] }
  0x7d   : > { %4141 = vmatmul.msk.bf16.gmra.mxu1 %vm197_vm1, %v5063_v6  ;;  %v700_v31 = vrot.slane %v5183_v61, 1 }
  0x7e   : > { %4149 = vmatmul.msk.bf16.gmra.mxu3 %vm197_vm1, %v5065_v12  ;;  %7148 = vst [vmem:[#allocation26_spill] sm:$0xff] %v5165_v59 }
  0x7f   : > { %v703_v16 = vsel %vm668_vm3, %v700_v31, %v702_v52 }
  0x80   : > { %v5237_v52 = vld [vmem:[#allocation2 + $0x178] sm:$0x3] }
  0x81   : > { %7155 = vst [vmem:[#allocation33_spill] sm:$0xff] %v5237_v52 }
  0x89   : > { %4125 = vmatmul.msk.bf16.gmra.mxu0 %vm197_vm1, %v5099_v49 }
  0x8b   : > { %4133 = vmatmul.msk.bf16.gmra.mxu2 %vm197_vm1, %v5107_v54  ;;  %v698_v54 = vsel %vm668_vm3, %v695_v45, %v697_v47  ;;  %v5175_v45 = vld [vmem:[#allocation2 + $0x150] sm:$0xff]  ;;  %v5177_v47 = vld [vmem:[#allocation2 + $0x158] sm:$0xff] }
  0x8c   : > { %v5163_v12 = vpack.c.bf16 %v698_v54, %v696_v2  ;;  %7149 = vst [vmem:[#allocation27_spill] sm:$0xff] %v5175_v45  ;;  %v5181_v2 = vld [vmem:[#allocation2 + $0x90] sm:$0xff]  ;;  %v739_v57 = vrot.slane %v5175_v45, 1  ;;  %v740_v5 = vrot.slane %v5177_v47, 1  ;;  %v5202_v28 = vpack.c.bf16 %v5177_v47, %v5175_v45 }
  0x8d   : > { %4142 = vmatmul.msk.bf16.gmra.mxu1 %vm197_vm1, %v5113_v60  ;;  %7150 = vst [vmem:[#allocation28_spill] sm:$0xff] %v5177_v47  ;;  %v699_v54 = vrot.slane %v5181_v2, 1 }
  0x8e   : > { %4150 = vmatmul.msk.bf16.gmra.mxu3 %vm197_vm1, %v5115_v62  ;;  %v5157_v62 = vpack.c.bf16 %v5130_v29, %v5128_v27  ;;  %v5194_v29 = vpack.c.bf16 %v5183_v61, %v5181_v2  ;;  %v973_v27 = vrot.slane %v4754_v4, 2  ;;  %7152 = vst [vmem:[#allocation30_spill] sm:$0xff] %v5202_v28 }
  0x8f   : > { %v701_v17 = vsel %vm668_vm3, %v699_v54, %v700_v31 }
  0x90   : > { %7147 = vst [vmem:[#allocation25_spill] sm:$0xff] %v5157_v62  ;;  %v5208_v33 = vpack.c.bf16 %v703_v16, %v701_v17  ;;  %v976_v54 = vsel %vm971_vm4, %v973_v27, %v975_v20  ;;  %v4239_v17 = vld [vmem:[%s7042_s1 + $0xe] sm:$0x3]  ;;  %v5230_v20 = vld [vmem:[#allocation2 + $0xb8] sm:$0x3] }
  0x99   : > { %4126 = vmatmul.msk.bf16.gmra.mxu0 %vm197_vm1, %v5149_v15 }
  0x9b   : > { %4134 = vmatmul.msk.bf16.gmra.mxu2 %vm197_vm1, %v5157_v62  ;;  %v742_v62 = vrot.slane %v5179_v51, 1  ;;  %v741_v51 = vsel %vm668_vm3, %v739_v57, %v740_v5  ;;  %v5239_v57 = vld [vmem:[#allocation2 + $0xa8] sm:$0xff] }
  0x9d   : > { %4143 = vmatmul.msk.bf16.gmra.mxu1 %vm197_vm1, %v5163_v12 }
  0x9e   : > { %4151 = vmatmul.msk.bf16.gmra.mxu3 %vm197_vm1, %v5165_v59  ;;  %v972_v59 = vrot.slane %v4750_v3, 2  ;;  %v743_v3 = vsel %vm668_vm3, %v740_v5, %v742_v62  ;;  %v4222_v62 = vld [vmem:[%s7042_s1 + $0xc] sm:$0x3]  ;;  %v5241_v5 = vld [vmem:[#allocation2 + $0xb0] sm:$0xff] }
  0x9f   : > { %v5210_v4 = vpack.c.bf16 %v743_v3, %v741_v51  ;;  %v1688_v16 = vsel %vm495_vm0, %v4222_v62, 0  ;;  %v5235_v51 = vld [vmem:[#allocation2 + $0x170] sm:$0xff]  ;;  %v704_v3 = vrot.slane %v5239_v57, 1  ;;  %v5254_v47 = vpack.c.bf16 %v5241_v5, %v5239_v57 }
  0xa0   : > { %v5213_v25 = vsel %vm971_vm4, %v972_v59, %v973_v27  ;;  %1697 = vmatpush.bf16.msra.mxu2 %v1688_v16  ;;  %v1828_v27 = vsel %vm495_vm0, %v4239_v17, 0  ;;  %v5233_v59 = vld [vmem:[#allocation2 + $0x168] sm:$0xff]  ;;  %7154 = vst [vmem:[#allocation32_spill] sm:$0xff] %v5235_v51  ;;  %v745_v16 = vrot.slane %v5235_v51, 1  ;;  %v747_v17 = vrot.slane %v5237_v52, 1 }
  0xa1   : > { %7153 = vst [vmem:[#allocation31_spill] sm:$0xff] %v5210_v4  ;;  %v1084_v31 = vpack.c.bf16 %v976_v54, %v5213_v25  ;;  %1837 = vmatpush.bf16.msra.mxu3 %v1828_v27  ;;  %v705_v25 = vrot.slane %v5241_v5, 1  ;;  %v707_v54 = vrot.slane %v5230_v20, 1  ;;  %v744_v62 = vrot.slane %v5233_v59, 1 }
  0xa2   : > { %v978_v27 = vrot.slane %v4927_v44, 2  ;;  %v5260_v38 = vpack.c.bf16 %v5235_v51, %v5233_v59  ;;  %v4205_v44 = vld [vmem:[%s7042_s1 + $0xa] sm:$0x3] }
  0xa3   : > { %v706_v45 = vsel %vm668_vm3, %v704_v3, %v705_v25  ;;  %v708_v39 = vsel %vm668_vm3, %v705_v25, %v707_v54  ;;  %v746_v52 = vsel %vm668_vm3, %v744_v62, %v745_v16  ;;  %v4256_v25 = vld [vmem:[%s7042_s1 + $0x10] sm:$0x3] }
  0xa4   : > { %7156 = vst [vmem:[#allocation34_spill] sm:$0xff] %v5260_v38  ;;  %v5270_v3 = vpack.c.bf16 %v708_v39, %v706_v45  ;;  %v508_v39 = vpop.f32.mrf.mxu0  ;;  %v982_v45 = vrot.slane %v4984_v10, 2 }
  0xa9   : > { %4127 = vmatmul.msk.bf16.gmra.mxu0 %vm197_vm1, %v5194_v29 }
  0xab   : > { %4135 = vmatmul.msk.bf16.gmra.mxu2 %vm197_vm1, %v5202_v28  ;;  %v977_v28 = vrot.slane %v4924_v43, 2  ;;  %v748_v43 = vsel %vm668_vm3, %v745_v16, %v747_v17  ;;  %v1965_v17 = vsel %vm495_vm0, %v4256_v25, 0 }
  0xac   : > { %v5277_v16 = vpack.c.bf16 %v748_v43, %v746_v52  ;;  %1974 = vmatpush.bf16.msra.mxu0 %v1965_v17 }
  0xad   : > { %4144 = vmatmul.msk.bf16.gmra.mxu1 %vm197_vm1, %v5208_v33  ;;  %v979_v54 = vsel %vm971_vm4, %v977_v28, %v978_v27  ;;  %v5289_v28 = vld [vmem:[%s7044_s3] ss:$0 sm:$0xff] }
  0xae   : > { %4152 = vmatmul.msk.bf16.gmra.mxu3 %vm197_vm1, %v5210_v4  ;;  %v980_v4 = vrot.slane %v4930_v46, 2  ;;  %v1558_v46 = vsel %vm495_vm0, %v4205_v44, 0  ;;  %7157 = vst [vmem:[#allocation35_spill] sm:$0xff] %v5277_v16  ;;  %v588_v52 = vadd.f32 %v5289_v28, %v508_v39 }
  0xaf   : > { %1567 = vmatpush.bf16.msrb.mxu1 %v1558_v46 }
  0xb0   : > { %v981_v62 = vsel %vm971_vm4, %v978_v27, %v980_v4  ;;  %v983_v4 = vrot.slane %v4986_v11, 2  ;;  %v985_v27 = vrot.slane %v4973_v1, 2  ;;  %v5305_v11 = vpop.f32.mrf.mxu0 }
  0xb1   : > { %v1085_v51 = vpack.c.bf16 %v981_v62, %v979_v54 }
  0xb2   : > { %v984_v25 = vsel %vm971_vm4, %v982_v45, %v983_v4  ;;  %v986_v54 = vsel %vm971_vm4, %v983_v4, %v985_v27  ;;  %v987_v4 = vrot.slane %v5035_v40, 2 }
  0xb3   : > { %v5302_v10 = vpack.c.bf16 %v986_v54, %v984_v25  ;;  %v990_v25 = vrot.slane %v5024_v35, 2 }
  0xb9   : > { %4128 = vmatmul.msk.bf16.gmra.mxu0 %vm197_vm1, %v5254_v47 }
  0xbb   : > { %4136 = vmatmul.msk.bf16.gmra.mxu2 %vm197_vm1, %v5260_v38 }
  0xbd   : > { %4145 = vmatmul.msk.bf16.gmra.mxu1 %vm197_vm1, %v5270_v3 }
  0xbe   : > { %4153 = vmatmul.msk.bf16.gmra.mxu3 %vm197_vm1, %v5277_v16 }
  0xc5   : > { %v859_v43 = vpop.f32.mrf.mxu1 }
  0xc6   : > { %v5297_v44 = vadd.f32 %v859_v43, %v588_v52  ;;  %v988_v52 = vrot.slane %v5037_v41, 2 }
  0xc7   : > { %v548_v46 = vpop.f32.mrf.mxu2 }
  0xc8   : > { %v604_v62 = vadd.f32 %v5289_v28, %v548_v46  ;;  %v991_v54 = vsel %vm971_vm4, %v988_v52, %v990_v25 }
  0xc9   : > { %4189 = vmatmul.msk.bf16.vlgmr.msrb.gmra.mxu0 %vm197_vm1, %v4965_v63 }
  0xca   : > { %v899_v1 = vpop.f32.mrf.mxu3 }
  0xcb   : > { %4155 = vmatmul.msk.bf16.vlgmr.msrb.gmra.mxu2 %vm197_vm1, %v1084_v31  ;;  %v5310_v63 = vadd.f32 %v899_v1, %v604_v62 }
  0xcd   : > { %4206 = vmatmul.msk.bf16.vlgmr.msrb.gmra.mxu1 %vm197_vm1, %v1085_v51  ;;  %v5312_v17 = vpop.f32.mrf.mxu1 }
  0xce   : > { %4172 = vmatmul.msk.bf16.vlgmr.msrb.gmra.mxu3 %vm197_vm1, %v4936_v48  ;;  %v989_v48 = vsel %vm971_vm4, %v987_v4, %v988_v52 }
  0xcf   : > { %v550_v39 = vpop.f32.mrf.mxu2  ;;  %v5325_v1 = vpack.c.bf16 %v991_v54, %v989_v48 }
  0xd0   : > { %v605_v45 = vadd.f32 %v5289_v28, %v550_v39 }
  0xd2   : > { %v901_v31 = vpop.f32.mrf.mxu3 }
  0xd3   : > { %v5317_v43 = vadd.f32 %v901_v31, %v605_v45 }
  0xd6   : > { %v513_v27 = vpop.f32.mrf.mxu0 }
  0xd7   : > { %v590_v46 = vadd.f32 %v5289_v28, %v513_v27 }
  0xd9   : > { %4190 = vmatmul.msk.bf16.gmra.mxu0 %vm197_vm1, %v5013_v32 }
  0xda   : > { %v864_v62 = vpop.f32.mrf.mxu1 }
  0xdb   : > { %4156 = vmatmul.msk.bf16.gmra.mxu2 %vm197_vm1, %v1085_v51  ;;  %v5328_v40 = vadd.f32 %v864_v62, %v590_v46  ;;  %v992_v51 = vrot.slane %v5085_v22, 2  ;;  %v993_v46 = vrot.slane %v5087_v26, 2 }
  0xdd   : > { %4207 = vmatmul.msk.bf16.gmra.mxu1 %vm197_vm1, %v5302_v10 }
  0xde   : > { %v515_v41 = vpop.f32.mrf.mxu0  ;;  %v553_v39 = vpop.f32.mrf.mxu2  ;;  %4173 = vmatmul.msk.bf16.gmra.mxu3 %vm197_vm1, %v4999_v24 }
  0xdf   : > { %v591_v35 = vadd.f32 %v5289_v28, %v515_v41  ;;  %v606_v45 = vadd.f32 %v5289_v28, %v553_v39  ;;  %v995_v41 = vrot.slane %v5074_v14, 2 }
  0xe1   : > { %v904_v4 = vpop.f32.mrf.mxu3 }
  0xe2   : > { %v5336_v52 = vadd.f32 %v904_v4, %v606_v45  ;;  %v866_v31 = vpop.f32.mrf.mxu1  ;;  %v994_v45 = vsel %vm971_vm4, %v992_v51, %v993_v46 }
  0xe3   : > { %v5338_v27 = vadd.f32 %v866_v31, %v591_v35  ;;  %v996_v35 = vsel %vm971_vm4, %v993_v46, %v995_v41 }
  0xe4   : > { %7158 = vst [vmem:[#allocation36_spill] sm:$0xff] %v5336_v52  ;;  %v5351_v26 = vpack.c.bf16 %v996_v35, %v994_v45  ;;  %v998_v45 = vrot.slane %v5137_v36, 2  ;;  %v1000_v35 = vrot.slane %v5124_v13, 2 }
  0xe6   : > { %v518_v25 = vpop.f32.mrf.mxu0  ;;  %v555_v48 = vpop.f32.mrf.mxu2 }
  0xe7   : > { %v592_v54 = vadd.f32 %v5289_v28, %v518_v25  ;;  %v607_v62 = vadd.f32 %v5289_v28, %v555_v48 }
  0xe9   : > { %4191 = vmatmul.msk.bf16.gmra.mxu0 %vm197_vm1, %v5063_v6  ;;  %v906_v39 = vpop.f32.mrf.mxu3 }
  0xea   : > { %v5349_v4 = vadd.f32 %v906_v39, %v607_v62  ;;  %v869_v22 = vpop.f32.mrf.mxu1 }
  0xeb   : > { %4157 = vmatmul.msk.bf16.gmra.mxu2 %vm197_vm1, %v5302_v10  ;;  %v5355_v31 = vadd.f32 %v869_v22, %v592_v54  ;;  %v997_v54 = vrot.slane %v5135_v34, 2 }
  0xec   : > { %7159 = vst [vmem:[#allocation37_spill] sm:$0xff] %v5349_v4 }
  0xed   : > { %4208 = vmatmul.msk.bf16.gmra.mxu1 %vm197_vm1, %v5325_v1 }
  0xee   : > { %v520_v14 = vpop.f32.mrf.mxu0  ;;  %v558_v25 = vpop.f32.mrf.mxu2  ;;  %4174 = vmatmul.msk.bf16.gmra.mxu3 %vm197_vm1, %v5049_v58 }
  0xef   : > { %v593_v51 = vadd.f32 %v5289_v28, %v520_v14  ;;  %v608_v46 = vadd.f32 %v5289_v28, %v558_v25 }
  0xf1   : > { %v909_v48 = vpop.f32.mrf.mxu3 }
  0xf2   : > { %v5363_v62 = vadd.f32 %v909_v48, %v608_v46  ;;  %v871_v41 = vpop.f32.mrf.mxu1  ;;  %v999_v46 = vsel %vm971_vm4, %v997_v54, %v998_v45 }
  0xf3   : > { %v5365_v39 = vadd.f32 %v871_v41, %v593_v51  ;;  %v1001_v51 = vsel %vm971_vm4, %v998_v45, %v1000_v35 }
  0xf4   : > { %7160 = vst [vmem:[#allocation38_spill] sm:$0xff] %v5363_v62  ;;  %v5378_v36 = vpack.c.bf16 %v1001_v51, %v999_v46  ;;  %v1003_v46 = vrot.slane %v5183_v61, 2  ;;  %v1005_v51 = vrot.slane %v5173_v42, 2 }
  0xf6   : > { %v523_v22 = vpop.f32.mrf.mxu0  ;;  %v560_v4 = vpop.f32.mrf.mxu2 }
  0xf7   : > { %v594_v52 = vadd.f32 %v5289_v28, %v523_v22  ;;  %v609_v14 = vadd.f32 %v5289_v28, %v560_v4 }
  0xf9   : > { %4192 = vmatmul.msk.bf16.gmra.mxu0 %vm197_vm1, %v5113_v60  ;;  %v911_v25 = vpop.f32.mrf.mxu3 }
  0xfa   : > { %v5376_v48 = vadd.f32 %v911_v25, %v609_v14  ;;  %v874_v34 = vpop.f32.mrf.mxu1 }
  0xfb   : > { %4158 = vmatmul.msk.bf16.gmra.mxu2 %vm197_vm1, %v5325_v1  ;;  %v5382_v13 = vadd.f32 %v874_v34, %v594_v52  ;;  %v1002_v52 = vrot.slane %v5181_v2, 2 }
  0xfc   : > { %7161 = vst [vmem:[#allocation39_spill] sm:$0xff] %v5376_v48 }
  0xfd   : > { %4209 = vmatmul.msk.bf16.gmra.mxu1 %vm197_vm1, %v5351_v26 }
  0xfe   : > { %v525_v4 = vpop.f32.mrf.mxu0  ;;  %v563_v41 = vpop.f32.mrf.mxu2  ;;  %4175 = vmatmul.msk.bf16.gmra.mxu3 %vm197_vm1, %v5099_v49 }
  0xff   : > { %v595_v54 = vadd.f32 %v5289_v28, %v525_v4  ;;  %v610_v45 = vadd.f32 %v5289_v28, %v563_v41 }
 0x101   : > { %v914_v35 = vpop.f32.mrf.mxu3 }
 0x102   : > { %v5390_v22 = vadd.f32 %v914_v35, %v610_v45  ;;  %v876_v14 = vpop.f32.mrf.mxu1  ;;  %v1004_v45 = vsel %vm971_vm4, %v1002_v52, %v1003_v46 }
 0x103   : > { %v5392_v25 = vadd.f32 %v876_v14, %v595_v54  ;;  %v1006_v54 = vsel %vm971_vm4, %v1003_v46, %v1005_v51 }
 0x104   : > { %7162 = vst [vmem:[#allocation40_spill] sm:$0xff] %v5390_v22  ;;  %v5405_v61 = vpack.c.bf16 %v1006_v54, %v1004_v45  ;;  %v1008_v45 = vrot.slane %v5241_v5, 2  ;;  %v1010_v54 = vrot.slane %v5230_v20, 2 }
 0x106   : > { %v528_v34 = vpop.f32.mrf.mxu0  ;;  %v565_v48 = vpop.f32.mrf.mxu2 }
 0x107   : > { %v596_v62 = vadd.f32 %v5289_v28, %v528_v34  ;;  %v611_v4 = vadd.f32 %v5289_v28, %v565_v48 }
 0x109   : > { %4193 = vmatmul.msk.bf16.gmra.mxu0 %vm197_vm1, %v5163_v12  ;;  %v916_v41 = vpop.f32.mrf.mxu3 }
 0x10a   : > { %v5403_v35 = vadd.f32 %v916_v41, %v611_v4  ;;  %v879_v2 = vpop.f32.mrf.mxu1 }
 0x10b   : > { %4159 = vmatmul.msk.bf16.gmra.mxu2 %vm197_vm1, %v5351_v26  ;;  %v5409_v42 = vadd.f32 %v879_v2, %v596_v62  ;;  %v1007_v62 = vrot.slane %v5239_v57, 2 }
 0x10c   : > { %7163 = vst [vmem:[#allocation41_spill] sm:$0xff] %v5403_v35 }
 0x10d   : > { %4210 = vmatmul.msk.bf16.gmra.mxu1 %vm197_vm1, %v5378_v36 }
 0x10e   : > { %v530_v48 = vpop.f32.mrf.mxu0  ;;  %v568_v14 = vpop.f32.mrf.mxu2  ;;  %4176 = vmatmul.msk.bf16.gmra.mxu3 %vm197_vm1, %v5149_v15 }
 0x10f   : > { %v597_v52 = vadd.f32 %v5289_v28, %v530_v48  ;;  %v612_v46 = vadd.f32 %v5289_v28, %v568_v14 }
 0x111   : > { %v919_v51 = vpop.f32.mrf.mxu3 }
 0x112   : > { %v5417_v34 = vadd.f32 %v919_v51, %v612_v46  ;;  %v881_v4 = vpop.f32.mrf.mxu1  ;;  %v1009_v46 = vsel %vm971_vm4, %v1007_v62, %v1008_v45 }
 0x113   : > { %v5419_v41 = vadd.f32 %v881_v4, %v597_v52  ;;  %v1011_v52 = vsel %vm971_vm4, %v1008_v45, %v1010_v54 }
 0x114   : > { %7164 = vst [vmem:[#allocation42_spill] sm:$0xff] %v5417_v34  ;;  %v5432_v5 = vpack.c.bf16 %v1011_v52, %v1009_v46  ;;  %v1013_v46 = vrot.slane %v4860_v19, 2  ;;  %v1015_v52 = vrot.slane %v4872_v23, 2 }
 0x116   : > { %v533_v2 = vpop.f32.mrf.mxu0  ;;  %v570_v35 = vpop.f32.mrf.mxu2 }
 0x117   : > { %v598_v22 = vadd.f32 %v5289_v28, %v533_v2  ;;  %v613_v48 = vadd.f32 %v5289_v28, %v570_v35 }
 0x119   : > { %4194 = vmatmul.msk.bf16.gmra.mxu0 %vm197_vm1, %v5208_v33  ;;  %v921_v14 = vpop.f32.mrf.mxu3 }
 0x11a   : > { %v5430_v51 = vadd.f32 %v921_v14, %v613_v48  ;;  %v884_v57 = vpop.f32.mrf.mxu1 }
 0x11b   : > { %4160 = vmatmul.msk.bf16.gmra.mxu2 %vm197_vm1, %v5378_v36  ;;  %v5436_v20 = vadd.f32 %v884_v57, %v598_v22  ;;  %v1012_v22 = vrot.slane %v4856_v18, 2 }
 0x11c   : > { %7165 = vst [vmem:[#allocation43_spill] sm:$0xff] %v5430_v51 }
 0x11d   : > { %4211 = vmatmul.msk.bf16.gmra.mxu1 %vm197_vm1, %v5405_v61 }
 0x11e   : > { %v535_v35 = vpop.f32.mrf.mxu0  ;;  %v573_v4 = vpop.f32.mrf.mxu2  ;;  %4177 = vmatmul.msk.bf16.gmra.mxu3 %vm197_vm1, %v5194_v29 }
 0x11f   : > { %v599_v62 = vadd.f32 %v5289_v28, %v535_v35  ;;  %v614_v45 = vadd.f32 %v5289_v28, %v573_v4 }
 0x121   : > { %v924_v54 = vpop.f32.mrf.mxu3 }
 0x122   : > { %v5444_v2 = vadd.f32 %v924_v54, %v614_v45  ;;  %v886_v48 = vpop.f32.mrf.mxu1  ;;  %v1014_v45 = vsel %vm971_vm4, %v1012_v22, %v1013_v46 }
 0x123   : > { %v5446_v14 = vadd.f32 %v886_v48, %v599_v62  ;;  %v1016_v62 = vsel %vm971_vm4, %v1013_v46, %v1015_v52 }
 0x124   : > { %7166 = vst [vmem:[#allocation44_spill] sm:$0xff] %v5444_v2  ;;  %v5459_v19 = vpack.c.bf16 %v1016_v62, %v1014_v45  ;;  %v1018_v45 = vrot.slane %v4944_v53, 2  ;;  %v1020_v62 = vrot.slane %v4947_v55, 2 }
 0x126   : > { %v538_v57 = vpop.f32.mrf.mxu0  ;;  %v575_v51 = vpop.f32.mrf.mxu2 }
 0x127   : > { %v600_v34 = vadd.f32 %v5289_v28, %v538_v57  ;;  %v615_v35 = vadd.f32 %v5289_v28, %v575_v51 }
 0x129   : > { %4195 = vmatmul.msk.bf16.gmra.mxu0 %vm197_vm1, %v5270_v3  ;;  %v926_v4 = vpop.f32.mrf.mxu3 }
 0x12a   : > { %v5457_v54 = vadd.f32 %v926_v4, %v615_v35  ;;  %v889_v18 = vpop.f32.mrf.mxu1 }
 0x12b   : > { %4161 = vmatmul.msk.bf16.gmra.mxu2 %vm197_vm1, %v5405_v61  ;;  %v5463_v23 = vadd.f32 %v889_v18, %v600_v34  ;;  %v1017_v34 = vrot.slane %v4939_v50, 2 }
 0x12c   : > { %7167 = vst [vmem:[#allocation45_spill] sm:$0xff] %v5457_v54 }
 0x12d   : > { %4212 = vmatmul.msk.bf16.gmra.mxu1 %vm197_vm1, %v5432_v5 }
 0x12e   : > { %v540_v51 = vpop.f32.mrf.mxu0  ;;  %v578_v48 = vpop.f32.mrf.mxu2  ;;  %4178 = vmatmul.msk.bf16.gmra.mxu3 %vm197_vm1, %v5254_v47 }
 0x12f   : > { %v601_v22 = vadd.f32 %v5289_v28, %v540_v51  ;;  %v616_v46 = vadd.f32 %v5289_v28, %v578_v48 }
 0x131   : > { %v929_v52 = vpop.f32.mrf.mxu3 }
 0x132   : > { %v5471_v57 = vadd.f32 %v929_v52, %v616_v46  ;;  %v891_v35 = vpop.f32.mrf.mxu1  ;;  %v1019_v46 = vsel %vm971_vm4, %v1017_v34, %v1018_v45  ;;  %v4528_v34 = vld [vmem:[%s7043_s2 + $0x8] sm:$0xff] }
 0x133   : > { %v5473_v4 = vadd.f32 %v891_v35, %v601_v22  ;;  %v1021_v22 = vsel %vm971_vm4, %v1018_v45, %v1020_v62  ;;  %2295 = vmatpush.bf16.msra.mxu1 %v4528_v34 }
 0x134   : > { %7168 = vst [vmem:[#allocation46_spill] sm:$0xff] %v5471_v57  ;;  %v5486_v53 = vpack.c.bf16 %v1021_v22, %v1019_v46  ;;  %v1022_v46 = vrot.slane %v4977_v7, 2  ;;  %v1023_v22 = vrot.slane %v4979_v8, 2 }
 0x136   : > { %v543_v18 = vpop.f32.mrf.mxu0  ;;  %v580_v54 = vpop.f32.mrf.mxu2 }
 0x137   : > { %v602_v2 = vadd.f32 %v5289_v28, %v543_v18  ;;  %v617_v51 = vadd.f32 %v5289_v28, %v580_v54 }
 0x139   : > { %4196 = vmatmul.msk.bf16.gmra.mxu0 %vm197_vm1, %v4891_v30  ;;  %v931_v48 = vpop.f32.mrf.mxu3 }
 0x13a   : > { %v5484_v52 = vadd.f32 %v931_v48, %v617_v51  ;;  %v894_v50 = vpop.f32.mrf.mxu1 }
 0x13b   : > { %4162 = vmatmul.msk.bf16.gmra.mxu2 %vm197_vm1, %v5432_v5  ;;  %v5490_v55 = vadd.f32 %v894_v50, %v602_v2  ;;  %v1025_v50 = vrot.slane %v4981_v9, 2 }
 0x13c   : > { %7169 = vst [vmem:[#allocation47_spill] sm:$0xff] %v5484_v52 }
 0x13d   : > { %4213 = vmatmul.msk.bf16.gmra.mxu1 %vm197_vm1, %v5459_v19  ;;  %v1026_v34 = vsel %vm971_vm4, %v1023_v22, %v1025_v50  ;;  %v1027_v50 = vrot.slane %v5028_v37, 2 }
 0x13e   : > { %v545_v54 = vpop.f32.mrf.mxu0  ;;  %v583_v35 = vpop.f32.mrf.mxu2  ;;  %4179 = vmatmul.msk.bf16.gmra.mxu3 %vm197_vm1, %v4867_v21 }
 0x13f   : > { %v603_v45 = vadd.f32 %v5289_v28, %v545_v54  ;;  %v618_v62 = vadd.f32 %v5289_v28, %v583_v35  ;;  %v1024_v35 = vsel %vm971_vm4, %v1022_v46, %v1023_v22 }
 0x140   : > { %v5515_v7 = vpack.c.bf16 %v1026_v34, %v1024_v35  ;;  %v7173_v34 = vld [vmem:[#allocation14_spill] sm:$0xff] }
 0x141   : > { %v934_v18 = vpop.f32.mrf.mxu3 }
 0x142   : > { %v5501_v2 = vadd.f32 %v934_v18, %v618_v62  ;;  %v896_v51 = vpop.f32.mrf.mxu1 }
 0x143   : > { %v5503_v48 = vadd.f32 %v896_v51, %v603_v45 }
 0x144   : > { %7170 = vst [vmem:[#allocation48_spill] sm:$0xff] %v5501_v2 }
 0x146   : > { %v1432_v52 = vpop.f32.mrf.mxu0  ;;  %v585_v57 = vpop.f32.mrf.mxu2 }
 0x147   : > { %v619_v30 = vadd.f32 %v5289_v28, %v585_v57 }
 0x149   : > { %4197 = vmatmul.msk.bf16.gmra.mxu0 %vm197_vm1, %v4967_v0  ;;  %v936_v54 = vpop.f32.mrf.mxu3 }
 0x14a   : > { %v5513_v45 = vadd.f32 %v936_v54, %v619_v30  ;;  %v1569_v62 = vpop.f32.mrf.mxu1  ;;  %v589_v30 = vadd.f32 %v5289_v28, %v5305_v11  ;;  %v7172_v54 = vld [vmem:[#allocation13_spill] sm:$0xff] }
 0x14b   : > { %4163 = vmatmul.msk.bf16.gmra.mxu2 %vm197_vm1, %v5459_v19  ;;  %v1028_v35 = vrot.slane %v7172_v54, 2 }
 0x14c   : > { %7171 = vst [vmem:[#allocation49_spill] sm:$0xff] %v5513_v45  ;;  %v1030_v45 = vrot.slane %v7173_v34, 2  ;;  %v940_v2 = vadd.f32 %v5312_v17, %v589_v30  ;;  %v7176_v30 = vld [vmem:[#allocation11_spill] sm:$0xff] }
 0x14d   : > { %4214 = vmatmul.msk.bf16.gmra.mxu1 %vm197_vm1, %v5486_v53  ;;  %v1029_v11 = vsel %vm971_vm4, %v1027_v50, %v1028_v35 }
 0x14e   : > { %v1434_v8 = vpop.f32.mrf.mxu0  ;;  %v1162_v9 = vpop.f32.mrf.mxu2  ;;  %4180 = vmatmul.msk.bf16.gmra.mxu3 %vm197_vm1, %v4953_v56 }
 0x14f   : > { %v1242_v57 = vadd.f32 %v1162_v9, %v5297_v44  ;;  %v7174_v9 = vld [vmem:[#allocation12_spill] sm:$0xff] }
 0x151   : > { %v1292_v18 = vpop.f32.mrf.mxu3 }
 0x152   : > { %v1372_v51 = vadd.f32 %v1292_v18, %v1242_v57  ;;  %v1571_v46 = vpop.f32.mrf.mxu1 }
 0x154   : > { %v1512_v22 = vadd.f32 %v1432_v52, %v1372_v51  ;;  %v1031_v52 = vsel %vm971_vm4, %v1028_v35, %v1030_v45  ;;  %v7177_v35 = vld [vmem:[#allocation17_spill] sm:$0xff] }
 0x155   : > { %v5536_v18 = vpack.c.bf16 %v1031_v52, %v1029_v11  ;;  %v1032_v34 = vrot.slane %v7177_v35, 2 }
 0x156   : > { %v1437_v0 = vpop.f32.mrf.mxu0  ;;  %v5530_v21 = vadd.f32 %v1569_v62, %v1512_v22  ;;  %v1164_v56 = vpop.f32.mrf.mxu2 }
 0x157   : > { %v1243_v44 = vadd.f32 %v1164_v56, %v940_v2 }
 0x159   : > { %4198 = vmatmul.msk.bf16.gmra.mxu0 %vm197_vm1, %v7174_v9  ;;  %v1294_v28 = vpop.f32.mrf.mxu3 }
 0x15a   : > { %v1373_v37 = vadd.f32 %v1294_v28, %v1243_v44  ;;  %v1574_v57 = vpop.f32.mrf.mxu1  ;;  %v7178_v44 = vld [vmem:[#allocation18_spill] sm:$0xff]  ;;  %v7179_v28 = vld [vmem:[#allocation19_spill] sm:$0xff] }
 0x15b   : > { %4164 = vmatmul.msk.bf16.gmra.mxu2 %vm197_vm1, %v5486_v53  ;;  %v1035_v11 = vrot.slane %v7179_v28, 2 }
 0x15c   : > { %v1513_v17 = vadd.f32 %v1434_v8, %v1373_v37  ;;  %v1033_v8 = vrot.slane %v7178_v44, 2  ;;  %v7183_v44 = vld [vmem:[#allocation15_spill] sm:$0xff] }
 0x15d   : > { %4215 = vmatmul.msk.bf16.gmra.mxu1 %vm197_vm1, %v5515_v7 }
 0x15e   : > { %v1439_v56 = vpop.f32.mrf.mxu0  ;;  %v5542_v2 = vadd.f32 %v1571_v46, %v1513_v17  ;;  %v1167_v62 = vpop.f32.mrf.mxu2  ;;  %4181 = vmatmul.msk.bf16.gmra.mxu3 %vm197_vm1, %v7176_v30 }
 0x15f   : > { %v1244_v45 = vadd.f32 %v1167_v62, %v5328_v40  ;;  %v1034_v62 = vsel %vm971_vm4, %v1032_v34, %v1033_v8 }
 0x160   : > { %7175 = vst [vmem:[#allocation13_spill] sm:$0xff] %v5542_v2  ;;  %v7181_v2 = vld [vmem:[#allocation16_spill] sm:$0xff] }
 0x161   : > { %v1297_v51 = vpop.f32.mrf.mxu3 }
 0x162   : > { %v1374_v22 = vadd.f32 %v1297_v51, %v1244_v45  ;;  %v1576_v50 = vpop.f32.mrf.mxu1 }
 0x164   : > { %v1514_v54 = vadd.f32 %v1437_v0, %v1374_v22  ;;  %v1036_v0 = vsel %vm971_vm4, %v1033_v8, %v1035_v11 }
 0x165   : > { %v5557_v22 = vpack.c.bf16 %v1036_v0, %v1034_v62  ;;  %v7185_v62 = vld [vmem:[#allocation23_spill] sm:$0xff]  ;;  %v7186_v0 = vld [vmem:[#allocation24_spill] sm:$0xff] }
 0x166   : > { %v1442_v52 = vpop.f32.mrf.mxu0  ;;  %v5550_v37 = vadd.f32 %v1574_v57, %v1514_v54  ;;  %v1169_v46 = vpop.f32.mrf.mxu2 }
 0x167   : > { %v1245_v17 = vadd.f32 %v1169_v46, %v5338_v27 }
 0x168   : > { %7180 = vst [vmem:[#allocation14_spill] sm:$0xff] %v5550_v37 }
 0x169   : > { %4199 = vmatmul.msk.bf16.gmra.mxu0 %vm197_vm1, %v7181_v2  ;;  %v1299_v40 = vpop.f32.mrf.mxu3 }
 0x16a   : > { %v1375_v45 = vadd.f32 %v1299_v40, %v1245_v17  ;;  %v1579_v51 = vpop.f32.mrf.mxu1  ;;  %v7184_v17 = vld [vmem:[#allocation22_spill] sm:$0xff] }
 0x16b   : > { %4165 = vmatmul.msk.bf16.gmra.mxu2 %vm197_vm1, %v5515_v7  ;;  %v1037_v40 = vrot.slane %v7184_v17, 2 }
 0x16c   : > { %v1515_v57 = vadd.f32 %v1439_v56, %v1375_v45  ;;  %v1038_v56 = vrot.slane %v7185_v62, 2  ;;  %v1040_v45 = vrot.slane %v7186_v0, 2  ;;  %v7190_v62 = vld [vmem:[#allocation20_spill] sm:$0xff] }
 0x16d   : > { %4216 = vmatmul.msk.bf16.gmra.mxu1 %vm197_vm1, %v5536_v18 }
 0x16e   : > { %v1444_v27 = vpop.f32.mrf.mxu0  ;;  %v5563_v54 = vadd.f32 %v1576_v50, %v1515_v57  ;;  %v1172_v35 = vpop.f32.mrf.mxu2  ;;  %4182 = vmatmul.msk.bf16.gmra.mxu3 %vm197_vm1, %v7183_v44 }
 0x16f   : > { %v1246_v34 = vadd.f32 %v1172_v35, %v5355_v31  ;;  %v1039_v35 = vsel %vm971_vm4, %v1037_v40, %v1038_v56 }
 0x170   : > { %7182 = vst [vmem:[#allocation12_spill] sm:$0xff] %v5563_v54  ;;  %v7188_v54 = vld [vmem:[#allocation21_spill] sm:$0xff] }
 0x171   : > { %v1302_v8 = vpop.f32.mrf.mxu3 }
 0x172   : > { %v1376_v28 = vadd.f32 %v1302_v8, %v1246_v34  ;;  %v1581_v11 = vpop.f32.mrf.mxu1 }
 0x174   : > { %v1516_v46 = vadd.f32 %v1442_v52, %v1376_v28  ;;  %v1041_v52 = vsel %vm971_vm4, %v1038_v56, %v1040_v45 }
 0x175   : > { %v5578_v28 = vpack.c.bf16 %v1041_v52, %v1039_v35  ;;  %v7193_v52 = vld [vmem:[#allocation29_spill] sm:$0xff] }
 0x176   : > { %v1447_v37 = vpop.f32.mrf.mxu0  ;;  %v5571_v2 = vadd.f32 %v1579_v51, %v1516_v46  ;;  %v1174_v50 = vpop.f32.mrf.mxu2 }
 0x177   : > { %v1247_v57 = vadd.f32 %v1174_v50, %v5365_v39 }
 0x178   : > { %7187 = vst [vmem:[#allocation11_spill] sm:$0xff] %v5571_v2 }
 0x179   : > { %4200 = vmatmul.msk.bf16.gmra.mxu0 %vm197_vm1, %v7188_v54  ;;  %v1304_v31 = vpop.f32.mrf.mxu3  ;;  %v7195_v54 = vld [vmem:[#allocation26_spill] sm:$0xff] }
 0x17a   : > { %v1377_v34 = vadd.f32 %v1304_v31, %v1247_v57  ;;  %v1584_v8 = vpop.f32.mrf.mxu1  ;;  %v7191_v57 = vld [vmem:[#allocation27_spill] sm:$0xff] }
 0x17b   : > { %4166 = vmatmul.msk.bf16.gmra.mxu2 %vm197_vm1, %v5536_v18  ;;  %v1042_v31 = vrot.slane %v7191_v57, 2 }
 0x17c   : > { %v1517_v51 = vadd.f32 %v1444_v27, %v1377_v34  ;;  %v7192_v27 = vld [vmem:[#allocation28_spill] sm:$0xff]  ;;  %v1045_v34 = vrot.slane %v7193_v52, 2 }
 0x17d   : > { %4217 = vmatmul.msk.bf16.gmra.mxu1 %vm197_vm1, %v5557_v22  ;;  %v1043_v35 = vrot.slane %v7192_v27, 2 }
 0x17e   : > { %v1449_v39 = vpop.f32.mrf.mxu0  ;;  %v5584_v46 = vadd.f32 %v1581_v11, %v1517_v51  ;;  %v1177_v17 = vpop.f32.mrf.mxu2  ;;  %4183 = vmatmul.msk.bf16.gmra.mxu3 %vm197_vm1, %v7190_v62 }
 0x17f   : > { %v1248_v40 = vadd.f32 %v1177_v17, %v5382_v13  ;;  %v1046_v17 = vsel %vm971_vm4, %v1043_v35, %v1045_v34 }
 0x180   : > { %7189 = vst [vmem:[#allocation17_spill] sm:$0xff] %v5584_v46 }
 0x181   : > { %v1307_v56 = vpop.f32.mrf.mxu3 }
 0x182   : > { %v1378_v0 = vadd.f32 %v1307_v56, %v1248_v40  ;;  %v1586_v45 = vpop.f32.mrf.mxu1 }
 0x184   : > { %v1518_v50 = vadd.f32 %v1447_v37, %v1378_v0  ;;  %v1044_v37 = vsel %vm971_vm4, %v1042_v31, %v1043_v35  ;;  %v7197_v31 = vld [vmem:[#allocation25_spill] sm:$0xff] }
 0x185   : > { %v5599_v0 = vpack.c.bf16 %v1046_v17, %v1044_v37  ;;  %v7199_v37 = vld [vmem:[#allocation32_spill] sm:$0xff] }
 0x186   : > { %v1452_v11 = vpop.f32.mrf.mxu0  ;;  %v5592_v51 = vadd.f32 %v1584_v8, %v1518_v50  ;;  %v1179_v46 = vpop.f32.mrf.mxu2  ;;  %v339_v8 = vld [vmem:[%s4824_s13 + $0xf0] sm:$0xff]  ;;  %v340_v50 = vld [vmem:[%s4824_s13 + $0xf8] sm:$0xff]  ;;  %v1048_v17 = vrot.slane %v7199_v37, 2  ;;  %s188_s13 = sand.u32 1, %s4646_s16  }
 0x187   : > { %v1249_v2 = vadd.f32 %v1179_v46, %v5392_v25  ;;  %372 = vst.msk [vmem:[#allocation2 + $0x181] sm:$0xff] %vm197_vm1, %v339_v8  ;;  %s4118_s14 = sshll.u32 %s188_s13, 8  ;;  %s4037_s19 = scalar_lea.sflag [#allocation5], %s188_s13 }
 0x188   : > { %7194 = vst [vmem:[#allocation18_spill] sm:$0xff] %v5592_v51  ;;  %v7202_v51 = vld [vmem:[#allocation31_spill] sm:$0xff]  ;;  %s6892_s20 = scalar_lea.vmem [#allocation4], %s4118_s14 }
 0x189   : > { %4201 = vmatmul.msk.bf16.gmra.mxu0 %vm197_vm1, %v7195_v54  ;;  %v1309_v13 = vpop.f32.mrf.mxu3  ;;  %373 = vst.msk [vmem:[#allocation2 + $0x189] sm:$0xff] %vm197_vm1, %v340_v50  ;;  %s4049_s29 = sshll.u32 %s6892_s20, 4  ;;  %s4050_s29 = int_to_ptr.vmem [resolvable:$true] %s4049_s29 }
 0x18a   : > { %v1379_v40 = vadd.f32 %v1309_v13, %v1249_v2  ;;  %v1589_v56 = vpop.f32.mrf.mxu1  ;;  %v1047_v13 = vrot.slane %v5233_v59, 2 }
 0x18b   : > { %4167 = vmatmul.msk.bf16.gmra.mxu2 %vm197_vm1, %v5557_v22 }
 0x18c   : > { %v1519_v57 = vadd.f32 %v1449_v39, %v1379_v40  ;;  %v7200_v40 = vld [vmem:[#allocation33_spill] sm:$0xff] }
 0x18d   : > { %4218 = vmatmul.msk.bf16.gmra.mxu1 %vm197_vm1, %v5578_v28  ;;  %v1050_v8 = vrot.slane %v7200_v40, 2 }
 0x18e   : > { %v1454_v25 = vpop.f32.mrf.mxu0  ;;  %v5609_v46 = vadd.f32 %v1586_v45, %v1519_v57  ;;  %v1182_v2 = vpop.f32.mrf.mxu2  ;;  %4184 = vmatmul.msk.bf16.gmra.mxu3 %vm197_vm1, %v7197_v31 }
 0x18f   : > { %v1250_v27 = vadd.f32 %v1182_v2, %v5409_v42  ;;  %v1049_v2 = vsel %vm971_vm4, %v1047_v13, %v1048_v17 }
 0x190   : > { %7196 = vst [vmem:[#allocation19_spill] sm:$0xff] %v5609_v46 }
 0x191   : > { %v1312_v35 = vpop.f32.mrf.mxu3 }
 0x192   : > { %v1380_v52 = vadd.f32 %v1312_v35, %v1250_v27  ;;  %v5614_v34 = vpop.f32.mrf.mxu1 }
 0x193   : > { %7198 = vst [vmem:[#allocation15_spill] sm:$0xff] %v5614_v34  ;;  %v423_v34 = vld [vmem:[#allocation2 + $0x188] sm:$0xff] }
 0x194   : > { %v1520_v39 = vadd.f32 %v1452_v11, %v1380_v52  ;;  %v1051_v11 = vsel %vm971_vm4, %v1048_v17, %v1050_v8 }
 0x195   : > { %v5626_v35 = vpack.c.bf16 %v1051_v11, %v1049_v2 }
 0x196   : > { %v1457_v50 = vpop.f32.mrf.mxu0  ;;  %v5619_v45 = vadd.f32 %v1589_v56, %v1520_v39  ;;  %v1184_v57 = vpop.f32.mrf.mxu2  ;;  %v7204_v39 = vld [vmem:[#allocation30_spill] sm:$0xff] }
 0x197   : > { %v1251_v46 = vadd.f32 %v1184_v57, %v5419_v41 }
 0x198   : > { %7201 = vst [vmem:[#allocation22_spill] sm:$0xff] %v5619_v45 }
 0x199   : > { %4202 = vmatmul.msk.bf16.gmra.mxu0 %vm197_vm1, %v7202_v51  ;;  %v1314_v42 = vpop.f32.mrf.mxu3 }
 0x19a   : > { %v1381_v27 = vadd.f32 %v1314_v42, %v1251_v46  ;;  %v1594_v59 = vpop.f32.mrf.mxu1 }
 0x19b   : > { %4168 = vmatmul.msk.bf16.gmra.mxu2 %vm197_vm1, %v5578_v28 }
 0x19c   : > { %v5630_v56 = vadd.f32 %v1454_v25, %v1381_v27  ;;  %v422_v27 = vld [vmem:[#allocation2 + $0x180] sm:$0xff] }
 0x19d   : > { %4219 = vmatmul.msk.bf16.gmra.mxu1 %vm197_vm1, %v5599_v0 }
 0x19e   : > { %7203 = vst [vmem:[#allocation23_spill] sm:$0xff] %v5630_v56  ;;  %v1459_v41 = vpop.f32.mrf.mxu0  ;;  %v1187_v52 = vpop.f32.mrf.mxu2  ;;  %4185 = vmatmul.msk.bf16.gmra.mxu3 %vm197_vm1, %v7204_v39  ;;  %v424_v56 = vld [vmem:[#allocation2 + $0x190] sm:$0x3] }
 0x19f   : > { %v1252_v13 = vadd.f32 %v1187_v52, %v5436_v20 }
 0x1a1   : > { %v1317_v37 = vpop.f32.mrf.mxu3 }
 0x1a2   : > { %v1382_v46 = vadd.f32 %v1317_v37, %v1252_v13  ;;  %v5637_v17 = vpop.f32.mrf.mxu1  ;;  %v1410_v13 = vrot.slane %v424_v56, 1 }
 0x1a3   : > { %7205 = vst [vmem:[#allocation24_spill] sm:$0xff] %v5637_v17  ;;  %v1545_v17 = vrot.slane %v423_v34, 2 }
 0x1a4   : > { %v1522_v40 = vadd.f32 %v1457_v50, %v1382_v46  ;;  %v1407_v50 = vrot.slane %v422_v27, 1 }
 0x1a6   : > { %v1462_v8 = vpop.f32.mrf.mxu0  ;;  %v5639_v57 = vadd.f32 %v1594_v59, %v1522_v40  ;;  %v1189_v25 = vpop.f32.mrf.mxu2  ;;  %v1408_v59 = vrot.slane %v423_v34, 1 }
 0x1a7   : > { %v1253_v42 = vadd.f32 %v1189_v25, %v5446_v14 }
 0x1a8   : > { %7206 = vst [vmem:[#allocation20_spill] sm:$0xff] %v5639_v57  ;;  %v1409_v25 = vsel %vm668_vm3, %v1407_v50, %v1408_v59 }
 0x1a9   : > { %4203 = vmatmul.msk.bf16.gmra.mxu0 %vm197_vm1, %v5277_v16  ;;  %v1319_v2 = vpop.f32.mrf.mxu3 }
 0x1aa   : > { %v1383_v11 = vadd.f32 %v1319_v2, %v1253_v42  ;;  %v1599_v20 = vpop.f32.mrf.mxu1  ;;  %v1411_v42 = vsel %vm668_vm3, %v1408_v59, %v1410_v13 }
 0x1ab   : > { %4169 = vmatmul.msk.bf16.gmra.mxu2 %vm197_vm1, %v5599_v0  ;;  %v5657_v16 = vpack.c.bf16 %v1411_v42, %v1409_v25 }
 0x1ac   : > { %v5646_v52 = vadd.f32 %v1459_v41, %v1383_v11  ;;  %v1544_v11 = vrot.slane %v422_v27, 2 }
 0x1ad   : > { %4220 = vmatmul.msk.bf16.gmra.mxu1 %vm197_vm1, %v5626_v35 }
 0x1ae   : > { %7207 = vst [vmem:[#allocation27_spill] sm:$0xff] %v5646_v52  ;;  %v1464_v14 = vpop.f32.mrf.mxu0  ;;  %v1192_v37 = vpop.f32.mrf.mxu2  ;;  %4186 = vmatmul.msk.bf16.gmra.mxu3 %vm197_vm1, %v5260_v38  ;;  %v1547_v52 = vrot.slane %v424_v56, 2 }
 0x1af   : > { %v1254_v46 = vadd.f32 %v1192_v37, %v5463_v23  ;;  %v1546_v23 = vsel %vm971_vm4, %v1544_v11, %v1545_v17 }
 0x1b0   : > { %v1548_v37 = vsel %vm971_vm4, %v1545_v17, %v1547_v52 }
 0x1b1   : > { %v1322_v40 = vpop.f32.mrf.mxu3  ;;  %v5666_v13 = vpack.c.bf16 %v1548_v37, %v1546_v23 }
 0x1b2   : > { %v1384_v41 = vadd.f32 %v1322_v40, %v1254_v46  ;;  %v5655_v2 = vpop.f32.mrf.mxu1 }
 0x1b4   : > { %v1524_v57 = vadd.f32 %v1462_v8, %v1384_v41  ;;  %v5668_v8 = vpack.c.bf16 %v423_v34, %v422_v27 }
 0x1b6   : > { %v1467_v45 = vpop.f32.mrf.mxu0  ;;  %v5659_v51 = vadd.f32 %v1599_v20, %v1524_v57  ;;  %v1194_v38 = vpop.f32.mrf.mxu2 }
 0x1b7   : > { %v1255_v50 = vadd.f32 %v1194_v38, %v5473_v4  ;;  %v4527_v4 = vld [vmem:[%s7043_s2] sm:$0xff] }
 0x1b8   : > { %2296 = vmatpush.bf16.msra.mxu1 %v4527_v4 }
 0x1b9   : > { %4204 = vmatmul.msk.bf16.gmra.mxu0 %vm197_vm1, %v5657_v16  ;;  %v1324_v59 = vpop.f32.mrf.mxu3 }
 0x1ba   : > { %v1385_v56 = vadd.f32 %v1324_v59, %v1255_v50  ;;  %v1604_v46 = vpop.f32.mrf.mxu1 }
 0x1bb   : > { %4170 = vmatmul.msk.bf16.gmra.mxu2 %vm197_vm1, %v5626_v35 }
 0x1bc   : > { %v5672_v57 = vadd.f32 %v1464_v14, %v1385_v56 }
 0x1bd   : > { %4221 = vmatmul.msk.bf16.gmra.mxu1 %vm197_vm1, %v5666_v13 }
 0x1be   : > { %v1469_v17 = vpop.f32.mrf.mxu0  ;;  %v1197_v38 = vpop.f32.mrf.mxu2  ;;  %4187 = vmatmul.msk.bf16.gmra.mxu3 %vm197_vm1, %v5668_v8 }
 0x1bf   : > { %v1256_v34 = vadd.f32 %v1197_v38, %v5490_v55 }
 0x1c1   : > { %v1327_v27 = vpop.f32.mrf.mxu3 }
 0x1c2   : > { %v1386_v20 = vadd.f32 %v1327_v27, %v1256_v34  ;;  %v5682_v52 = vpop.f32.mrf.mxu1 }
 0x1c4   : > { %v1526_v14 = vadd.f32 %v1467_v45, %v1386_v20 }
 0x1c6   : > { %v1472_v40 = vpop.f32.mrf.mxu0  ;;  %v5684_v25 = vadd.f32 %v1604_v46, %v1526_v14  ;;  %v1199_v42 = vpop.f32.mrf.mxu2 }
 0x1c7   : > { %v1257_v41 = vadd.f32 %v1199_v42, %v5503_v48 }
 0x1c9   : > { %4257 = vmatmul.msk.bf16.vlgmr.msra.gmra.mxu0 %vm197_vm1, %v5302_v10  ;;  %v1329_v11 = vpop.f32.mrf.mxu3 }
 0x1ca   : > { %v1387_v23 = vadd.f32 %v1329_v11, %v1257_v41  ;;  %v1609_v37 = vpop.f32.mrf.mxu1 }
 0x1cb   : > { %4223 = vmatmul.msk.bf16.vlgmr.msra.gmra.mxu2 %vm197_vm1, %v4999_v24 }
 0x1cc   : > { %v5691_v55 = vadd.f32 %v1469_v17, %v1387_v23 }
 0x1ce   : > { %v1474_v50 = vpop.f32.mrf.mxu0  ;;  %v1202_v59 = vpop.f32.mrf.mxu2  ;;  %4240 = vmatmul.msk.bf16.vlgmr.msra.gmra.mxu3 %vm197_vm1, %v5013_v32 }
 0x1cf   : > { %v1258_v45 = vadd.f32 %v1202_v59, %v5310_v63 }
 0x1d1   : > { %v1332_v56 = vpop.f32.mrf.mxu3 }
 0x1d2   : > { %v1388_v48 = vadd.f32 %v1332_v56, %v1258_v45  ;;  %v5696_v46 = vpop.f32.mrf.mxu1  ;;  %v7209_v45 = vld [vmem:[#allocation37_spill] sm:$0xff] }
 0x1d4   : > { %v1528_v10 = vadd.f32 %v1472_v40, %v1388_v48  ;;  %v7208_v40 = vld [vmem:[#allocation36_spill] sm:$0xff] }
 0x1d6   : > { %v1477_v38 = vpop.f32.mrf.mxu0  ;;  %v5698_v4 = vadd.f32 %v1609_v37, %v1528_v10  ;;  %v1204_v34 = vpop.f32.mrf.mxu2 }
 0x1d7   : > { %v1259_v24 = vadd.f32 %v1204_v34, %v5317_v43 }
 0x1d9   : > { %4258 = vmatmul.msk.bf16.gmra.mxu0 %vm197_vm1, %v5325_v1  ;;  %v1334_v17 = vpop.f32.mrf.mxu3 }
 0x1da   : > { %v1389_v27 = vadd.f32 %v1334_v17, %v1259_v24  ;;  %v1614_v20 = vpop.f32.mrf.mxu1 }
 0x1db   : > { %4224 = vmatmul.msk.bf16.gmra.mxu2 %vm197_vm1, %v5049_v58 }
 0x1dc   : > { %v5705_v32 = vadd.f32 %v1474_v50, %v1389_v27 }
 0x1de   : > { %v1479_v63 = vpop.f32.mrf.mxu0  ;;  %v1207_v14 = vpop.f32.mrf.mxu2  ;;  %4241 = vmatmul.msk.bf16.gmra.mxu3 %vm197_vm1, %v5063_v6 }
 0x1df   : > { %v1260_v42 = vadd.f32 %v1207_v14, %v7208_v40 }
 0x1e1   : > { %v1337_v41 = vpop.f32.mrf.mxu3 }
 0x1e2   : > { %v1390_v43 = vadd.f32 %v1337_v41, %v1260_v42  ;;  %v5710_v11 = vpop.f32.mrf.mxu1  ;;  %v7211_v41 = vld [vmem:[#allocation39_spill] sm:$0xff] }
 0x1e4   : > { %v1530_v1 = vadd.f32 %v1477_v38, %v1390_v43  ;;  %v7210_v38 = vld [vmem:[#allocation38_spill] sm:$0xff] }
 0x1e6   : > { %v1482_v23 = vpop.f32.mrf.mxu0  ;;  %v5712_v37 = vadd.f32 %v1614_v20, %v1530_v1  ;;  %v1209_v59 = vpop.f32.mrf.mxu2 }
 0x1e7   : > { %v1261_v58 = vadd.f32 %v1209_v59, %v7209_v45 }
 0x1e9   : > { %4259 = vmatmul.msk.bf16.gmra.mxu0 %vm197_vm1, %v5351_v26  ;;  %v1339_v50 = vpop.f32.mrf.mxu3 }
 0x1ea   : > { %v1391_v56 = vadd.f32 %v1339_v50, %v1261_v58  ;;  %v1619_v48 = vpop.f32.mrf.mxu1 }
 0x1eb   : > { %4225 = vmatmul.msk.bf16.gmra.mxu2 %vm197_vm1, %v5099_v49 }
 0x1ec   : > { %v5719_v6 = vadd.f32 %v1479_v63, %v1391_v56 }
 0x1ee   : > { %v1484_v10 = vpop.f32.mrf.mxu0  ;;  %v1212_v34 = vpop.f32.mrf.mxu2  ;;  %4242 = vmatmul.msk.bf16.gmra.mxu3 %vm197_vm1, %v5113_v60 }
 0x1ef   : > { %v1262_v24 = vadd.f32 %v1212_v34, %v7210_v38 }
 0x1f1   : > { %v1342_v17 = vpop.f32.mrf.mxu3 }
 0x1f2   : > { %v1392_v27 = vadd.f32 %v1342_v17, %v1262_v24  ;;  %v5724_v20 = vpop.f32.mrf.mxu1  ;;  %v7213_v17 = vld [vmem:[#allocation41_spill] sm:$0xff] }
 0x1f4   : > { %v1532_v26 = vadd.f32 %v1482_v23, %v1392_v27  ;;  %v7212_v23 = vld [vmem:[#allocation40_spill] sm:$0xff] }
 0x1f6   : > { %v1487_v14 = vpop.f32.mrf.mxu0  ;;  %v5726_v40 = vadd.f32 %v1619_v48, %v1532_v26  ;;  %v1214_v42 = vpop.f32.mrf.mxu2 }
 0x1f7   : > { %v1263_v49 = vadd.f32 %v1214_v42, %v7211_v41 }
 0x1f9   : > { %4260 = vmatmul.msk.bf16.gmra.mxu0 %vm197_vm1, %v5378_v36  ;;  %v1344_v63 = vpop.f32.mrf.mxu3 }
 0x1fa   : > { %v1393_v43 = vadd.f32 %v1344_v63, %v1263_v49  ;;  %v1624_v1 = vpop.f32.mrf.mxu1 }
 0x1fb   : > { %4226 = vmatmul.msk.bf16.gmra.mxu2 %vm197_vm1, %v5149_v15 }
 0x1fc   : > { %v5733_v60 = vadd.f32 %v1484_v10, %v1393_v43 }
 0x1fe   : > { %v1489_v59 = vpop.f32.mrf.mxu0  ;;  %v1217_v45 = vpop.f32.mrf.mxu2  ;;  %4243 = vmatmul.msk.bf16.gmra.mxu3 %vm197_vm1, %v5163_v12 }
 0x1ff   : > { %v1264_v58 = vadd.f32 %v1217_v45, %v7212_v23 }
 0x201   : > { %v1347_v50 = vpop.f32.mrf.mxu3 }
 0x202   : > { %v1394_v56 = vadd.f32 %v1347_v50, %v1264_v58  ;;  %v5738_v48 = vpop.f32.mrf.mxu1  ;;  %v7215_v50 = vld [vmem:[#allocation43_spill] sm:$0xff] }
 0x204   : > { %v1534_v36 = vadd.f32 %v1487_v14, %v1394_v56  ;;  %v7214_v14 = vld [vmem:[#allocation42_spill] sm:$0xff] }
 0x206   : > { %v1492_v34 = vpop.f32.mrf.mxu0  ;;  %v5740_v38 = vadd.f32 %v1624_v1, %v1534_v36  ;;  %v1219_v24 = vpop.f32.mrf.mxu2 }
 0x207   : > { %v1265_v15 = vadd.f32 %v1219_v24, %v7213_v17 }
 0x209   : > { %4261 = vmatmul.msk.bf16.gmra.mxu0 %vm197_vm1, %v5405_v61  ;;  %v1349_v10 = vpop.f32.mrf.mxu3 }
 0x20a   : > { %v1395_v27 = vadd.f32 %v1349_v10, %v1265_v15  ;;  %v1629_v26 = vpop.f32.mrf.mxu1 }
 0x20b   : > { %4227 = vmatmul.msk.bf16.gmra.mxu2 %vm197_vm1, %v5194_v29 }
 0x20c   : > { %v5747_v12 = vadd.f32 %v1489_v59, %v1395_v27 }
 0x20e   : > { %v1494_v42 = vpop.f32.mrf.mxu0  ;;  %v1222_v41 = vpop.f32.mrf.mxu2  ;;  %4244 = vmatmul.msk.bf16.gmra.mxu3 %vm197_vm1, %v5208_v33 }
 0x20f   : > { %v1266_v49 = vadd.f32 %v1222_v41, %v7214_v14 }
 0x211   : > { %v1352_v63 = vpop.f32.mrf.mxu3 }
 0x212   : > { %v1396_v43 = vadd.f32 %v1352_v63, %v1266_v49  ;;  %v5752_v1 = vpop.f32.mrf.mxu1 }
 0x214   : > { %v1536_v61 = vadd.f32 %v1492_v34, %v1396_v43  ;;  %v7216_v34 = vld [vmem:[#allocation44_spill] sm:$0xff] }
 0x216   : > { %v1497_v45 = vpop.f32.mrf.mxu0  ;;  %v5754_v23 = vadd.f32 %v1629_v26, %v1536_v61  ;;  %v1224_v58 = vpop.f32.mrf.mxu2  ;;  %v7220_v61 = vld [vmem:[#allocation7_spill] sm:$0xff] }
 0x217   : > { %v1267_v29 = vadd.f32 %v1224_v58, %v7215_v50 }
 0x219   : > { %4262 = vmatmul.msk.bf16.gmra.mxu0 %vm197_vm1, %v5432_v5  ;;  %v1354_v59 = vpop.f32.mrf.mxu3 }
 0x21a   : > { %v1397_v56 = vadd.f32 %v1354_v59, %v1267_v29  ;;  %v1634_v33 = vpop.f32.mrf.mxu1  ;;  %v7223_v29 = vld [vmem:[#allocation8_spill] sm:$0xff] }
 0x21b   : > { %4228 = vmatmul.msk.bf16.gmra.mxu2 %vm197_vm1, %v5254_v47  ;;  %v7219_v47 = vld [vmem:[#allocation45_spill] sm:$0xff] }
 0x21c   : > { %v5761_v36 = vadd.f32 %v1494_v42, %v1397_v56 }
 0x21e   : > { %v1499_v24 = vpop.f32.mrf.mxu0  ;;  %v1227_v17 = vpop.f32.mrf.mxu2  ;;  %4245 = vmatmul.msk.bf16.gmra.mxu3 %vm197_vm1, %v5270_v3 }
 0x21f   : > { %v1268_v15 = vadd.f32 %v1227_v17, %v7216_v34 }
 0x221   : > { %v1357_v10 = vpop.f32.mrf.mxu3 }
 0x222   : > { %v1398_v27 = vadd.f32 %v1357_v10, %v1268_v15  ;;  %v5766_v41 = vpop.f32.mrf.mxu1 }
 0x223   : > { %7217 = vst [vmem:[#allocation28_spill] sm:$0xff] %v5766_v41 }
 0x224   : > { %v1538_v26 = vadd.f32 %v1497_v45, %v1398_v27  ;;  %v7222_v45 = vmov 0.0  }
 0x225   : > { %258 = vst.msk [vmem:[#allocation3 + $0x18] sm:$0xff] %vm253_vm5, %v7222_v45 }
 0x226   : > { %v1502_v5 = vpop.f32.mrf.mxu0  ;;  %v5768_v14 = vadd.f32 %v1634_v33, %v1538_v26  ;;  %v1229_v49 = vpop.f32.mrf.mxu2  ;;  %259 = vst.msk [vmem:[#allocation3 + $0x20] sm:$0xff] %vm253_vm5, %v7222_v45  ;;  %v4530_v33 = vld [vmem:[%s7043_s2 + $0x18] sm:$0xff] }
 0x227   : > { %v1269_v63 = vadd.f32 %v1229_v49, %v7219_v47  ;;  %254 = vst.msk [vmem:[#allocation3] sm:$0xff] %vm253_vm5, %v7222_v45  ;;  %2657 = vmatpush.bf16.msrb.mxu2 %v4530_v33  ;;  %v7230_v33 = vld [vmem:[#allocation10_spill] sm:$0xff] }
 0x228   : > { %7218 = vst [vmem:[#allocation29_spill] sm:$0xff] %v5768_v14 }
 0x229   : > { %4263 = vmatmul.msk.bf16.gmra.mxu0 %vm197_vm1, %v5459_v19  ;;  %v1359_v42 = vpop.f32.mrf.mxu3  ;;  %v7224_v19 = vld [vmem:[#allocation46_spill] sm:$0xff]  ;;  %255 = vst.msk [vmem:[#allocation3 + $0x8] sm:$0xff] %vm253_vm5, %v7222_v45 }
 0x22a   : > { %v1399_v43 = vadd.f32 %v1359_v42, %v1269_v63  ;;  %v1639_v56 = vpop.f32.mrf.mxu1  ;;  %261 = vst.msk [vmem:[#allocation3 + $0x30] sm:$0xff] %vm253_vm5, %v7222_v45  ;;  %v7226_v63 = vld [vmem:[#allocation47_spill] sm:$0xff] }
 0x22b   : > { %4229 = vmatmul.msk.bf16.gmra.mxu2 %vm197_vm1, %v7220_v61  ;;  %262 = vst.msk [vmem:[#allocation3 + $0x38] sm:$0xff] %vm253_vm5, %v7222_v45 }
 0x22c   : > { %v5775_v3 = vadd.f32 %v1499_v24, %v1399_v43  ;;  %v4532_v24 = vld [vmem:[%s7043_s2 + $0x28] sm:$0xff]  ;;  %264 = vst.msk [vmem:[#allocation3 + $0x48] sm:$0xff] %vm253_vm5, %v7222_v45 }
 0x22d   : > { %2971 = vmatpush.bf16.msrb.mxu3 %v4532_v24  ;;  %265 = vst.msk [vmem:[#allocation3 + $0x50] sm:$0xff] %vm253_vm5, %v7222_v45  ;;  %v7231_v24 = vld [vmem:[#allocation48_spill] sm:$0xff] }
 0x22e   : > { %7221 = vst [vmem:[#allocation26_spill] sm:$0xff] %v5775_v3  ;;  %v1504_v58 = vpop.f32.mrf.mxu0  ;;  %v1232_v50 = vpop.f32.mrf.mxu2  ;;  %4246 = vmatmul.msk.bf16.gmra.mxu3 %vm197_vm1, %v7223_v29  ;;  %v5806_v10 = vld [vmem:[#allocation3] sm:$0xff] }
 0x22f   : > { %v1270_v59 = vadd.f32 %v1232_v50, %v7224_v19  ;;  %267 = vst.msk [vmem:[#allocation3 + $0x60] sm:$0xff] %vm253_vm5, %v7222_v45  ;;  %v4534_v50 = vld [vmem:[%s7043_s2 + $0x38] sm:$0xff]  ;;  %v7228_v19 = vld [vmem:[#allocation9_spill] sm:$0xff] }
 0x230   : > { %268 = vst.msk [vmem:[#allocation3 + $0x68] sm:$0xff] %vm253_vm5, %v7222_v45  ;;  %v5812_v47 = vld [vmem:[#allocation3 + $0x8] sm:$0xff]  ;;  %3113 = vmatpush.bf16.msrb.mxu0 %v4534_v50  ;;  %v7233_v50 = vld [vmem:[#allocation49_spill] sm:$0xff] }
 0x231   : > { %v1362_v17 = vpop.f32.mrf.mxu3  ;;  %270 = vst.msk [vmem:[#allocation3 + $0x78] sm:$0xff] %vm253_vm5, %v7222_v45 }
 0x232   : > { %v1400_v34 = vadd.f32 %v1362_v17, %v1270_v59  ;;  %271 = vst.msk [vmem:[#allocation3 + $0x80] sm:$0xff] %vm253_vm5, %v7222_v45  ;;  %v5823_v61 = vpop.f32.mrf.mxu1 }
 0x233   : > { %273 = vst.msk [vmem:[#allocation3 + $0x90] sm:$0xff] %vm253_vm5, %v7222_v45 }
 0x234   : > { %v1540_v15 = vadd.f32 %v1502_v5, %v1400_v34  ;;  %v2209_v5 = vpack.c.bf16 %v5812_v47, %v5806_v10  ;;  %7227 = vst [vmem:[#allocation32_spill] sm:$0xff] %v5823_v61 }
 0x235   : > { %274 = vst.msk [vmem:[#allocation3 + $0x98] sm:$0xff] %vm253_vm5, %v7222_v45 }
 0x236   : > { %v1507_v27 = vpop.f32.mrf.mxu0  ;;  %v5808_v26 = vadd.f32 %v1639_v56, %v1540_v15  ;;  %v1234_v49 = vpop.f32.mrf.mxu2  ;;  %4281 = vmatmul.msk.bf16.vlgmr.msra.gmra.mxu1 %vm253_vm5, %v2209_v5  ;;  %276 = vst.msk [vmem:[#allocation3 + $0xa8] sm:$0xff] %vm253_vm5, %v7222_v45 }
 0x237   : > { %v1271_v42 = vadd.f32 %v1234_v49, %v7226_v63  ;;  %277 = vst.msk [vmem:[#allocation3 + $0xb0] sm:$0xff] %vm253_vm5, %v7222_v45  ;;  %v4536_v49 = vld [vmem:[%s7043_s2 + $0x48] sm:$0xff] }
 0x238   : > { %7225 = vst [vmem:[#allocation25_spill] sm:$0xff] %v5808_v26  ;;  %3265 = vmatpush.bf16.msrb.mxu1 %v4536_v49  ;;  %v427_v26 = vld [vmem:[#allocation2 + $0x1a8] sm:$0x3] }
 0x239   : > { %4264 = vmatmul.msk.bf16.gmra.mxu0 %vm197_vm1, %v5486_v53  ;;  %v1364_v43 = vpop.f32.mrf.mxu3  ;;  %279 = vst.msk [vmem:[#allocation3 + $0xc0] sm:$0xff] %vm253_vm5, %v7222_v45 }
 0x23a   : > { %v1401_v29 = vadd.f32 %v1364_v43, %v1271_v42  ;;  %280 = vst.msk [vmem:[#allocation3 + $0xc8] sm:$0xff] %vm253_vm5, %v7222_v45  ;;  %v1644_v15 = vpop.f32.mrf.mxu1 }
 0x23b   : > { %4230 = vmatmul.msk.bf16.gmra.mxu2 %vm197_vm1, %v7228_v19  ;;  %282 = vst.msk [vmem:[#allocation3 + $0xd8] sm:$0xff] %vm253_vm5, %v7222_v45 }
 0x23c   : > { %v5837_v53 = vadd.f32 %v1504_v58, %v1401_v29  ;;  %283 = vst.msk [vmem:[#allocation3 + $0xe0] sm:$0xff] %vm253_vm5, %v7222_v45 }
 0x23d   : > { %285 = vst.msk [vmem:[#allocation3 + $0xf0] sm:$0xff] %vm253_vm5, %v7222_v45 }
 0x23e   : > { %7229 = vst [vmem:[#allocation33_spill] sm:$0xff] %v5837_v53  ;;  %v1509_v59 = vpop.f32.mrf.mxu0  ;;  %v1237_v56 = vpop.f32.mrf.mxu2  ;;  %4247 = vmatmul.msk.bf16.gmra.mxu3 %vm197_vm1, %v7230_v33  ;;  %v2773_v53 = vrot.slane %v5812_v47, 2 }
 0x23f   : > { %v1272_v17 = vadd.f32 %v1237_v56, %v7231_v24  ;;  %286 = vst.msk [vmem:[#allocation3 + $0xf8] sm:$0xff] %vm253_vm5, %v7222_v45 }
 0x240   : > { %288 = vst.msk [vmem:[#allocation3 + $0x108] sm:$0xff] %vm253_vm5, %v7222_v45 }
 0x241   : > { %v1367_v58 = vpop.f32.mrf.mxu3  ;;  %289 = vst.msk [vmem:[#allocation3 + $0x110] sm:$0xff] %vm253_vm5, %v7222_v45 }
 0x242   : > { %v1402_v34 = vadd.f32 %v1367_v58, %v1272_v17  ;;  %291 = vst.msk [vmem:[#allocation3 + $0x120] sm:$0xff] %vm253_vm5, %v7222_v45 }
 0x243   : > { %292 = vst.msk [vmem:[#allocation3 + $0x128] sm:$0xff] %vm253_vm5, %v7222_v45 }
 0x244   : > { %v1542_v63 = vadd.f32 %v1507_v27, %v1402_v34  ;;  %294 = vst.msk [vmem:[#allocation3 + $0x138] sm:$0xff] %vm253_vm5, %v7222_v45  ;;  %v7235_v34 = vld [vmem:[#allocation13_spill] sm:$0xff] }
 0x245   : > { %295 = vst.msk [vmem:[#allocation3 + $0x140] sm:$0xff] %vm253_vm5, %v7222_v45 }
 0x246   : > { %v1976_v42 = vpop.f32.mrf.mxu0  ;;  %v5865_v5 = vadd.f32 %v1644_v15, %v1542_v63  ;;  %v1239_v43 = vpop.f32.mrf.mxu2  ;;  %297 = vst.msk [vmem:[#allocation3 + $0x150] sm:$0xff] %vm253_vm5, %v7222_v45 }
 0x247   : > { %v1273_v29 = vadd.f32 %v1239_v43, %v7233_v50  ;;  %298 = vst.msk [vmem:[#allocation3 + $0x158] sm:$0xff] %vm253_vm5, %v7222_v45 }
 0x248   : > { %7232 = vst [vmem:[#allocation30_spill] sm:$0xff] %v5865_v5 }
 0x249   : > { %4265 = vmatmul.msk.bf16.gmra.mxu0 %vm197_vm1, %v5515_v7  ;;  %v1369_v27 = vpop.f32.mrf.mxu3  ;;  %300 = vst.msk [vmem:[#allocation3 + $0x168] sm:$0xff] %vm253_vm5, %v7222_v45 }
 0x24a   : > { %v1403_v19 = vadd.f32 %v1369_v27, %v1273_v29  ;;  %301 = vst.msk [vmem:[#allocation3 + $0x170] sm:$0xff] %vm253_vm5, %v7222_v45  ;;  %v7236_v29 = vld [vmem:[#allocation16_spill] sm:$0xff] }
 0x24b   : > { %4231 = vmatmul.msk.bf16.gmra.mxu2 %vm197_vm1, %v7176_v30  ;;  %303 = vst.msk [vmem:[#allocation3 + $0x180] sm:$0xff] %vm253_vm5, %v7222_v45 }
 0x24c   : > { %v5884_v56 = vadd.f32 %v1509_v59, %v1403_v19  ;;  %304 = vst.msk [vmem:[#allocation3 + $0x188] sm:$0xff] %vm253_vm5, %v7222_v45 }
 0x24d   : > { %306 = vst.msk [vmem:[#allocation3 + $0x198] sm:$0xff] %vm253_vm5, %v7222_v45 }
 0x24e   : > { %7234 = vst [vmem:[#allocation36_spill] sm:$0xff] %v5884_v56  ;;  %v1978_v7 = vpop.f32.mrf.mxu0  ;;  %v1699_v33 = vpop.f32.mrf.mxu2  ;;  %4248 = vmatmul.msk.bf16.gmra.mxu3 %vm197_vm1, %v7174_v9 }
 0x24f   : > { %v1779_v30 = vadd.f32 %v1699_v33, %v5530_v21  ;;  %307 = vst.msk [vmem:[#allocation3 + $0x1a0] sm:$0xff] %vm253_vm5, %v7222_v45 }
 0x250   : > { %260 = vst.msk [vmem:[#allocation3 + $0x28] sm:$0x3] %vm256_vm6, %v7222_v45 }
 0x251   : > { %v1839_v59 = vpop.f32.mrf.mxu3  ;;  %257 = vst.msk [vmem:[#allocation3 + $0x10] sm:$0x3] %vm256_vm6, %v7222_v45 }
 0x252   : > { %v1919_v24 = vadd.f32 %v1839_v59, %v1779_v30  ;;  %263 = vst.msk [vmem:[#allocation3 + $0x40] sm:$0x3] %vm256_vm6, %v7222_v45 }
 0x253   : > { %266 = vst.msk [vmem:[#allocation3 + $0x58] sm:$0x3] %vm256_vm6, %v7222_v45 }
 0x254   : > { %v2056_v9 = vadd.f32 %v1976_v42, %v1919_v24  ;;  %269 = vst.msk [vmem:[#allocation3 + $0x70] sm:$0x3] %vm256_vm6, %v7222_v45 }
 0x255   : > { %272 = vst.msk [vmem:[#allocation3 + $0x88] sm:$0x3] %vm256_vm6, %v7222_v45 }
 0x256   : > { %v2088_v21 = vmax.f32 %v2056_v9, 0.0  ;;  %v1981_v17 = vpop.f32.mrf.mxu0  ;;  %v1701_v58 = vpop.f32.mrf.mxu2  ;;  %275 = vst.msk [vmem:[#allocation3 + $0xa0] sm:$0x3] %vm256_vm6, %v7222_v45 }
 0x257   : > { %v1780_v15 = vadd.f32 %v1701_v58, %v7235_v34  ;;  %278 = vst.msk [vmem:[#allocation3 + $0xb8] sm:$0x3] %vm256_vm6, %v7222_v45 }
 0x258   : > { %2121 = vst.msk [vmem:[#allocation3 + $0x19] sm:$0xff] %vm253_vm5, %v2088_v21  ;;  %v7238_v21 = vld [vmem:[#allocation12_spill] sm:$0xff] }
 0x259   : > { %4266 = vmatmul.msk.bf16.gmra.mxu0 %vm197_vm1, %v5536_v18  ;;  %v1841_v49 = vpop.f32.mrf.mxu3  ;;  %281 = vst.msk [vmem:[#allocation3 + $0xd0] sm:$0x3] %vm256_vm6, %v7222_v45 }
 0x25a   : > { %v1920_v63 = vadd.f32 %v1841_v49, %v1780_v15  ;;  %284 = vst.msk [vmem:[#allocation3 + $0xe8] sm:$0x3] %vm256_vm6, %v7222_v45 }
 0x25b   : > { %287 = vst.msk [vmem:[#allocation3 + $0x100] sm:$0x3] %vm256_vm6, %v7222_v45  ;;  %4232 = vmatmul.msk.bf16.gmra.mxu2 %vm197_vm1, %v7183_v44  ;;  %v7237_v44 = vld [vmem:[#allocation14_spill] sm:$0xff] }
 0x25c   : > { %v2057_v42 = vadd.f32 %v1978_v7, %v1920_v63  ;;  %290 = vst.msk [vmem:[#allocation3 + $0x118] sm:$0x3] %vm256_vm6, %v7222_v45 }
 0x25d   : > { %293 = vst.msk [vmem:[#allocation3 + $0x130] sm:$0x3] %vm256_vm6, %v7222_v45 }
 0x25e   : > { %v2089_v18 = vmax.f32 %v2057_v42, 0.0  ;;  %296 = vst.msk [vmem:[#allocation3 + $0x148] sm:$0x3] %vm256_vm6, %v7222_v45  ;;  %v1983_v43 = vpop.f32.mrf.mxu0  ;;  %v1704_v50 = vpop.f32.mrf.mxu2  ;;  %4249 = vmatmul.msk.bf16.gmra.mxu3 %vm197_vm1, %v7236_v29 }
 0x25f   : > { %299 = vst.msk [vmem:[#allocation3 + $0x160] sm:$0x3] %vm256_vm6, %v7222_v45  ;;  %v1781_v27 = vadd.f32 %v1704_v50, %v7237_v44  ;;  %v2156_v30 = vld [vmem:[#allocation3 + $0x18] sm:$0xff] }
 0x260   : > { %2122 = vst.msk [vmem:[#allocation3 + $0x21] sm:$0xff] %vm253_vm5, %v2089_v18  ;;  %v2463_v15 = vrot.slane %v2156_v30, 1  ;;  %v2777_v49 = vrot.slane %v2156_v30, 2 }
 0x261   : > { %302 = vst.msk [vmem:[#allocation3 + $0x178] sm:$0x3] %vm256_vm6, %v7222_v45  ;;  %v1844_v19 = vpop.f32.mrf.mxu3 }
 0x262   : > { %305 = vst.msk [vmem:[#allocation3 + $0x190] sm:$0x3] %vm256_vm6, %v7222_v45  ;;  %v1921_v7 = vadd.f32 %v1844_v19, %v1781_v27 }
 0x263   : > { %308 = vst.msk [vmem:[#allocation3 + $0x1a8] sm:$0x3] %vm256_vm6, %v7222_v45 }
 0x264   : > { %v2058_v33 = vadd.f32 %v1981_v17, %v1921_v7 }
 0x266   : > { %v2090_v59 = vmax.f32 %v2058_v33, 0.0  ;;  %v1986_v24 = vpop.f32.mrf.mxu0  ;;  %v1706_v9 = vpop.f32.mrf.mxu2 }
 0x267   : > { %v1782_v58 = vadd.f32 %v1706_v9, %v7238_v21  ;;  %v2157_v34 = vld [vmem:[#allocation3 + $0x20] sm:$0xff]  ;;  %v2158_v63 = vld [vmem:[#allocation3 + $0x28] sm:$0x3] }
 0x268   : > { %2123 = vst.msk [vmem:[#allocation3 + $0x31] sm:$0xff] %vm253_vm5, %v2090_v59  ;;  %v5945_v42 = vpack.c.bf16 %v2157_v34, %v2156_v30  ;;  %v2464_v18 = vrot.slane %v2157_v34, 1  ;;  %v2778_v50 = vrot.slane %v2157_v34, 2  ;;  %v2466_v29 = vrot.slane %v2158_v63, 1  ;;  %v7239_v34 = vld [vmem:[#allocation21_spill] sm:$0xff] }
 0x269   : > { %4267 = vmatmul.msk.bf16.gmra.mxu0 %vm197_vm1, %v5557_v22  ;;  %v1846_v45 = vpop.f32.mrf.mxu3  ;;  %v2780_v17 = vrot.slane %v2158_v63, 2 }
 0x26a   : > { %v1922_v44 = vadd.f32 %v1846_v45, %v1782_v58  ;;  %4282 = vmatmul.msk.bf16.gmra.mxu1 %vm253_vm5, %v5945_v42  ;;  %v2465_v27 = vsel %vm668_vm3, %v2463_v15, %v2464_v18  ;;  %v2467_v19 = vsel %vm668_vm3, %v2464_v18, %v2466_v29  ;;  %v2779_v7 = vsel %vm971_vm4, %v2777_v49, %v2778_v50  ;;  %v7240_v15 = vld [vmem:[#allocation11_spill] sm:$0xff] }
 0x26b   : > { %4233 = vmatmul.msk.bf16.gmra.mxu2 %vm197_vm1, %v7190_v62  ;;  %v5956_v33 = vpack.c.bf16 %v2467_v19, %v2465_v27  ;;  %v2781_v30 = vsel %vm971_vm4, %v2778_v50, %v2780_v17 }
 0x26c   : > { %v2059_v22 = vadd.f32 %v1983_v43, %v1922_v44  ;;  %v5959_v59 = vpack.c.bf16 %v2781_v30, %v2779_v7  ;;  %v7241_v43 = vld [vmem:[#allocation17_spill] sm:$0xff] }
 0x26e   : > { %v2091_v9 = vmax.f32 %v2059_v22, 0.0  ;;  %v1988_v21 = vpop.f32.mrf.mxu0  ;;  %v1709_v58 = vpop.f32.mrf.mxu2  ;;  %4250 = vmatmul.msk.bf16.gmra.mxu3 %vm197_vm1, %v7239_v34 }
 0x26f   : > { %v1783_v63 = vadd.f32 %v1709_v58, %v7240_v15  ;;  %v2159_v29 = vld [vmem:[#allocation3 + $0x30] sm:$0xff] }
 0x270   : > { %2124 = vst.msk [vmem:[#allocation3 + $0x39] sm:$0xff] %vm253_vm5, %v2091_v9  ;;  %v2468_v19 = vrot.slane %v2159_v29, 1  ;;  %v2782_v7 = vrot.slane %v2159_v29, 2 }
 0x271   : > { %v1849_v49 = vpop.f32.mrf.mxu3 }
 0x272   : > { %v1923_v18 = vadd.f32 %v1849_v49, %v1783_v63 }
 0x274   : > { %v2060_v62 = vadd.f32 %v1986_v24, %v1923_v18 }
 0x276   : > { %v2092_v45 = vmax.f32 %v2060_v62, 0.0  ;;  %v1991_v27 = vpop.f32.mrf.mxu0  ;;  %v1711_v50 = vpop.f32.mrf.mxu2 }
 0x277   : > { %v1784_v17 = vadd.f32 %v1711_v50, %v7241_v43  ;;  %v2160_v44 = vld [vmem:[#allocation3 + $0x38] sm:$0xff]  ;;  %v2161_v30 = vld [vmem:[#allocation3 + $0x40] sm:$0x3] }
 0x278   : > { %2125 = vst.msk [vmem:[#allocation3 + $0x49] sm:$0xff] %vm253_vm5, %v2092_v45  ;;  %v5967_v22 = vpack.c.bf16 %v2160_v44, %v2159_v29  ;;  %v2469_v58 = vrot.slane %v2160_v44, 1  ;;  %v2783_v34 = vrot.slane %v2160_v44, 2  ;;  %v2471_v9 = vrot.slane %v2161_v30, 1 }
 0x279   : > { %4268 = vmatmul.msk.bf16.gmra.mxu0 %vm197_vm1, %v5578_v28  ;;  %v1851_v24 = vpop.f32.mrf.mxu3  ;;  %v2785_v15 = vrot.slane %v2161_v30, 2 }
 0x27a   : > { %7242 = vst [vmem:[#allocation37_spill] sm:$0xff] %v5967_v22  ;;  %v1924_v63 = vadd.f32 %v1851_v24, %v1784_v17  ;;  %4283 = vmatmul.msk.bf16.gmra.mxu1 %vm253_vm5, %v5967_v22  ;;  %v2470_v49 = vsel %vm668_vm3, %v2468_v19, %v2469_v58  ;;  %v2472_v18 = vsel %vm668_vm3, %v2469_v58, %v2471_v9  ;;  %v7244_v19 = vld [vmem:[#allocation18_spill] sm:$0xff] }
 0x27b   : > { %v2784_v62 = vsel %vm971_vm4, %v2782_v7, %v2783_v34  ;;  %4234 = vmatmul.msk.bf16.gmra.mxu2 %vm197_vm1, %v7197_v31  ;;  %v5978_v29 = vpack.c.bf16 %v2472_v18, %v2470_v49  ;;  %v2786_v45 = vsel %vm971_vm4, %v2783_v34, %v2785_v15 }
 0x27c   : > { %v2061_v28 = vadd.f32 %v1988_v21, %v1924_v63  ;;  %v5981_v50 = vpack.c.bf16 %v2786_v45, %v2784_v62  ;;  %v7245_v21 = vld [vmem:[#allocation19_spill] sm:$0xff] }
 0x27e   : > { %7243 = vst [vmem:[#allocation38_spill] sm:$0xff] %v5981_v50  ;;  %v2093_v43 = vmax.f32 %v2061_v28, 0.0  ;;  %v1993_v17 = vpop.f32.mrf.mxu0  ;;  %v1714_v44 = vpop.f32.mrf.mxu2  ;;  %4251 = vmatmul.msk.bf16.gmra.mxu3 %vm197_vm1, %v7195_v54 }
 0x27f   : > { %v1785_v30 = vadd.f32 %v1714_v44, %v7244_v19  ;;  %v2162_v9 = vld [vmem:[#allocation3 + $0x48] sm:$0xff] }
 0x280   : > { %2126 = vst.msk [vmem:[#allocation3 + $0x51] sm:$0xff] %vm253_vm5, %v2093_v43  ;;  %v2473_v18 = vrot.slane %v2162_v9, 1  ;;  %v2787_v62 = vrot.slane %v2162_v9, 2 }
 0x281   : > { %v1854_v7 = vpop.f32.mrf.mxu3 }
 0x282   : > { %v1925_v58 = vadd.f32 %v1854_v7, %v1785_v30 }
 0x284   : > { %v2062_v31 = vadd.f32 %v1991_v27, %v1925_v58 }
 0x286   : > { %v2094_v24 = vmax.f32 %v2062_v31, 0.0  ;;  %v1996_v49 = vpop.f32.mrf.mxu0  ;;  %v1716_v34 = vpop.f32.mrf.mxu2 }
 0x287   : > { %v1786_v15 = vadd.f32 %v1716_v34, %v7245_v21  ;;  %v2163_v63 = vld [vmem:[#allocation3 + $0x50] sm:$0xff]  ;;  %v2164_v45 = vld [vmem:[#allocation3 + $0x58] sm:$0x3] }
 0x288   : > { %2127 = vst.msk [vmem:[#allocation3 + $0x61] sm:$0xff] %vm253_vm5, %v2094_v24  ;;  %v5989_v54 = vpack.c.bf16 %v2163_v63, %v2162_v9  ;;  %v2474_v28 = vrot.slane %v2163_v63, 1  ;;  %v2788_v44 = vrot.slane %v2163_v63, 2  ;;  %v2476_v43 = vrot.slane %v2164_v45, 1 }
 0x289   : > { %4269 = vmatmul.msk.bf16.gmra.mxu0 %vm197_vm1, %v5599_v0  ;;  %v1856_v27 = vpop.f32.mrf.mxu3  ;;  %v2790_v19 = vrot.slane %v2164_v45, 2  ;;  %v7248_v45 = vld [vmem:[#allocation31_spill] sm:$0xff] }
 0x28a   : > { %7246 = vst [vmem:[#allocation39_spill] sm:$0xff] %v5989_v54  ;;  %v1926_v30 = vadd.f32 %v1856_v27, %v1786_v15  ;;  %4284 = vmatmul.msk.bf16.gmra.mxu1 %vm253_vm5, %v5989_v54  ;;  %v2475_v7 = vsel %vm668_vm3, %v2473_v18, %v2474_v28  ;;  %v2477_v58 = vsel %vm668_vm3, %v2474_v28, %v2476_v43  ;;  %v7249_v18 = vld [vmem:[#allocation22_spill] sm:$0xff] }
 0x28b   : > { %v2789_v31 = vsel %vm971_vm4, %v2787_v62, %v2788_v44  ;;  %4235 = vmatmul.msk.bf16.gmra.mxu2 %vm197_vm1, %v7204_v39  ;;  %v6000_v9 = vpack.c.bf16 %v2477_v58, %v2475_v7  ;;  %v2791_v24 = vsel %vm971_vm4, %v2788_v44, %v2790_v19  ;;  %v7250_v7 = vld [vmem:[#allocation23_spill] sm:$0xff] }
 0x28c   : > { %v2063_v0 = vadd.f32 %v1993_v17, %v1926_v30  ;;  %v6003_v34 = vpack.c.bf16 %v2791_v24, %v2789_v31  ;;  %v7251_v58 = vld [vmem:[#allocation15_spill] sm:$0xff] }
 0x28d   : > { %v1658_v44 = vadd.f32 %v7251_v58, %v7250_v7 }
 0x28e   : > { %7247 = vst [vmem:[#allocation40_spill] sm:$0xff] %v6003_v34  ;;  %v2095_v21 = vmax.f32 %v2063_v0, 0.0  ;;  %v1998_v15 = vpop.f32.mrf.mxu0  ;;  %v1719_v63 = vpop.f32.mrf.mxu2  ;;  %4252 = vmatmul.msk.bf16.gmra.mxu3 %vm197_vm1, %v7248_v45 }
 0x28f   : > { %v1787_v28 = vadd.f32 %v1719_v63, %v7249_v18  ;;  %v2165_v27 = vld [vmem:[#allocation3 + $0x60] sm:$0xff] }
 0x290   : > { %2128 = vst.msk [vmem:[#allocation3 + $0x69] sm:$0xff] %vm253_vm5, %v2095_v21  ;;  %v2478_v0 = vrot.slane %v2165_v27, 1  ;;  %v2792_v56 = vrot.slane %v2165_v27, 2 }
 0x291   : > { %v1859_v62 = vpop.f32.mrf.mxu3 }
 0x292   : > { %v1927_v43 = vadd.f32 %v1859_v62, %v1787_v28 }
 0x294   : > { %v2064_v39 = vadd.f32 %v1996_v49, %v1927_v43 }
 0x296   : > { %v2096_v17 = vmax.f32 %v2064_v39, 0.0  ;;  %v2001_v19 = vpop.f32.mrf.mxu0  ;;  %v1721_v30 = vpop.f32.mrf.mxu2 }
 0x297   : > { %v1788_v31 = vadd.f32 %v1721_v30, %v1658_v44  ;;  %v2166_v24 = vld [vmem:[#allocation3 + $0x68] sm:$0xff]  ;;  %v2167_v5 = vld [vmem:[#allocation3 + $0x70] sm:$0x3] }
 0x298   : > { %2129 = vst.msk [vmem:[#allocation3 + $0x79] sm:$0xff] %vm253_vm5, %v2096_v17  ;;  %v6012_v63 = vpack.c.bf16 %v2166_v24, %v2165_v27  ;;  %v2479_v21 = vrot.slane %v2166_v24, 1  ;;  %v2793_v45 = vrot.slane %v2166_v24, 2  ;;  %v2481_v18 = vrot.slane %v2167_v5, 1  ;;  %v7253_v27 = vld [vmem:[#allocation34_spill] sm:$0xff]  ;;  %v7255_v24 = vld [vmem:[#allocation35_spill] sm:$0xff] }
 0x299   : > { %4270 = vmatmul.msk.bf16.gmra.mxu0 %vm197_vm1, %v5626_v35  ;;  %v1861_v49 = vpop.f32.mrf.mxu3  ;;  %v2795_v28 = vrot.slane %v2167_v5, 2 }
 0x29a   : > { %7252 = vst [vmem:[#allocation41_spill] sm:$0xff] %v6012_v63  ;;  %v1928_v62 = vadd.f32 %v1861_v49, %v1788_v31  ;;  %4285 = vmatmul.msk.bf16.gmra.mxu1 %vm253_vm5, %v6012_v63  ;;  %v2480_v43 = vsel %vm668_vm3, %v2478_v0, %v2479_v21  ;;  %v2482_v39 = vsel %vm668_vm3, %v2479_v21, %v2481_v18  ;;  %v7256_v0 = vld [vmem:[#allocation20_spill] sm:$0xff] }
 0x29b   : > { %v2794_v7 = vsel %vm971_vm4, %v2792_v56, %v2793_v45  ;;  %4236 = vmatmul.msk.bf16.gmra.mxu2 %vm197_vm1, %v7253_v27  ;;  %v6023_v58 = vpack.c.bf16 %v2482_v39, %v2480_v43  ;;  %v2796_v44 = vsel %vm971_vm4, %v2793_v45, %v2795_v28  ;;  %v7257_v45 = vld [vmem:[#allocation27_spill] sm:$0xff]  ;;  %v7258_v28 = vld [vmem:[#allocation24_spill] sm:$0xff] }
 0x29c   : > { %v2065_v35 = vadd.f32 %v1998_v15, %v1928_v62  ;;  %v6026_v17 = vpack.c.bf16 %v2796_v44, %v2794_v7  ;;  %v4533_v15 = vld [vmem:[%s7043_s2 + $0x30] sm:$0xff]  ;;  %v1660_v62 = vadd.f32 %v7258_v28, %v7257_v45  ;;  %v2458_v44 = vrot.slane %v5806_v10, 1 }
 0x29d   : > { %3114 = vmatpush.bf16.msrb.mxu0 %v4533_v15  ;;  %v4529_v28 = vld [vmem:[%s7043_s2 + $0x10] sm:$0xff] }
 0x29e   : > { %7254 = vst [vmem:[#allocation42_spill] sm:$0xff] %v6026_v17  ;;  %v2097_v5 = vmax.f32 %v2065_v35, 0.0  ;;  %v2003_v30 = vpop.f32.mrf.mxu0  ;;  %v1724_v31 = vpop.f32.mrf.mxu2  ;;  %4253 = vmatmul.msk.bf16.gmra.mxu3 %vm197_vm1, %v7255_v24  ;;  %v2459_v35 = vrot.slane %v5812_v47, 1  ;;  %2658 = vmatpush.bf16.msrb.mxu2 %v4529_v28 }
 0x29f   : > { %v1789_v21 = vadd.f32 %v1724_v31, %v7256_v0  ;;  %v2168_v43 = vld [vmem:[#allocation3 + $0x78] sm:$0xff] }
 0x2a0   : > { %2130 = vst.msk [vmem:[#allocation3 + $0x81] sm:$0xff] %vm253_vm5, %v2097_v5  ;;  %v2483_v24 = vrot.slane %v2168_v43, 1  ;;  %v2797_v45 = vrot.slane %v2168_v43, 2 }
 0x2a1   : > { %v1864_v56 = vpop.f32.mrf.mxu3 }
 0x2a2   : > { %v1929_v18 = vadd.f32 %v1864_v56, %v1789_v21 }
 0x2a4   : > { %v2066_v49 = vadd.f32 %v2001_v19, %v1929_v18 }
 0x2a6   : > { %v2098_v39 = vmax.f32 %v2066_v49, 0.0  ;;  %v2006_v7 = vpop.f32.mrf.mxu0  ;;  %v1726_v27 = vpop.f32.mrf.mxu2  ;;  %v2772_v49 = vrot.slane %v5806_v10, 2 }
 0x2a7   : > { %v1790_v5 = vadd.f32 %v1726_v27, %v1660_v62  ;;  %v2169_v31 = vld [vmem:[#allocation3 + $0x80] sm:$0xff]  ;;  %v2170_v19 = vld [vmem:[#allocation3 + $0x88] sm:$0x3]  ;;  %v2155_v62 = vld [vmem:[#allocation3 + $0x10] sm:$0x3] }
 0x2a8   : > { %2131 = vst.msk [vmem:[#allocation3 + $0x91] sm:$0xff] %vm253_vm5, %v2098_v39  ;;  %v6040_v0 = vpack.c.bf16 %v2169_v31, %v2168_v43  ;;  %v2484_v21 = vrot.slane %v2169_v31, 1  ;;  %v2798_v56 = vrot.slane %v2169_v31, 2  ;;  %v2486_v18 = vrot.slane %v2170_v19, 1  ;;  %v426_v43 = vld [vmem:[#allocation2 + $0x1a0] sm:$0xff] }
 0x2a9   : > { %4271 = vmatmul.msk.bf16.gmra.mxu0 %vm197_vm1, %v5666_v13  ;;  %v1866_v15 = vpop.f32.mrf.mxu3  ;;  %v2800_v27 = vrot.slane %v2170_v19, 2  ;;  %v2461_v39 = vrot.slane %v2155_v62, 1  ;;  %v6055_v13 = vld [vmem:[#allocation2 + $0x198] sm:$0xff] }
 0x2aa   : > { %7259 = vst [vmem:[#allocation43_spill] sm:$0xff] %v6040_v0  ;;  %v1930_v61 = vadd.f32 %v1866_v15, %v1790_v5  ;;  %4286 = vmatmul.msk.bf16.gmra.mxu1 %vm253_vm5, %v6040_v0  ;;  %v2485_v31 = vsel %vm668_vm3, %v2483_v24, %v2484_v21  ;;  %v2487_v10 = vsel %vm668_vm3, %v2484_v21, %v2486_v18  ;;  %v4531_v18 = vld [vmem:[%s7043_s2 + $0x20] sm:$0xff] }
 0x2ab   : > { %4237 = vmatmul.msk.bf16.gmra.mxu2 %vm197_vm1, %v5668_v8  ;;  %v6057_v41 = vpack.c.bf16 %v2487_v10, %v2485_v31  ;;  %v2799_v5 = vsel %vm971_vm4, %v2797_v45, %v2798_v56  ;;  %v2801_v19 = vsel %vm971_vm4, %v2798_v56, %v2800_v27  ;;  %v6062_v24 = vsel %vm668_vm3, %v2458_v44, %v2459_v35 }
 0x2ac   : > { %v2067_v15 = vadd.f32 %v2003_v30, %v1930_v61  ;;  %v6065_v47 = vsel %vm668_vm3, %v2459_v35, %v2461_v39  ;;  %v6067_v21 = vpack.c.bf16 %v2801_v19, %v2799_v5  ;;  %v2775_v45 = vrot.slane %v2155_v62, 2  ;;  %2972 = vmatpush.bf16.msrb.mxu3 %v4531_v18 }
 0x2ad   : > { %v1951_v30 = vrot.slane %v6055_v13, 2  ;;  %v1952_v44 = vrot.slane %v426_v43, 2  ;;  %v1954_v35 = vrot.slane %v427_v26, 2  ;;  %v6079_v27 = vsel %vm971_vm4, %v2772_v49, %v2773_v53 }
 0x2ae   : > { %7260 = vst [vmem:[#allocation44_spill] sm:$0xff] %v6067_v21  ;;  %v2099_v31 = vmax.f32 %v2067_v15, 0.0  ;;  %v2008_v56 = vpop.f32.mrf.mxu0  ;;  %v1729_v61 = vpop.f32.mrf.mxu2  ;;  %4254 = vmatmul.msk.bf16.gmra.mxu3 %vm197_vm1, %v5657_v16  ;;  %v6082_v39 = vsel %vm971_vm4, %v2773_v53, %v2775_v45  ;;  %v1815_v15 = vrot.slane %v426_v43, 1  ;;  %v1817_v18 = vrot.slane %v427_v26, 1 }
 0x2af   : > { %v1791_v28 = vadd.f32 %v1729_v61, %v5659_v51  ;;  %v1953_v5 = vsel %vm971_vm4, %v1951_v30, %v1952_v44  ;;  %v1955_v19 = vsel %vm971_vm4, %v1952_v44, %v1954_v35  ;;  %v1814_v51 = vrot.slane %v6055_v13, 1  ;;  %v2171_v61 = vld [vmem:[#allocation3 + $0x90] sm:$0xff] }
 0x2b0   : > { %2132 = vst.msk [vmem:[#allocation3 + $0x99] sm:$0xff] %vm253_vm5, %v2099_v31  ;;  %v1662_v53 = vadd.f32 %v5655_v2, %v5672_v57  ;;  %v1958_v45 = vpack.c.bf16 %v1955_v19, %v1953_v5  ;;  %v1681_v62 = vpack.c.bf16 %v426_v43, %v6055_v13  ;;  %v2488_v30 = vrot.slane %v2171_v61, 1 }
 0x2b1   : > { %v1869_v10 = vpop.f32.mrf.mxu3  ;;  %v1816_v44 = vsel %vm668_vm3, %v1814_v51, %v1815_v15  ;;  %v1818_v35 = vsel %vm668_vm3, %v1815_v15, %v1817_v18  ;;  %v2802_v2 = vrot.slane %v2171_v61, 2 }
 0x2b2   : > { %v1931_v16 = vadd.f32 %v1869_v10, %v1791_v28  ;;  %v1821_v43 = vpack.c.bf16 %v1818_v35, %v1816_v44  ;;  %v1664_v35 = vadd.f32 %v5682_v52, %v5691_v55 }
 0x2b4   : > { %v2068_v49 = vadd.f32 %v2006_v7, %v1931_v16 }
 0x2b6   : > { %v2100_v31 = vmax.f32 %v2068_v49, 0.0  ;;  %v2011_v8 = vpop.f32.mrf.mxu0  ;;  %v1731_v3 = vpop.f32.mrf.mxu2 }
 0x2b7   : > { %v1792_v28 = vadd.f32 %v1731_v3, %v1662_v53  ;;  %v2172_v10 = vld [vmem:[#allocation3 + $0x98] sm:$0xff]  ;;  %v2173_v14 = vld [vmem:[#allocation3 + $0xa0] sm:$0x3] }
 0x2b8   : > { %2133 = vst.msk [vmem:[#allocation3 + $0xa9] sm:$0xff] %vm253_vm5, %v2100_v31  ;;  %v6096_v26 = vpack.c.bf16 %v2172_v10, %v2171_v61  ;;  %v2489_v7 = vrot.slane %v2172_v10, 1  ;;  %v2803_v57 = vrot.slane %v2172_v10, 2  ;;  %v2491_v5 = vrot.slane %v2173_v14, 1 }
 0x2b9   : > { %4272 = vmatmul.msk.bf16.gmra.mxu0 %vm197_vm1, %v1958_v45  ;;  %v1871_v16 = vpop.f32.mrf.mxu3  ;;  %v2805_v13 = vrot.slane %v2173_v14, 2 }
 0x2ba   : > { %7261 = vst [vmem:[#allocation45_spill] sm:$0xff] %v6096_v26  ;;  %v1932_v3 = vadd.f32 %v1871_v16, %v1792_v28  ;;  %4287 = vmatmul.msk.bf16.gmra.mxu1 %vm253_vm5, %v6096_v26  ;;  %v2490_v19 = vsel %vm668_vm3, %v2488_v30, %v2489_v7  ;;  %v2804_v51 = vsel %vm971_vm4, %v2802_v2, %v2803_v57 }
 0x2bb   : > { %4238 = vmatmul.msk.bf16.gmra.mxu2 %vm197_vm1, %v1681_v62  ;;  %v2492_v15 = vsel %vm668_vm3, %v2489_v7, %v2491_v5  ;;  %v2806_v18 = vsel %vm971_vm4, %v2803_v57, %v2805_v13  ;;  %v4535_v62 = vld [vmem:[%s7043_s2 + $0x40] sm:$0xff] }
 0x2bc   : > { %v2069_v49 = vadd.f32 %v2008_v56, %v1932_v3  ;;  %v6106_v61 = vpack.c.bf16 %v2492_v15, %v2490_v19  ;;  %v6108_v53 = vpack.c.bf16 %v2806_v18, %v2804_v51  ;;  %3266 = vmatpush.bf16.msrb.mxu1 %v4535_v62 }
 0x2be   : > { %7262 = vst [vmem:[#allocation7_spill] sm:$0xff] %v6108_v53  ;;  %v2101_v14 = vmax.f32 %v2069_v49, 0.0  ;;  %v2013_v45 = vpop.f32.mrf.mxu0  ;;  %v1734_v31 = vpop.f32.mrf.mxu2  ;;  %4255 = vmatmul.msk.bf16.gmra.mxu3 %vm197_vm1, %v1821_v43 }
 0x2bf   : > { %v1793_v28 = vadd.f32 %v1734_v31, %v5684_v25  ;;  %v2174_v44 = vld [vmem:[#allocation3 + $0xa8] sm:$0xff]  ;;  %v7264_v31 = vpack.c.bf16 %v6065_v47, %v6062_v24 }
 0x2c0   : > { %2134 = vst.msk [vmem:[#allocation3 + $0xb1] sm:$0xff] %vm253_vm5, %v2101_v14  ;;  %v2493_v25 = vrot.slane %v2174_v44, 1  ;;  %v2807_v13 = vrot.slane %v2174_v44, 2 }
 0x2c1   : > { %v1874_v10 = vpop.f32.mrf.mxu3 }
 0x2c2   : > { %v1933_v30 = vadd.f32 %v1874_v10, %v1793_v28 }
 0x2c4   : > { %v2070_v56 = vadd.f32 %v2011_v8, %v1933_v30  ;;  %v6137_v30 = vpop.f32.mrf.mxu1 }
 0x2c6   : > { %v2102_v7 = vmax.f32 %v2070_v56, 0.0  ;;  %v2016_v2 = vpop.f32.mrf.mxu0  ;;  %v1736_v57 = vpop.f32.mrf.mxu2 }
 0x2c7   : > { %v1794_v16 = vadd.f32 %v1736_v57, %v1664_v35  ;;  %v2175_v5 = vld [vmem:[#allocation3 + $0xb0] sm:$0xff]  ;;  %v2176_v3 = vld [vmem:[#allocation3 + $0xb8] sm:$0x3] }
 0x2c8   : > { %2135 = vst.msk [vmem:[#allocation3 + $0xc1] sm:$0xff] %vm253_vm5, %v2102_v7  ;;  %v6119_v43 = vpack.c.bf16 %v2175_v5, %v2174_v44  ;;  %v2494_v19 = vrot.slane %v2175_v5, 1  ;;  %v2808_v51 = vrot.slane %v2175_v5, 2  ;;  %v2496_v15 = vrot.slane %v2176_v3, 1 }
 0x2c9   : > { %4365 = vmatmul.msk.bf16.vlgmr.msrb.gmra.mxu0 %vm253_vm5, %v5945_v42  ;;  %v1876_v8 = vpop.f32.mrf.mxu3  ;;  %v2810_v52 = vrot.slane %v2176_v3, 2  ;;  %v7266_v7 = vpack.c.bf16 %v6082_v39, %v6079_v27  ;;  %v1666_v5 = vadd.f32 %v5696_v46, %v5705_v32 }
 0x2ca   : > { %7263 = vst [vmem:[#allocation8_spill] sm:$0xff] %v6119_v43  ;;  %v1934_v55 = vadd.f32 %v1876_v8, %v1794_v16  ;;  %4288 = vmatmul.msk.bf16.gmra.mxu1 %vm253_vm5, %v6119_v43  ;;  %v2495_v18 = vsel %vm668_vm3, %v2493_v25, %v2494_v19  ;;  %v2497_v49 = vsel %vm668_vm3, %v2494_v19, %v2496_v15 }
 0x2cb   : > { %v2809_v14 = vsel %vm971_vm4, %v2807_v13, %v2808_v51  ;;  %4309 = vmatmul.msk.bf16.vlgmr.msrb.gmra.mxu2 %vm253_vm5, %v7264_v31  ;;  %v6132_v28 = vpack.c.bf16 %v2497_v49, %v2495_v18  ;;  %v2811_v42 = vsel %vm971_vm4, %v2808_v51, %v2810_v52 }
 0x2cc   : > { %v2071_v62 = vadd.f32 %v2013_v45, %v1934_v55  ;;  %v6135_v10 = vpack.c.bf16 %v2811_v42, %v2809_v14  ;;  %v6147_v25 = vpop.f32.mrf.mxu1 }
 0x2ce   : > { %7265 = vst [vmem:[#allocation46_spill] sm:$0xff] %v6135_v10  ;;  %v2103_v56 = vmax.f32 %v2071_v62, 0.0  ;;  %v2018_v44 = vpop.f32.mrf.mxu0  ;;  %v1739_v35 = vpop.f32.mrf.mxu2  ;;  %4337 = vmatmul.msk.bf16.vlgmr.msrb.gmra.mxu3 %vm253_vm5, %v7266_v7 }
 0x2cf   : > { %v1795_v24 = vadd.f32 %v1739_v35, %v5698_v4  ;;  %v2177_v45 = vld [vmem:[#allocation3 + $0xc0] sm:$0xff] }
 0x2d0   : > { %2136 = vst.msk [vmem:[#allocation3 + $0xc9] sm:$0xff] %vm253_vm5, %v2103_v56  ;;  %v2498_v39 = vrot.slane %v2177_v45, 1  ;;  %v2812_v15 = vrot.slane %v2177_v45, 2 }
 0x2d1   : > { %v1879_v47 = vpop.f32.mrf.mxu3 }
 0x2d2   : > { %v1935_v57 = vadd.f32 %v1879_v47, %v1795_v24 }
 0x2d4   : > { %v2072_v16 = vadd.f32 %v2016_v2, %v1935_v57  ;;  %v6168_v57 = vpop.f32.mrf.mxu1 }
 0x2d6   : > { %v2104_v13 = vmax.f32 %v2072_v16, 0.0  ;;  %v2021_v3 = vpop.f32.mrf.mxu0  ;;  %v1741_v19 = vpop.f32.mrf.mxu2 }
 0x2d7   : > { %v1796_v51 = vadd.f32 %v1741_v19, %v1666_v5  ;;  %v2178_v27 = vld [vmem:[#allocation3 + $0xc8] sm:$0xff]  ;;  %v2179_v8 = vld [vmem:[#allocation3 + $0xd0] sm:$0x3] }
 0x2d8   : > { %2137 = vst.msk [vmem:[#allocation3 + $0xd9] sm:$0xff] %vm253_vm5, %v2104_v13  ;;  %v6150_v4 = vpack.c.bf16 %v2178_v27, %v2177_v45  ;;  %v2499_v52 = vrot.slane %v2178_v27, 1  ;;  %v2813_v2 = vrot.slane %v2178_v27, 2  ;;  %v2501_v55 = vrot.slane %v2179_v8, 1 }
 0x2d9   : > { %4366 = vmatmul.msk.bf16.gmra.mxu0 %vm253_vm5, %v5967_v22  ;;  %v1881_v46 = vpop.f32.mrf.mxu3  ;;  %v2815_v32 = vrot.slane %v2179_v8, 2 }
 0x2da   : > { %7267 = vst [vmem:[#allocation47_spill] sm:$0xff] %v6150_v4  ;;  %v1936_v18 = vadd.f32 %v1881_v46, %v1796_v51  ;;  %4289 = vmatmul.msk.bf16.gmra.mxu1 %vm253_vm5, %v6150_v4  ;;  %v2500_v49 = vsel %vm668_vm3, %v2498_v39, %v2499_v52  ;;  %v2502_v14 = vsel %vm668_vm3, %v2499_v52, %v2501_v55 }
 0x2db   : > { %v2814_v31 = vsel %vm971_vm4, %v2812_v15, %v2813_v2  ;;  %4310 = vmatmul.msk.bf16.gmra.mxu2 %vm253_vm5, %v5956_v33  ;;  %v6161_v42 = vpack.c.bf16 %v2502_v14, %v2500_v49  ;;  %v2816_v62 = vsel %vm971_vm4, %v2813_v2, %v2815_v32 }
 0x2dc   : > { %v2073_v56 = vadd.f32 %v2018_v44, %v1936_v18  ;;  %v6164_v35 = vpack.c.bf16 %v2816_v62, %v2814_v31  ;;  %v1668_v44 = vadd.f32 %v5710_v11, %v5719_v6 }
 0x2de   : > { %7268 = vst [vmem:[#allocation9_spill] sm:$0xff] %v6164_v35  ;;  %v2105_v7 = vmax.f32 %v2073_v56, 0.0  ;;  %v2023_v24 = vpop.f32.mrf.mxu0  ;;  %v1744_v47 = vpop.f32.mrf.mxu2  ;;  %4338 = vmatmul.msk.bf16.gmra.mxu3 %vm253_vm5, %v5959_v59 }
 0x2df   : > { %v1797_v16 = vadd.f32 %v1744_v47, %v5712_v37  ;;  %v2180_v19 = vld [vmem:[#allocation3 + $0xd8] sm:$0xff] }
 0x2e0   : > { %2138 = vst.msk [vmem:[#allocation3 + $0xe1] sm:$0xff] %vm253_vm5, %v2105_v7  ;;  %v2503_v2 = vrot.slane %v2180_v19, 1  ;;  %v2817_v32 = vrot.slane %v2180_v19, 2 }
 0x2e1   : > { %v1884_v45 = vpop.f32.mrf.mxu3 }
 0x2e2   : > { %v1937_v5 = vadd.f32 %v1884_v45, %v1797_v16 }
 0x2e4   : > { %v2074_v13 = vadd.f32 %v2021_v3, %v1937_v5 }
 0x2e6   : > { %v2106_v51 = vmax.f32 %v2074_v13, 0.0  ;;  %v2026_v27 = vpop.f32.mrf.mxu0  ;;  %v1746_v39 = vpop.f32.mrf.mxu2 }
 0x2e7   : > { %v1798_v15 = vadd.f32 %v1746_v39, %v1668_v44  ;;  %v6174_v8 = vpop.f32.mrf.mxu1  ;;  %v2181_v52 = vld [vmem:[#allocation3 + $0xe0] sm:$0xff]  ;;  %v2182_v55 = vld [vmem:[#allocation3 + $0xe8] sm:$0x3] }
 0x2e8   : > { %2139 = vst.msk [vmem:[#allocation3 + $0xf1] sm:$0xff] %vm253_vm5, %v2106_v51  ;;  %v6177_v37 = vpack.c.bf16 %v2181_v52, %v2180_v19  ;;  %v2504_v46 = vrot.slane %v2181_v52, 1  ;;  %v2818_v3 = vrot.slane %v2181_v52, 2  ;;  %v2506_v6 = vrot.slane %v2182_v55, 1 }
 0x2e9   : > { %4367 = vmatmul.msk.bf16.gmra.mxu0 %vm253_vm5, %v5989_v54  ;;  %v1886_v11 = vpop.f32.mrf.mxu3  ;;  %v2820_v18 = vrot.slane %v2182_v55, 2  ;;  %v1670_v52 = vadd.f32 %v5724_v20, %v5733_v60 }
 0x2ea   : > { %7269 = vst [vmem:[#allocation10_spill] sm:$0xff] %v6177_v37  ;;  %v1938_v49 = vadd.f32 %v1886_v11, %v1798_v15  ;;  %4290 = vmatmul.msk.bf16.gmra.mxu1 %vm253_vm5, %v6177_v37  ;;  %v2505_v14 = vsel %vm668_vm3, %v2503_v2, %v2504_v46  ;;  %v2819_v31 = vsel %vm971_vm4, %v2817_v32, %v2818_v3 }
 0x2eb   : > { %4311 = vmatmul.msk.bf16.gmra.mxu2 %vm253_vm5, %v5978_v29  ;;  %v2507_v62 = vsel %vm668_vm3, %v2504_v46, %v2506_v6  ;;  %v2821_v56 = vsel %vm971_vm4, %v2818_v3, %v2820_v18 }
 0x2ec   : > { %v2075_v7 = vadd.f32 %v2023_v24, %v1938_v49  ;;  %v6189_v47 = vpack.c.bf16 %v2507_v62, %v2505_v14  ;;  %v6191_v16 = vpack.c.bf16 %v2821_v56, %v2819_v31 }
 0x2ee   : > { %v2107_v45 = vmax.f32 %v2075_v7, 0.0  ;;  %v2028_v5 = vpop.f32.mrf.mxu0  ;;  %v1749_v13 = vpop.f32.mrf.mxu2  ;;  %4339 = vmatmul.msk.bf16.gmra.mxu3 %vm253_vm5, %v5981_v50 }
 0x2ef   : > { %v1799_v19 = vadd.f32 %v1749_v13, %v5726_v40  ;;  %v6196_v44 = vpop.f32.mrf.mxu1  ;;  %v2183_v24 = vld [vmem:[#allocation3 + $0xf0] sm:$0xff] }
 0x2f0   : > { %2140 = vst.msk [vmem:[#allocation3 + $0xf9] sm:$0xff] %vm253_vm5, %v2107_v45  ;;  %v2508_v6 = vrot.slane %v2183_v24, 1  ;;  %v2822_v14 = vrot.slane %v2183_v24, 2 }
 0x2f1   : > { %v1889_v51 = vpop.f32.mrf.mxu3 }
 0x2f2   : > { %v1939_v39 = vadd.f32 %v1889_v51, %v1799_v19 }
 0x2f4   : > { %v2076_v15 = vadd.f32 %v2026_v27, %v1939_v39 }
 0x2f6   : > { %v2108_v2 = vmax.f32 %v2076_v15, 0.0  ;;  %v2031_v55 = vpop.f32.mrf.mxu0  ;;  %v1751_v46 = vpop.f32.mrf.mxu2 }
 0x2f7   : > { %v1800_v32 = vadd.f32 %v1751_v46, %v1670_v52  ;;  %v6201_v3 = vpop.f32.mrf.mxu1  ;;  %v2184_v11 = vld [vmem:[#allocation3 + $0xf8] sm:$0xff]  ;;  %v2185_v40 = vld [vmem:[#allocation3 + $0x100] sm:$0x3] }
 0x2f8   : > { %2141 = vst.msk [vmem:[#allocation3 + $0x109] sm:$0xff] %vm253_vm5, %v2108_v2  ;;  %v6204_v18 = vpack.c.bf16 %v2184_v11, %v2183_v24  ;;  %v2509_v49 = vrot.slane %v2184_v11, 1  ;;  %v2823_v27 = vrot.slane %v2184_v11, 2  ;;  %v2511_v60 = vrot.slane %v2185_v40, 1 }
 0x2f9   : > { %4368 = vmatmul.msk.bf16.gmra.mxu0 %vm253_vm5, %v6012_v63  ;;  %v1891_v20 = vpop.f32.mrf.mxu3  ;;  %v2825_v31 = vrot.slane %v2185_v40, 2  ;;  %v1672_v40 = vadd.f32 %v5738_v48, %v5747_v12 }
 0x2fa   : > { %7270 = vst [vmem:[#allocation48_spill] sm:$0xff] %v6204_v18  ;;  %v1940_v62 = vadd.f32 %v1891_v20, %v1800_v32  ;;  %4291 = vmatmul.msk.bf16.gmra.mxu1 %vm253_vm5, %v6204_v18  ;;  %v2510_v56 = vsel %vm668_vm3, %v2508_v6, %v2509_v49  ;;  %v2824_v7 = vsel %vm971_vm4, %v2822_v14, %v2823_v27 }
 0x2fb   : > { %4312 = vmatmul.msk.bf16.gmra.mxu2 %vm253_vm5, %v6000_v9  ;;  %v2512_v45 = vsel %vm668_vm3, %v2509_v49, %v2511_v60  ;;  %v2826_v13 = vsel %vm971_vm4, %v2823_v27, %v2825_v31 }
 0x2fc   : > { %v2077_v19 = vadd.f32 %v2028_v5, %v1940_v62  ;;  %v6216_v51 = vpack.c.bf16 %v2512_v45, %v2510_v56  ;;  %v6218_v39 = vpack.c.bf16 %v2826_v13, %v2824_v7 }
 0x2fe   : > { %v2109_v15 = vmax.f32 %v2077_v19, 0.0  ;;  %v2033_v24 = vpop.f32.mrf.mxu0  ;;  %v1754_v52 = vpop.f32.mrf.mxu2  ;;  %4340 = vmatmul.msk.bf16.gmra.mxu3 %vm253_vm5, %v6003_v34 }
 0x2ff   : > { %v1801_v2 = vadd.f32 %v1754_v52, %v5740_v38  ;;  %v6223_v46 = vpop.f32.mrf.mxu1  ;;  %v2186_v5 = vld [vmem:[#allocation3 + $0x108] sm:$0xff] }
 0x300   : > { %2142 = vst.msk [vmem:[#allocation3 + $0x111] sm:$0xff] %vm253_vm5, %v2109_v15  ;;  %v2513_v62 = vrot.slane %v2186_v5, 1  ;;  %v2827_v45 = vrot.slane %v2186_v5, 2 }
 0x301   : > { %v1894_v32 = vpop.f32.mrf.mxu3 }
 0x302   : > { %v1941_v11 = vadd.f32 %v1894_v32, %v1801_v2 }
 0x304   : > { %v2078_v6 = vadd.f32 %v2031_v55, %v1941_v11 }
 0x306   : > { %v2110_v49 = vmax.f32 %v2078_v6, 0.0  ;;  %v2036_v14 = vpop.f32.mrf.mxu0  ;;  %v1756_v27 = vpop.f32.mrf.mxu2 }
 0x307   : > { %v1802_v20 = vadd.f32 %v1756_v27, %v1672_v40  ;;  %v6228_v60 = vpop.f32.mrf.mxu1  ;;  %v2187_v31 = vld [vmem:[#allocation3 + $0x110] sm:$0xff]  ;;  %v2188_v38 = vld [vmem:[#allocation3 + $0x118] sm:$0x3] }
 0x308   : > { %2143 = vst.msk [vmem:[#allocation3 + $0x121] sm:$0xff] %vm253_vm5, %v2110_v49  ;;  %v6231_v56 = vpack.c.bf16 %v2187_v31, %v2186_v5  ;;  %v2514_v7 = vrot.slane %v2187_v31, 1  ;;  %v2828_v55 = vrot.slane %v2187_v31, 2  ;;  %v2516_v12 = vrot.slane %v2188_v38, 1 }
 0x309   : > { %4369 = vmatmul.msk.bf16.gmra.mxu0 %vm253_vm5, %v6040_v0  ;;  %v1896_v48 = vpop.f32.mrf.mxu3  ;;  %v2830_v13 = vrot.slane %v2188_v38, 2 }
 0x30a   : > { %7271 = vst [vmem:[#allocation49_spill] sm:$0xff] %v6231_v56  ;;  %v1942_v19 = vadd.f32 %v1896_v48, %v1802_v20  ;;  %4292 = vmatmul.msk.bf16.gmra.mxu1 %vm253_vm5, %v6231_v56  ;;  %v2515_v15 = vsel %vm668_vm3, %v2513_v62, %v2514_v7  ;;  %v2829_v52 = vsel %vm971_vm4, %v2827_v45, %v2828_v55 }
 0x30b   : > { %4313 = vmatmul.msk.bf16.gmra.mxu2 %vm253_vm5, %v6023_v58  ;;  %v2517_v2 = vsel %vm668_vm3, %v2514_v7, %v2516_v12  ;;  %v2831_v32 = vsel %vm971_vm4, %v2828_v55, %v2830_v13  ;;  %v1674_v45 = vadd.f32 %v5752_v1, %v5761_v36 }
 0x30c   : > { %v2079_v11 = vadd.f32 %v2033_v24, %v1942_v19  ;;  %v6243_v6 = vpack.c.bf16 %v2517_v2, %v2515_v15  ;;  %v6245_v5 = vpack.c.bf16 %v2831_v32, %v2829_v52 }
 0x30e   : > { %7272 = vst [vmem:[#allocation13_spill] sm:$0xff] %v6245_v5  ;;  %v2111_v40 = vmax.f32 %v2079_v11, 0.0  ;;  %v2038_v49 = vpop.f32.mrf.mxu0  ;;  %v1759_v27 = vpop.f32.mrf.mxu2  ;;  %4341 = vmatmul.msk.bf16.gmra.mxu3 %vm253_vm5, %v6026_v17 }
 0x30f   : > { %v1803_v20 = vadd.f32 %v1759_v27, %v5754_v23  ;;  %v6250_v31 = vpop.f32.mrf.mxu1  ;;  %v2189_v24 = vld [vmem:[#allocation3 + $0x120] sm:$0xff] }
 0x310   : > { %2144 = vst.msk [vmem:[#allocation3 + $0x129] sm:$0xff] %vm253_vm5, %v2111_v40  ;;  %v2518_v52 = vrot.slane %v2189_v24, 1  ;;  %v2832_v11 = vrot.slane %v2189_v24, 2 }
 0x311   : > { %v1899_v62 = vpop.f32.mrf.mxu3 }
 0x312   : > { %v1943_v38 = vadd.f32 %v1899_v62, %v1803_v20 }
 0x314   : > { %v2080_v7 = vadd.f32 %v2036_v14, %v1943_v38 }
 0x316   : > { %v2112_v55 = vmax.f32 %v2080_v7, 0.0  ;;  %v2041_v48 = vpop.f32.mrf.mxu0  ;;  %v1761_v12 = vpop.f32.mrf.mxu2 }
 0x317   : > { %v1804_v13 = vadd.f32 %v1761_v12, %v1674_v45  ;;  %v6255_v19 = vpop.f32.mrf.mxu1  ;;  %v2190_v15 = vld [vmem:[#allocation3 + $0x128] sm:$0xff]  ;;  %v2191_v23 = vld [vmem:[#allocation3 + $0x130] sm:$0x3] }
 0x318   : > { %2145 = vst.msk [vmem:[#allocation3 + $0x139] sm:$0xff] %vm253_vm5, %v2112_v55  ;;  %v6258_v2 = vpack.c.bf16 %v2190_v15, %v2189_v24  ;;  %v2519_v32 = vrot.slane %v2190_v15, 1  ;;  %v2833_v14 = vrot.slane %v2190_v15, 2  ;;  %v2521_v36 = vrot.slane %v2191_v23, 1 }
 0x319   : > { %4370 = vmatmul.msk.bf16.gmra.mxu0 %vm253_vm5, %v6096_v26  ;;  %v1901_v1 = vpop.f32.mrf.mxu3  ;;  %v2835_v40 = vrot.slane %v2191_v23, 2 }
 0x31a   : > { %7273 = vst [vmem:[#allocation16_spill] sm:$0xff] %v6258_v2  ;;  %v1944_v27 = vadd.f32 %v1901_v1, %v1804_v13  ;;  %4293 = vmatmul.msk.bf16.gmra.mxu1 %vm253_vm5, %v6258_v2  ;;  %v2520_v20 = vsel %vm668_vm3, %v2518_v52, %v2519_v32  ;;  %v2834_v62 = vsel %vm971_vm4, %v2832_v11, %v2833_v14  ;;  %v7275_v52 = vld [vmem:[#allocation29_spill] sm:$0xff] }
 0x31b   : > { %4314 = vmatmul.msk.bf16.gmra.mxu2 %vm253_vm5, %v6057_v41  ;;  %v2522_v38 = vsel %vm668_vm3, %v2519_v32, %v2521_v36  ;;  %v2836_v7 = vsel %vm971_vm4, %v2833_v14, %v2835_v40  ;;  %v7276_v36 = vld [vmem:[#allocation26_spill] sm:$0xff]  ;;  %v7277_v40 = vld [vmem:[#allocation28_spill] sm:$0xff] }
 0x31c   : > { %v2081_v24 = vadd.f32 %v2038_v49, %v1944_v27  ;;  %v6270_v45 = vpack.c.bf16 %v2522_v38, %v2520_v20  ;;  %v6272_v55 = vpack.c.bf16 %v2836_v7, %v2834_v62  ;;  %v1676_v27 = vadd.f32 %v7277_v40, %v7276_v36 }
 0x31e   : > { %7274 = vst [vmem:[#allocation14_spill] sm:$0xff] %v6272_v55  ;;  %v2113_v12 = vmax.f32 %v2081_v24, 0.0  ;;  %v2043_v13 = vpop.f32.mrf.mxu0  ;;  %v1764_v15 = vpop.f32.mrf.mxu2  ;;  %4342 = vmatmul.msk.bf16.gmra.mxu3 %vm253_vm5, %v6067_v21 }
 0x31f   : > { %v1805_v23 = vadd.f32 %v1764_v15, %v7275_v52  ;;  %v6277_v11 = vpop.f32.mrf.mxu1  ;;  %v2192_v49 = vld [vmem:[#allocation3 + $0x138] sm:$0xff] }
 0x320   : > { %2146 = vst.msk [vmem:[#allocation3 + $0x141] sm:$0xff] %vm253_vm5, %v2113_v12  ;;  %v2523_v21 = vrot.slane %v2192_v49, 1 }
 0x321   : > { %v1904_v32 = vpop.f32.mrf.mxu3 }
 0x322   : > { %v1945_v1 = vadd.f32 %v1904_v32, %v1805_v23  ;;  %v2837_v23 = vrot.slane %v2192_v49, 2 }
 0x324   : > { %v2082_v14 = vadd.f32 %v2041_v48, %v1945_v1 }
 0x326   : > { %v2114_v20 = vmax.f32 %v2082_v14, 0.0  ;;  %v2046_v62 = vpop.f32.mrf.mxu0  ;;  %v1766_v38 = vpop.f32.mrf.mxu2 }
 0x327   : > { %v1806_v7 = vadd.f32 %v1766_v38, %v1676_v27  ;;  %v6282_v24 = vpop.f32.mrf.mxu1  ;;  %v2193_v26 = vld [vmem:[#allocation3 + $0x140] sm:$0xff]  ;;  %v2194_v15 = vld [vmem:[#allocation3 + $0x148] sm:$0x3] }
 0x328   : > { %2147 = vst.msk [vmem:[#allocation3 + $0x151] sm:$0xff] %vm253_vm5, %v2114_v20  ;;  %v6285_v52 = vpack.c.bf16 %v2193_v26, %v2192_v49  ;;  %v2524_v12 = vrot.slane %v2193_v26, 1  ;;  %v2838_v48 = vrot.slane %v2193_v26, 2  ;;  %v2526_v1 = vrot.slane %v2194_v15, 1 }
 0x329   : > { %4371 = vmatmul.msk.bf16.gmra.mxu0 %vm253_vm5, %v6119_v43  ;;  %v1906_v32 = vpop.f32.mrf.mxu3  ;;  %v2840_v14 = vrot.slane %v2194_v15, 2 }
 0x32a   : > { %7278 = vst [vmem:[#allocation12_spill] sm:$0xff] %v6285_v52  ;;  %v1946_v36 = vadd.f32 %v1906_v32, %v1806_v7  ;;  %4294 = vmatmul.msk.bf16.gmra.mxu1 %vm253_vm5, %v6285_v52  ;;  %v2525_v40 = vsel %vm668_vm3, %v2523_v21, %v2524_v12  ;;  %v2839_v27 = vsel %vm971_vm4, %v2837_v23, %v2838_v48  ;;  %v7280_v21 = vld [vmem:[#allocation25_spill] sm:$0xff] }
 0x32b   : > { %4315 = vmatmul.msk.bf16.gmra.mxu2 %vm253_vm5, %v6106_v61  ;;  %v2527_v49 = vsel %vm668_vm3, %v2524_v12, %v2526_v1  ;;  %v2841_v26 = vsel %vm971_vm4, %v2838_v48, %v2840_v14  ;;  %v4540_v12 = vld [vmem:[%s7043_s2 + $0x68] sm:$0xff] }
 0x32c   : > { %v2083_v20 = vadd.f32 %v2043_v13, %v1946_v36  ;;  %v6297_v38 = vpack.c.bf16 %v2527_v49, %v2525_v40  ;;  %v6299_v43 = vpack.c.bf16 %v2841_v26, %v2839_v27  ;;  %v4538_v13 = vld [vmem:[%s7043_s2 + $0x58] sm:$0xff]  ;;  %3556 = vmatpush.bf16.msra.mxu3 %v4540_v12  ;;  %v7281_v40 = vld [vmem:[#allocation33_spill] sm:$0xff]  ;;  %v7282_v27 = vld [vmem:[#allocation32_spill] sm:$0xff] }
 0x32d   : > { %3414 = vmatpush.bf16.msra.mxu2 %v4538_v13  ;;  %v1678_v49 = vadd.f32 %v7282_v27, %v7281_v40 }
 0x32e   : > { %7279 = vst [vmem:[#allocation21_spill] sm:$0xff] %v6299_v43  ;;  %v2115_v7 = vmax.f32 %v2083_v20, 0.0  ;;  %v2048_v15 = vpop.f32.mrf.mxu0  ;;  %v1769_v32 = vpop.f32.mrf.mxu2  ;;  %4343 = vmatmul.msk.bf16.gmra.mxu3 %vm253_vm5, %v6108_v53 }
 0x32f   : > { %v1807_v23 = vadd.f32 %v1769_v32, %v7280_v21  ;;  %v6304_v0 = vpop.f32.mrf.mxu1  ;;  %v2195_v36 = vld [vmem:[#allocation3 + $0x150] sm:$0xff] }
 0x330   : > { %2148 = vst.msk [vmem:[#allocation3 + $0x159] sm:$0xff] %vm253_vm5, %v2115_v7  ;;  %v2528_v17 = vrot.slane %v2195_v36, 1  ;;  %v2842_v13 = vrot.slane %v2195_v36, 2 }
 0x331   : > { %v1909_v48 = vpop.f32.mrf.mxu3 }
 0x332   : > { %v1947_v1 = vadd.f32 %v1909_v48, %v1807_v23  ;;  %v4542_v48 = vld [vmem:[%s7043_s2 + $0x78] sm:$0xff] }
 0x333   : > { %3708 = vmatpush.bf16.msra.mxu0 %v4542_v48 }
 0x334   : > { %v2084_v14 = vadd.f32 %v2046_v62, %v1947_v1 }
 0x336   : > { %v2116_v26 = vmax.f32 %v2084_v14, 0.0  ;;  %v2051_v20 = vpop.f32.mrf.mxu0  ;;  %v1771_v7 = vpop.f32.mrf.mxu2 }
 0x337   : > { %v1808_v32 = vadd.f32 %v1771_v7, %v1678_v49  ;;  %v6315_v21 = vpop.f32.mrf.mxu1  ;;  %v2196_v53 = vld [vmem:[#allocation3 + $0x158] sm:$0xff]  ;;  %v2197_v63 = vld [vmem:[#allocation3 + $0x160] sm:$0x3] }
 0x338   : > { %2149 = vst.msk [vmem:[#allocation3 + $0x169] sm:$0xff] %vm253_vm5, %v2116_v26  ;;  %v6318_v34 = vpack.c.bf16 %v2196_v53, %v2195_v36  ;;  %v2529_v23 = vrot.slane %v2196_v53, 1  ;;  %v2843_v62 = vrot.slane %v2196_v53, 2  ;;  %v2531_v1 = vrot.slane %v2197_v63, 1 }
 0x339   : > { %4372 = vmatmul.msk.bf16.gmra.mxu0 %vm253_vm5, %v6150_v4  ;;  %v1911_v12 = vpop.f32.mrf.mxu3  ;;  %v2845_v14 = vrot.slane %v2197_v63, 2 }
 0x33a   : > { %7283 = vst [vmem:[#allocation11_spill] sm:$0xff] %v6318_v34  ;;  %v1948_v40 = vadd.f32 %v1911_v12, %v1808_v32  ;;  %4295 = vmatmul.msk.bf16.gmra.mxu1 %vm253_vm5, %v6318_v34  ;;  %v2530_v27 = vsel %vm668_vm3, %v2528_v17, %v2529_v23  ;;  %v2844_v49 = vsel %vm971_vm4, %v2842_v13, %v2843_v62  ;;  %v4544_v17 = vld [vmem:[%s7043_s2 + $0x88] sm:$0xff]  ;;  %v7285_v13 = vld [vmem:[#allocation30_spill] sm:$0xff] }
 0x33b   : > { %4316 = vmatmul.msk.bf16.gmra.mxu2 %vm253_vm5, %v6132_v28  ;;  %v2532_v53 = vsel %vm668_vm3, %v2529_v23, %v2531_v1  ;;  %v2846_v36 = vsel %vm971_vm4, %v2843_v62, %v2845_v14  ;;  %3857 = vmatpush.bf16.msra.mxu1 %v4544_v17 }
 0x33c   : > { %v2085_v26 = vadd.f32 %v2048_v15, %v1948_v40  ;;  %v6333_v7 = vpack.c.bf16 %v2532_v53, %v2530_v27  ;;  %v6335_v63 = vpack.c.bf16 %v2846_v36, %v2844_v49  ;;  %v7286_v40 = vld [vmem:[#allocation36_spill] sm:$0xff] }
 0x33d   : > { %v1680_v27 = vadd.f32 %v6137_v30, %v7286_v40  ;;  %v6356_v30 = vld [vmem:[%s7044_s3 + $0x1] ss:$0 sm:$0xff] }
 0x33e   : > { %7284 = vst [vmem:[#allocation17_spill] sm:$0xff] %v6335_v63  ;;  %v2117_v32 = vmax.f32 %v2085_v26, 0.0  ;;  %v2053_v12 = vpop.f32.mrf.mxu0  ;;  %v1774_v4 = vpop.f32.mrf.mxu2  ;;  %4344 = vmatmul.msk.bf16.gmra.mxu3 %vm253_vm5, %v6135_v10 }
 0x33f   : > { %v1809_v48 = vadd.f32 %v1774_v4, %v7285_v13  ;;  %v6343_v23 = vpop.f32.mrf.mxu1  ;;  %v2198_v14 = vld [vmem:[#allocation3 + $0x168] sm:$0xff] }
 0x340   : > { %2150 = vst.msk [vmem:[#allocation3 + $0x171] sm:$0xff] %vm253_vm5, %v2117_v32  ;;  %v2533_v4 = vrot.slane %v2198_v14, 1 }
 0x341   : > { %v1914_v15 = vpop.f32.mrf.mxu3 }
 0x342   : > { %v1949_v62 = vadd.f32 %v1914_v15, %v1809_v48  ;;  %v2847_v48 = vrot.slane %v2198_v14, 2 }
 0x344   : > { %v2086_v1 = vadd.f32 %v2051_v20, %v1949_v62 }
 0x346   : > { %v2118_v49 = vmax.f32 %v2086_v1, 0.0  ;;  %v3116_v53 = vpop.f32.mrf.mxu0  ;;  %v1776_v36 = vpop.f32.mrf.mxu2 }
 0x347   : > { %v1810_v26 = vadd.f32 %v1776_v36, %v1680_v27  ;;  %v6348_v10 = vpop.f32.mrf.mxu1  ;;  %v2199_v54 = vld [vmem:[#allocation3 + $0x170] sm:$0xff]  ;;  %v2200_v13 = vld [vmem:[#allocation3 + $0x178] sm:$0x3] }
 0x348   : > { %2151 = vst.msk [vmem:[#allocation3 + $0x181] sm:$0xff] %vm253_vm5, %v2118_v49  ;;  %v6351_v32 = vpack.c.bf16 %v2199_v54, %v2198_v14  ;;  %v2534_v17 = vrot.slane %v2199_v54, 1  ;;  %v2848_v20 = vrot.slane %v2199_v54, 2  ;;  %v2536_v62 = vrot.slane %v2200_v13, 1 }
 0x349   : > { %4373 = vmatmul.msk.bf16.gmra.mxu0 %vm253_vm5, %v6177_v37  ;;  %v1916_v15 = vpop.f32.mrf.mxu3  ;;  %v2850_v1 = vrot.slane %v2200_v13, 2 }
 0x34a   : > { %7287 = vst [vmem:[#allocation18_spill] sm:$0xff] %v6351_v32  ;;  %v1950_v40 = vadd.f32 %v1916_v15, %v1810_v26  ;;  %4296 = vmatmul.msk.bf16.gmra.mxu1 %vm253_vm5, %v6351_v32  ;;  %v2535_v27 = vsel %vm668_vm3, %v2533_v4, %v2534_v17  ;;  %v2849_v14 = vsel %vm971_vm4, %v2847_v48, %v2848_v20 }
 0x34b   : > { %4317 = vmatmul.msk.bf16.gmra.mxu2 %vm253_vm5, %v6161_v42  ;;  %v2537_v54 = vsel %vm668_vm3, %v2534_v17, %v2536_v62  ;;  %v2851_v49 = vsel %vm971_vm4, %v2848_v20, %v2850_v1  ;;  %v2378_v26 = vadd.f32 %v6356_v30, %v6147_v25  ;;  %v2379_v62 = vadd.f32 %v6356_v30, %v6168_v57 }
 0x34c   : > { %v2087_v36 = vadd.f32 %v2053_v12, %v1950_v40  ;;  %v6368_v37 = vpack.c.bf16 %v2537_v54, %v2535_v27  ;;  %v6370_v50 = vpack.c.bf16 %v2851_v49, %v2849_v14 }
 0x34e   : > { %7288 = vst [vmem:[#allocation19_spill] sm:$0xff] %v6370_v50  ;;  %v2119_v13 = vmax.f32 %v2087_v36, 0.0  ;;  %v3118_v15 = vpop.f32.mrf.mxu0  ;;  %v2660_v4 = vpop.f32.mrf.mxu2  ;;  %4345 = vmatmul.msk.bf16.gmra.mxu3 %vm253_vm5, %v6164_v35 }
 0x34f   : > { %v2740_v48 = vadd.f32 %v2660_v4, %v2378_v26  ;;  %v6376_v22 = vpop.f32.mrf.mxu1  ;;  %v6383_v1 = vld [vmem:[#allocation3 + $0x180] sm:$0xff] }
 0x350   : > { %2152 = vst.msk [vmem:[#allocation3 + $0x189] sm:$0xff] %vm253_vm5, %v2119_v13  ;;  %v3231_v36 = vrot.slane %v6383_v1, 1 }
 0x351   : > { %v2974_v17 = vpop.f32.mrf.mxu3 }
 0x352   : > { %v3054_v12 = vadd.f32 %v2974_v17, %v2740_v48 }
 0x354   : > { %v6379_v20 = vadd.f32 %v3116_v53, %v3054_v12  ;;  %v3380_v53 = vrot.slane %v6383_v1, 2 }
 0x356   : > { %7289 = vst [vmem:[#allocation31_spill] sm:$0xff] %v6379_v20  ;;  %v3121_v25 = vpop.f32.mrf.mxu0  ;;  %v2662_v40 = vpop.f32.mrf.mxu2 }
 0x357   : > { %v2741_v27 = vadd.f32 %v2662_v40, %v2379_v62  ;;  %v6385_v14 = vpop.f32.mrf.mxu1  ;;  %v6387_v54 = vld [vmem:[#allocation3 + $0x188] sm:$0xff]  ;;  %v2203_v49 = vld [vmem:[#allocation3 + $0x190] sm:$0x3] }
 0x358   : > { %v3232_v26 = vrot.slane %v6387_v54, 1  ;;  %v3381_v13 = vrot.slane %v6387_v54, 2  ;;  %v3234_v4 = vrot.slane %v2203_v49, 1  ;;  %v3383_v48 = vrot.slane %v2203_v49, 2 }
 0x359   : > { %4374 = vmatmul.msk.bf16.gmra.mxu0 %vm253_vm5, %v6204_v18  ;;  %v2976_v57 = vpop.f32.mrf.mxu3 }
 0x35a   : > { %v3055_v17 = vadd.f32 %v2976_v57, %v2741_v27  ;;  %4393 = vmatmul.msk.bf16.vlgmr.msrb.gmra.mxu1 %vm253_vm5, %v5956_v33  ;;  %v3233_v12 = vsel %vm668_vm3, %v3231_v36, %v3232_v26  ;;  %v3382_v62 = vsel %vm971_vm4, %v3380_v53, %v3381_v13  ;;  %v3235_v40 = vsel %vm668_vm3, %v3232_v26, %v3234_v4 }
 0x35b   : > { %4318 = vmatmul.msk.bf16.gmra.mxu2 %vm253_vm5, %v6189_v47  ;;  %v3384_v35 = vsel %vm971_vm4, %v3381_v13, %v3383_v48  ;;  %v6405_v18 = vpack.c.bf16 %v3235_v40, %v3233_v12  ;;  %v2380_v33 = vadd.f32 %v6356_v30, %v6174_v8 }
 0x35c   : > { %v6403_v20 = vadd.f32 %v3118_v15, %v3055_v17  ;;  %v6407_v49 = vpack.c.bf16 %v3384_v35, %v3382_v62  ;;  %v2381_v15 = vadd.f32 %v6356_v30, %v6196_v44  ;;  %v2382_v44 = vadd.f32 %v6356_v30, %v6201_v3 }
 0x35e   : > { %7290 = vst [vmem:[#allocation22_spill] sm:$0xff] %v6407_v49  ;;  %v3123_v27 = vpop.f32.mrf.mxu0  ;;  %v2665_v36 = vpop.f32.mrf.mxu2  ;;  %4346 = vmatmul.msk.bf16.gmra.mxu3 %vm253_vm5, %v6191_v16 }
 0x35f   : > { %v2742_v53 = vadd.f32 %v2665_v36, %v2380_v33  ;;  %v6413_v57 = vpop.f32.mrf.mxu1 }
 0x361   : > { %v2979_v26 = vpop.f32.mrf.mxu3 }
 0x362   : > { %v3056_v4 = vadd.f32 %v2979_v26, %v2742_v53 }
 0x364   : > { %v6415_v13 = vadd.f32 %v3121_v25, %v3056_v4 }
 0x366   : > { %v3126_v35 = vpop.f32.mrf.mxu0  ;;  %v2667_v48 = vpop.f32.mrf.mxu2 }
 0x367   : > { %v2743_v17 = vadd.f32 %v2667_v48, %v2381_v15  ;;  %v6419_v12 = vpop.f32.mrf.mxu1  ;;  %v2383_v48 = vadd.f32 %v6356_v30, %v6223_v46  ;;  %v2384_v46 = vadd.f32 %v6356_v30, %v6228_v60 }
 0x369   : > { %4375 = vmatmul.msk.bf16.gmra.mxu0 %vm253_vm5, %v6231_v56  ;;  %v2981_v8 = vpop.f32.mrf.mxu3 }
 0x36a   : > { %v3057_v62 = vadd.f32 %v2981_v8, %v2743_v17  ;;  %4394 = vmatmul.msk.bf16.gmra.mxu1 %vm253_vm5, %v5978_v29 }
 0x36b   : > { %4319 = vmatmul.msk.bf16.gmra.mxu2 %vm253_vm5, %v6216_v51 }
 0x36c   : > { %v6427_v25 = vadd.f32 %v3123_v27, %v3057_v62 }
 0x36e   : > { %v3128_v40 = vpop.f32.mrf.mxu0  ;;  %v2670_v33 = vpop.f32.mrf.mxu2  ;;  %4347 = vmatmul.msk.bf16.gmra.mxu3 %vm253_vm5, %v6218_v39 }
 0x36f   : > { %v2744_v36 = vadd.f32 %v2670_v33, %v2382_v44  ;;  %v6433_v53 = vpop.f32.mrf.mxu1 }
 0x371   : > { %v2984_v26 = vpop.f32.mrf.mxu3 }
 0x372   : > { %v3058_v4 = vadd.f32 %v2984_v26, %v2744_v36 }
 0x374   : > { %v6435_v15 = vadd.f32 %v3126_v35, %v3058_v4 }
 0x376   : > { %v3131_v27 = vpop.f32.mrf.mxu0  ;;  %v2672_v17 = vpop.f32.mrf.mxu2 }
 0x377   : > { %v2745_v8 = vadd.f32 %v2672_v17, %v2383_v48  ;;  %v6439_v62 = vpop.f32.mrf.mxu1 }
 0x379   : > { %4376 = vmatmul.msk.bf16.gmra.mxu0 %vm253_vm5, %v6258_v2  ;;  %v2986_v3 = vpop.f32.mrf.mxu3 }
 0x37a   : > { %v3059_v49 = vadd.f32 %v2986_v3, %v2745_v8  ;;  %4395 = vmatmul.msk.bf16.gmra.mxu1 %vm253_vm5, %v6000_v9  ;;  %v2385_v8 = vadd.f32 %v6356_v30, %v6250_v31  ;;  %v2386_v31 = vadd.f32 %v6356_v30, %v6255_v19 }
 0x37b   : > { %4320 = vmatmul.msk.bf16.gmra.mxu2 %vm253_vm5, %v6243_v6 }
 0x37c   : > { %v6447_v35 = vadd.f32 %v3128_v40, %v3059_v49 }
 0x37e   : > { %v3133_v44 = vpop.f32.mrf.mxu0  ;;  %v2675_v33 = vpop.f32.mrf.mxu2  ;;  %4348 = vmatmul.msk.bf16.gmra.mxu3 %vm253_vm5, %v6245_v5 }
 0x37f   : > { %v2746_v36 = vadd.f32 %v2675_v33, %v2384_v46  ;;  %v6453_v26 = vpop.f32.mrf.mxu1 }
 0x381   : > { %v2989_v4 = vpop.f32.mrf.mxu3 }
 0x382   : > { %v3060_v48 = vadd.f32 %v2989_v4, %v2746_v36 }
 0x384   : > { %v6455_v17 = vadd.f32 %v3131_v27, %v3060_v48 }
 0x386   : > { %v3136_v49 = vpop.f32.mrf.mxu0  ;;  %v2677_v40 = vpop.f32.mrf.mxu2 }
 0x387   : > { %v2747_v3 = vadd.f32 %v2677_v40, %v2385_v8  ;;  %v6459_v2 = vpop.f32.mrf.mxu1 }
 0x389   : > { %4377 = vmatmul.msk.bf16.gmra.mxu0 %vm253_vm5, %v6285_v52  ;;  %v2991_v60 = vpop.f32.mrf.mxu3 }
 0x38a   : > { %v3061_v5 = vadd.f32 %v2991_v60, %v2747_v3  ;;  %4396 = vmatmul.msk.bf16.gmra.mxu1 %vm253_vm5, %v6023_v58  ;;  %v2387_v3 = vadd.f32 %v6356_v30, %v6277_v11  ;;  %v2388_v11 = vadd.f32 %v6356_v30, %v6282_v24 }
 0x38b   : > { %4321 = vmatmul.msk.bf16.gmra.mxu2 %vm253_vm5, %v6270_v45 }
 0x38c   : > { %v6467_v27 = vadd.f32 %v3133_v44, %v3061_v5 }
 0x38e   : > { %v3138_v46 = vpop.f32.mrf.mxu0  ;;  %v2680_v33 = vpop.f32.mrf.mxu2  ;;  %4349 = vmatmul.msk.bf16.gmra.mxu3 %vm253_vm5, %v6272_v55 }
 0x38f   : > { %v2748_v36 = vadd.f32 %v2680_v33, %v2386_v31  ;;  %v6473_v4 = vpop.f32.mrf.mxu1 }
 0x391   : > { %v2994_v48 = vpop.f32.mrf.mxu3 }
 0x392   : > { %v3062_v8 = vadd.f32 %v2994_v48, %v2748_v36 }
 0x394   : > { %v6475_v40 = vadd.f32 %v3136_v49, %v3062_v8 }
 0x396   : > { %v3141_v5 = vpop.f32.mrf.mxu0  ;;  %v2682_v44 = vpop.f32.mrf.mxu2 }
 0x397   : > { %v2749_v60 = vadd.f32 %v2682_v44, %v2387_v3  ;;  %v6479_v52 = vpop.f32.mrf.mxu1  ;;  %v4541_v44 = vld [vmem:[%s7043_s2 + $0x70] sm:$0xff] }
 0x398   : > { %3709 = vmatpush.bf16.msra.mxu0 %v4541_v44 }
 0x399   : > { %4378 = vmatmul.msk.bf16.gmra.mxu0 %vm253_vm5, %v6318_v34  ;;  %v2996_v19 = vpop.f32.mrf.mxu3 }
 0x39a   : > { %v3063_v55 = vadd.f32 %v2996_v19, %v2749_v60  ;;  %4397 = vmatmul.msk.bf16.gmra.mxu1 %vm253_vm5, %v6057_v41 }
 0x39b   : > { %4322 = vmatmul.msk.bf16.gmra.mxu2 %vm253_vm5, %v6297_v38 }
 0x39c   : > { %v6487_v49 = vadd.f32 %v3138_v46, %v3063_v55  ;;  %v2389_v55 = vadd.f32 %v6356_v30, %v6304_v0 }
 0x39e   : > { %v3143_v31 = vpop.f32.mrf.mxu0  ;;  %v2685_v33 = vpop.f32.mrf.mxu2  ;;  %4350 = vmatmul.msk.bf16.gmra.mxu3 %vm253_vm5, %v6299_v43 }
 0x39f   : > { %v2750_v36 = vadd.f32 %v2685_v33, %v2388_v11  ;;  %v6493_v48 = vpop.f32.mrf.mxu1  ;;  %v4537_v33 = vld [vmem:[%s7043_s2 + $0x50] sm:$0xff] }
 0x3a0   : > { %3415 = vmatpush.bf16.msra.mxu2 %v4537_v33 }
 0x3a1   : > { %v2999_v8 = vpop.f32.mrf.mxu3 }
 0x3a2   : > { %v3064_v3 = vadd.f32 %v2999_v8, %v2750_v36  ;;  %v4539_v8 = vld [vmem:[%s7043_s2 + $0x60] sm:$0xff] }
 0x3a3   : > { %3557 = vmatpush.bf16.msra.mxu3 %v4539_v8 }
 0x3a4   : > { %v6498_v60 = vadd.f32 %v3141_v5, %v3064_v3  ;;  %v2390_v5 = vadd.f32 %v6356_v30, %v6315_v21  ;;  %v2391_v21 = vadd.f32 %v6356_v30, %v6343_v23 }
 0x3a6   : > { %v3146_v24 = vpop.f32.mrf.mxu0  ;;  %v2687_v46 = vpop.f32.mrf.mxu2 }
 0x3a7   : > { %v2751_v19 = vadd.f32 %v2687_v46, %v2389_v55  ;;  %v6502_v34 = vpop.f32.mrf.mxu1 }
 0x3a9   : > { %4379 = vmatmul.msk.bf16.gmra.mxu0 %vm253_vm5, %v6351_v32  ;;  %v3001_v11 = vpop.f32.mrf.mxu3  ;;  %v6530_v32 = vpack.c.bf16 %v6387_v54, %v6383_v1  ;;  %v2392_v1 = vadd.f32 %v6356_v30, %v6348_v10  ;;  %v2393_v10 = vadd.f32 %v6356_v30, %v6376_v22  ;;  %v2394_v22 = vadd.f32 %v6356_v30, %v6385_v14  ;;  %v7293_v14 = vld [vmem:[#allocation31_spill] sm:$0xff] }
 0x3aa   : > { %v3065_v36 = vadd.f32 %v3001_v11, %v2751_v19  ;;  %4398 = vmatmul.msk.bf16.gmra.mxu1 %vm253_vm5, %v6106_v61 }
 0x3ab   : > { %4323 = vmatmul.msk.bf16.gmra.mxu2 %vm253_vm5, %v6333_v7  ;;  %7291 = vst [vmem:[#allocation23_spill] sm:$0xff] %v6530_v32 }
 0x3ac   : > { %v6513_v0 = vadd.f32 %v3143_v31, %v3065_v36 }
 0x3ae   : > { %v3148_v3 = vpop.f32.mrf.mxu0  ;;  %v2690_v44 = vpop.f32.mrf.mxu2  ;;  %4351 = vmatmul.msk.bf16.gmra.mxu3 %vm253_vm5, %v6335_v63 }
 0x3af   : > { %v2752_v55 = vadd.f32 %v2690_v44, %v2390_v5  ;;  %v6522_v46 = vpop.f32.mrf.mxu1 }
 0x3b1   : > { %v3004_v19 = vpop.f32.mrf.mxu3 }
 0x3b2   : > { %v3066_v11 = vadd.f32 %v3004_v19, %v2752_v55 }
 0x3b4   : > { %v6524_v31 = vadd.f32 %v3146_v24, %v3066_v11 }
 0x3b6   : > { %v3151_v33 = vpop.f32.mrf.mxu0  ;;  %v2692_v36 = vpop.f32.mrf.mxu2 }
 0x3b7   : > { %v2753_v43 = vadd.f32 %v2692_v36, %v2391_v21  ;;  %v6532_v56 = vpop.f32.mrf.mxu1 }
 0x3b9   : > { %4380 = vmatmul.msk.bf16.gmra.mxu0 %vm253_vm5, %v6530_v32  ;;  %v3006_v5 = vpop.f32.mrf.mxu3 }
 0x3ba   : > { %v3067_v8 = vadd.f32 %v3006_v5, %v2753_v43  ;;  %4399 = vmatmul.msk.bf16.gmra.mxu1 %vm253_vm5, %v6132_v28  ;;  %v4543_v43 = vld [vmem:[%s7043_s2 + $0x80] sm:$0xff] }
 0x3bb   : > { %4324 = vmatmul.msk.bf16.gmra.mxu2 %vm253_vm5, %v6368_v37  ;;  %3858 = vmatpush.bf16.msra.mxu1 %v4543_v43 }
 0x3bc   : > { %v6540_v23 = vadd.f32 %v3148_v3, %v3067_v8 }
 0x3be   : > { %v3153_v54 = vpop.f32.mrf.mxu0  ;;  %v2695_v24 = vpop.f32.mrf.mxu2  ;;  %4352 = vmatmul.msk.bf16.gmra.mxu3 %vm253_vm5, %v6370_v50 }
 0x3bf   : > { %v2754_v44 = vadd.f32 %v2695_v24, %v2392_v1  ;;  %v6549_v55 = vpop.f32.mrf.mxu1 }
 0x3c1   : > { %v3009_v19 = vpop.f32.mrf.mxu3 }
 0x3c2   : > { %v3068_v11 = vadd.f32 %v3009_v19, %v2754_v44  ;;  %v7292_v44 = vld [vmem:[#allocation37_spill] sm:$0xff] }
 0x3c4   : > { %v6551_v3 = vadd.f32 %v3151_v33, %v3068_v11 }
 0x3c6   : > { %v3156_v21 = vpop.f32.mrf.mxu0  ;;  %v2697_v36 = vpop.f32.mrf.mxu2 }
 0x3c7   : > { %v2755_v5 = vadd.f32 %v2697_v36, %v2393_v10  ;;  %v6555_v8 = vpop.f32.mrf.mxu1 }
 0x3c9   : > { %4477 = vmatmul.msk.bf16.vlgmr.msra.gmra.mxu0 %vm253_vm5, %v5978_v29  ;;  %v3011_v32 = vpop.f32.mrf.mxu3 }
 0x3ca   : > { %v3069_v1 = vadd.f32 %v3011_v32, %v2755_v5  ;;  %4400 = vmatmul.msk.bf16.gmra.mxu1 %vm253_vm5, %v6161_v42 }
 0x3cb   : > { %4421 = vmatmul.msk.bf16.vlgmr.msra.gmra.mxu2 %vm253_vm5, %v5959_v59  ;;  %v2395_v59 = vadd.f32 %v6356_v30, %v6413_v57  ;;  %v2396_v57 = vadd.f32 %v6356_v30, %v6419_v12 }
 0x3cc   : > { %v6563_v33 = vadd.f32 %v3153_v54, %v3069_v1 }
 0x3ce   : > { %v3158_v24 = vpop.f32.mrf.mxu0  ;;  %v2700_v43 = vpop.f32.mrf.mxu2  ;;  %4449 = vmatmul.msk.bf16.vlgmr.msra.gmra.mxu3 %vm253_vm5, %v7292_v44 }
 0x3cf   : > { %v2756_v19 = vadd.f32 %v2700_v43, %v2394_v22  ;;  %v6569_v29 = vpop.f32.mrf.mxu1 }
 0x3d1   : > { %v3014_v32 = vpop.f32.mrf.mxu3 }
 0x3d2   : > { %v3070_v11 = vadd.f32 %v3014_v32, %v2756_v19 }
 0x3d4   : > { %v6571_v10 = vadd.f32 %v3156_v21, %v3070_v11  ;;  %v7294_v21 = vld [vmem:[#allocation38_spill] sm:$0xff]  ;;  %v7296_v11 = vld [vmem:[#allocation39_spill] sm:$0xff] }
 0x3d6   : > { %v3161_v54 = vpop.f32.mrf.mxu0  ;;  %v2702_v36 = vpop.f32.mrf.mxu2 }
 0x3d7   : > { %v2757_v5 = vadd.f32 %v2702_v36, %v2395_v59  ;;  %v3268_v1 = vpop.f32.mrf.mxu1 }
 0x3d8   : > { %v6576_v50 = vadd.f32 %v3268_v1, %v7293_v14 }
 0x3d9   : > { %4478 = vmatmul.msk.bf16.gmra.mxu0 %vm253_vm5, %v6000_v9  ;;  %v3016_v22 = vpop.f32.mrf.mxu3 }
 0x3da   : > { %v3071_v43 = vadd.f32 %v3016_v22, %v2757_v5  ;;  %4401 = vmatmul.msk.bf16.gmra.mxu1 %vm253_vm5, %v6189_v47 }
 0x3db   : > { %4422 = vmatmul.msk.bf16.gmra.mxu2 %vm253_vm5, %v7294_v21 }
 0x3dc   : > { %v6584_v44 = vadd.f32 %v3158_v24, %v3071_v43  ;;  %v2397_v24 = vadd.f32 %v6356_v30, %v6433_v53  ;;  %v2398_v53 = vadd.f32 %v6356_v30, %v6439_v62 }
 0x3de   : > { %7295 = vst [vmem:[#allocation15_spill] sm:$0xff] %v6584_v44  ;;  %v3163_v19 = vpop.f32.mrf.mxu0  ;;  %v2705_v32 = vpop.f32.mrf.mxu2  ;;  %4450 = vmatmul.msk.bf16.gmra.mxu3 %vm253_vm5, %v7296_v11 }
 0x3df   : > { %v2758_v59 = vadd.f32 %v2705_v32, %v2396_v57  ;;  %v3270_v9 = vpop.f32.mrf.mxu1 }
 0x3e0   : > { %v6591_v36 = vadd.f32 %v3270_v9, %v6403_v20 }
 0x3e1   : > { %v3019_v5 = vpop.f32.mrf.mxu3 }
 0x3e2   : > { %v3072_v1 = vadd.f32 %v3019_v5, %v2758_v59 }
 0x3e4   : > { %v6593_v14 = vadd.f32 %v3161_v54, %v3072_v1  ;;  %v7297_v54 = vld [vmem:[#allocation40_spill] sm:$0xff] }
 0x3e6   : > { %v3166_v22 = vpop.f32.mrf.mxu0  ;;  %v2707_v43 = vpop.f32.mrf.mxu2 }
 0x3e7   : > { %v2759_v12 = vadd.f32 %v2707_v43, %v2397_v24  ;;  %v3273_v63 = vpop.f32.mrf.mxu1 }
 0x3e8   : > { %v6598_v44 = vadd.f32 %v3273_v63, %v6415_v13  ;;  %v7298_v63 = vld [vmem:[#allocation41_spill] sm:$0xff] }
 0x3e9   : > { %4479 = vmatmul.msk.bf16.gmra.mxu0 %vm253_vm5, %v6023_v58  ;;  %v3021_v57 = vpop.f32.mrf.mxu3 }
 0x3ea   : > { %v3073_v20 = vadd.f32 %v3021_v57, %v2759_v12  ;;  %4402 = vmatmul.msk.bf16.gmra.mxu1 %vm253_vm5, %v6216_v51 }
 0x3eb   : > { %4423 = vmatmul.msk.bf16.gmra.mxu2 %vm253_vm5, %v7297_v54 }
 0x3ec   : > { %v6606_v32 = vadd.f32 %v3163_v19, %v3073_v20  ;;  %v2399_v19 = vadd.f32 %v6356_v30, %v6453_v26  ;;  %v2400_v26 = vadd.f32 %v6356_v30, %v6459_v2 }
 0x3ee   : > { %v3168_v11 = vpop.f32.mrf.mxu0  ;;  %v2710_v59 = vpop.f32.mrf.mxu2  ;;  %4451 = vmatmul.msk.bf16.gmra.mxu3 %vm253_vm5, %v7298_v63 }
 0x3ef   : > { %v2760_v13 = vadd.f32 %v2710_v59, %v2398_v53  ;;  %v3275_v58 = vpop.f32.mrf.mxu1 }
 0x3f0   : > { %v6613_v9 = vadd.f32 %v3275_v58, %v6427_v25 }
 0x3f1   : > { %v3024_v5 = vpop.f32.mrf.mxu3 }
 0x3f2   : > { %v3074_v1 = vadd.f32 %v3024_v5, %v2760_v13 }
 0x3f4   : > { %v6615_v24 = vadd.f32 %v3166_v22, %v3074_v1  ;;  %v7299_v22 = vld [vmem:[#allocation42_spill] sm:$0xff] }
 0x3f6   : > { %v3171_v43 = vpop.f32.mrf.mxu0  ;;  %v2712_v12 = vpop.f32.mrf.mxu2 }
 0x3f7   : > { %v2761_v62 = vadd.f32 %v2712_v12, %v2399_v19  ;;  %v3278_v57 = vpop.f32.mrf.mxu1 }
 0x3f8   : > { %v6620_v20 = vadd.f32 %v3278_v57, %v6435_v15  ;;  %v7300_v15 = vld [vmem:[#allocation43_spill] sm:$0xff] }
 0x3f9   : > { %4480 = vmatmul.msk.bf16.gmra.mxu0 %vm253_vm5, %v6057_v41  ;;  %v3026_v53 = vpop.f32.mrf.mxu3 }
 0x3fa   : > { %v3075_v25 = vadd.f32 %v3026_v53, %v2761_v62  ;;  %4403 = vmatmul.msk.bf16.gmra.mxu1 %vm253_vm5, %v6243_v6 }
 0x3fb   : > { %4424 = vmatmul.msk.bf16.gmra.mxu2 %vm253_vm5, %v7299_v22 }
 0x3fc   : > { %v6628_v59 = vadd.f32 %v3168_v11, %v3075_v25  ;;  %v2401_v11 = vadd.f32 %v6356_v30, %v6473_v4  ;;  %v2402_v4 = vadd.f32 %v6356_v30, %v6479_v52 }
 0x3fe   : > { %v3173_v63 = vpop.f32.mrf.mxu0  ;;  %v2715_v13 = vpop.f32.mrf.mxu2  ;;  %4452 = vmatmul.msk.bf16.gmra.mxu3 %vm253_vm5, %v7300_v15 }
 0x3ff   : > { %v2762_v58 = vadd.f32 %v2715_v13, %v2400_v26  ;;  %v3280_v41 = vpop.f32.mrf.mxu1 }
 0x400   : > { %v6635_v5 = vadd.f32 %v3280_v41, %v6447_v35 }
 0x401   : > { %v3029_v1 = vpop.f32.mrf.mxu3 }
 0x402   : > { %v3076_v19 = vadd.f32 %v3029_v1, %v2762_v58 }
 0x404   : > { %v6637_v12 = vadd.f32 %v3171_v43, %v3076_v19  ;;  %v7301_v43 = vld [vmem:[#allocation44_spill] sm:$0xff] }
 0x406   : > { %v3176_v62 = vpop.f32.mrf.mxu0  ;;  %v2717_v57 = vpop.f32.mrf.mxu2 }
 0x407   : > { %v2763_v2 = vadd.f32 %v2717_v57, %v2401_v11  ;;  %v3283_v53 = vpop.f32.mrf.mxu1 }
 0x408   : > { %v6642_v25 = vadd.f32 %v3283_v53, %v6455_v17  ;;  %v7302_v17 = vld [vmem:[#allocation45_spill] sm:$0xff] }
 0x409   : > { %4481 = vmatmul.msk.bf16.gmra.mxu0 %vm253_vm5, %v6106_v61  ;;  %v3031_v26 = vpop.f32.mrf.mxu3 }
 0x40a   : > { %v3077_v35 = vadd.f32 %v3031_v26, %v2763_v2  ;;  %4404 = vmatmul.msk.bf16.gmra.mxu1 %vm253_vm5, %v6270_v45 }
 0x40b   : > { %4425 = vmatmul.msk.bf16.gmra.mxu2 %vm253_vm5, %v7301_v43 }
 0x40c   : > { %v6650_v13 = vadd.f32 %v3173_v63, %v3077_v35  ;;  %v2403_v63 = vadd.f32 %v6356_v30, %v6493_v48  ;;  %v2404_v48 = vadd.f32 %v6356_v30, %v6502_v34 }
 0x40e   : > { %v3178_v15 = vpop.f32.mrf.mxu0  ;;  %v2720_v58 = vpop.f32.mrf.mxu2  ;;  %4453 = vmatmul.msk.bf16.gmra.mxu3 %vm253_vm5, %v7302_v17 }
 0x40f   : > { %v2764_v41 = vadd.f32 %v2720_v58, %v2402_v4  ;;  %v3285_v61 = vpop.f32.mrf.mxu1 }
 0x410   : > { %v6657_v1 = vadd.f32 %v3285_v61, %v6467_v27 }
 0x411   : > { %v3034_v19 = vpop.f32.mrf.mxu3 }
 0x412   : > { %v3078_v11 = vadd.f32 %v3034_v19, %v2764_v41 }
 0x414   : > { %v6659_v57 = vadd.f32 %v3176_v62, %v3078_v11  ;;  %v7303_v62 = vld [vmem:[#allocation7_spill] sm:$0xff] }
 0x416   : > { %v3181_v2 = vpop.f32.mrf.mxu0  ;;  %v2722_v53 = vpop.f32.mrf.mxu2 }
 0x417   : > { %v2765_v52 = vadd.f32 %v2722_v53, %v2403_v63  ;;  %v3288_v26 = vpop.f32.mrf.mxu1 }
 0x418   : > { %v6664_v35 = vadd.f32 %v3288_v26, %v6475_v40  ;;  %v7304_v40 = vld [vmem:[#allocation8_spill] sm:$0xff] }
 0x419   : > { %4482 = vmatmul.msk.bf16.gmra.mxu0 %vm253_vm5, %v6132_v28  ;;  %v3036_v4 = vpop.f32.mrf.mxu3 }
 0x41a   : > { %v3079_v27 = vadd.f32 %v3036_v4, %v2765_v52  ;;  %4405 = vmatmul.msk.bf16.gmra.mxu1 %vm253_vm5, %v6297_v38 }
 0x41b   : > { %4426 = vmatmul.msk.bf16.gmra.mxu2 %vm253_vm5, %v7303_v62 }
 0x41c   : > { %v6672_v58 = vadd.f32 %v3178_v15, %v3079_v27  ;;  %v2405_v15 = vadd.f32 %v6356_v30, %v6522_v46  ;;  %v2406_v46 = vadd.f32 %v6356_v30, %v6532_v56 }
 0x41e   : > { %v3183_v17 = vpop.f32.mrf.mxu0  ;;  %v2725_v41 = vpop.f32.mrf.mxu2  ;;  %4454 = vmatmul.msk.bf16.gmra.mxu3 %vm253_vm5, %v7304_v40 }
 0x41f   : > { %v2766_v61 = vadd.f32 %v2725_v41, %v2404_v48  ;;  %v3290_v28 = vpop.f32.mrf.mxu1 }
 0x420   : > { %v6679_v19 = vadd.f32 %v3290_v28, %v6487_v49 }
 0x421   : > { %v3039_v11 = vpop.f32.mrf.mxu3 }
 0x422   : > { %v3080_v63 = vadd.f32 %v3039_v11, %v2766_v61 }
 0x424   : > { %v6681_v53 = vadd.f32 %v3181_v2, %v3080_v63  ;;  %v7305_v2 = vld [vmem:[#allocation46_spill] sm:$0xff] }
 0x426   : > { %v3186_v52 = vpop.f32.mrf.mxu0  ;;  %v2727_v26 = vpop.f32.mrf.mxu2 }
 0x427   : > { %v2767_v34 = vadd.f32 %v2727_v26, %v2405_v15  ;;  %v3293_v4 = vpop.f32.mrf.mxu1 }
 0x428   : > { %v6686_v27 = vadd.f32 %v3293_v4, %v6498_v60  ;;  %v7306_v60 = vld [vmem:[#allocation47_spill] sm:$0xff] }
 0x429   : > { %4483 = vmatmul.msk.bf16.gmra.mxu0 %vm253_vm5, %v6161_v42  ;;  %v3041_v48 = vpop.f32.mrf.mxu3 }
 0x42a   : > { %v3081_v49 = vadd.f32 %v3041_v48, %v2767_v34  ;;  %4406 = vmatmul.msk.bf16.gmra.mxu1 %vm253_vm5, %v6333_v7 }
 0x42b   : > { %4427 = vmatmul.msk.bf16.gmra.mxu2 %vm253_vm5, %v7305_v2 }
 0x42c   : > { %v6694_v41 = vadd.f32 %v3183_v17, %v3081_v49  ;;  %v2407_v17 = vadd.f32 %v6356_v30, %v6549_v55  ;;  %v2408_v55 = vadd.f32 %v6356_v30, %v6555_v8 }
 0x42e   : > { %v3188_v40 = vpop.f32.mrf.mxu0  ;;  %v2730_v61 = vpop.f32.mrf.mxu2  ;;  %4455 = vmatmul.msk.bf16.gmra.mxu3 %vm253_vm5, %v7306_v60 }
 0x42f   : > { %v2768_v28 = vadd.f32 %v2730_v61, %v2406_v46  ;;  %v3295_v42 = vpop.f32.mrf.mxu1 }
 0x430   : > { %v6701_v11 = vadd.f32 %v3295_v42, %v6513_v0 }
 0x431   : > { %v3044_v63 = vpop.f32.mrf.mxu3 }
 0x432   : > { %v3082_v15 = vadd.f32 %v3044_v63, %v2768_v28 }
 0x434   : > { %v6703_v26 = vadd.f32 %v3186_v52, %v3082_v15  ;;  %v7307_v52 = vld [vmem:[#allocation9_spill] sm:$0xff] }
 0x436   : > { %v3191_v34 = vpop.f32.mrf.mxu0  ;;  %v2732_v4 = vpop.f32.mrf.mxu2 }
 0x437   : > { %v2769_v56 = vadd.f32 %v2732_v4, %v2407_v17  ;;  %v3298_v48 = vpop.f32.mrf.mxu1 }
 0x438   : > { %v6708_v49 = vadd.f32 %v3298_v48, %v6524_v31  ;;  %v7308_v31 = vld [vmem:[#allocation10_spill] sm:$0xff] }
 0x439   : > { %4484 = vmatmul.msk.bf16.gmra.mxu0 %vm253_vm5, %v6189_v47  ;;  %v3046_v46 = vpop.f32.mrf.mxu3 }
 0x43a   : > { %v3083_v0 = vadd.f32 %v3046_v46, %v2769_v56  ;;  %4407 = vmatmul.msk.bf16.gmra.mxu1 %vm253_vm5, %v6368_v37 }
 0x43b   : > { %4428 = vmatmul.msk.bf16.gmra.mxu2 %vm253_vm5, %v7307_v52 }
 0x43c   : > { %v6716_v61 = vadd.f32 %v3188_v40, %v3083_v0  ;;  %v2409_v40 = vadd.f32 %v6356_v30, %v6569_v29  ;;  %v7309_v29 = vld [vmem:[#allocation48_spill] sm:$0xff] }
 0x43e   : > { %v3193_v60 = vpop.f32.mrf.mxu0  ;;  %v2735_v28 = vpop.f32.mrf.mxu2  ;;  %4456 = vmatmul.msk.bf16.gmra.mxu3 %vm253_vm5, %v7308_v31 }
 0x43f   : > { %v2770_v42 = vadd.f32 %v2735_v28, %v2408_v55  ;;  %v3300_v47 = vpop.f32.mrf.mxu1 }
 0x440   : > { %v6723_v63 = vadd.f32 %v3300_v47, %v6540_v23 }
 0x441   : > { %v3049_v15 = vpop.f32.mrf.mxu3 }
 0x442   : > { %v3084_v17 = vadd.f32 %v3049_v15, %v2770_v42 }
 0x444   : > { %v6725_v4 = vadd.f32 %v3191_v34, %v3084_v17 }
 0x446   : > { %v3711_v56 = vpop.f32.mrf.mxu0  ;;  %v2737_v48 = vpop.f32.mrf.mxu2 }
 0x447   : > { %v2771_v8 = vadd.f32 %v2737_v48, %v2409_v40  ;;  %v3303_v46 = vpop.f32.mrf.mxu1 }
 0x448   : > { %v6730_v0 = vadd.f32 %v3303_v46, %v6551_v3 }
 0x449   : > { %4485 = vmatmul.msk.bf16.gmra.mxu0 %vm253_vm5, %v6216_v51  ;;  %v3051_v55 = vpop.f32.mrf.mxu3 }
 0x44a   : > { %v3085_v23 = vadd.f32 %v3051_v55, %v2771_v8  ;;  %4408 = vmatmul.msk.bf16.gmra.mxu1 %vm253_vm5, %v6405_v18 }
 0x44b   : > { %4429 = vmatmul.msk.bf16.gmra.mxu2 %vm253_vm5, %v6191_v16 }
 0x44c   : > { %v6738_v34 = vadd.f32 %v3193_v60, %v3085_v23  ;;  %v7311_v23 = vld [vmem:[#allocation15_spill] sm:$0xff] }
 0x44e   : > { %v3417_v30 = vpop.f32.mrf.mxu2  ;;  %4457 = vmatmul.msk.bf16.gmra.mxu3 %vm253_vm5, %v7309_v29  ;;  %v3713_v28 = vpop.f32.mrf.mxu0 }
 0x44f   : > { %v3497_v3 = vadd.f32 %v3417_v30, %v6576_v50  ;;  %v3305_v31 = vpop.f32.mrf.mxu1 }
 0x450   : > { %v6744_v51 = vadd.f32 %v3305_v31, %v6563_v33 }
 0x451   : > { %v3559_v42 = vpop.f32.mrf.mxu3 }
 0x452   : > { %v3639_v47 = vadd.f32 %v3559_v42, %v3497_v3 }
 0x454   : > { %v6746_v15 = vadd.f32 %v3711_v56, %v3639_v47 }
 0x456   : > { %v3419_v17 = vpop.f32.mrf.mxu2  ;;  %v3716_v8 = vpop.f32.mrf.mxu0 }
 0x457   : > { %v3498_v40 = vadd.f32 %v3419_v17, %v6591_v36  ;;  %v3308_v60 = vpop.f32.mrf.mxu1  ;;  %v7310_v36 = vld [vmem:[#allocation49_spill] sm:$0xff] }
 0x458   : > { %v6750_v48 = vadd.f32 %v3308_v60, %v6571_v10 }
 0x459   : > { %4486 = vmatmul.msk.bf16.gmra.mxu0 %vm253_vm5, %v6243_v6  ;;  %v3561_v50 = vpop.f32.mrf.mxu3 }
 0x45a   : > { %v3640_v46 = vadd.f32 %v3561_v50, %v3498_v40  ;;  %4505 = vmatmul.msk.bf16.vlgmr.msra.gmra.mxu1 %vm253_vm5, %v7294_v21  ;;  %v7312_v40 = vld [vmem:[#allocation13_spill] sm:$0xff] }
 0x45b   : > { %4430 = vmatmul.msk.bf16.gmra.mxu2 %vm253_vm5, %v6218_v39 }
 0x45c   : > { %v6758_v33 = vadd.f32 %v3713_v28, %v3640_v46 }
 0x45e   : > { %v3422_v56 = vpop.f32.mrf.mxu2  ;;  %4458 = vmatmul.msk.bf16.gmra.mxu3 %vm253_vm5, %v7310_v36  ;;  %v3718_v3 = vpop.f32.mrf.mxu0 }
 0x45f   : > { %v3499_v10 = vadd.f32 %v3422_v56, %v6598_v44  ;;  %v3310_v55 = vpop.f32.mrf.mxu1 }
 0x460   : > { %v6764_v30 = vadd.f32 %v3310_v55, %v7311_v23 }
 0x461   : > { %v3564_v6 = vpop.f32.mrf.mxu3 }
 0x462   : > { %v3641_v29 = vadd.f32 %v3564_v6, %v3499_v10 }
 0x464   : > { %v6766_v31 = vadd.f32 %v3716_v8, %v3641_v29 }
 0x466   : > { %v3424_v21 = vpop.f32.mrf.mxu2  ;;  %v3721_v8 = vpop.f32.mrf.mxu0 }
 0x467   : > { %v3500_v42 = vadd.f32 %v3424_v21, %v6613_v9  ;;  %v3313_v28 = vpop.f32.mrf.mxu1  ;;  %v7313_v9 = vld [vmem:[#allocation16_spill] sm:$0xff] }
 0x468   : > { %v6770_v47 = vadd.f32 %v3313_v28, %v6593_v14  ;;  %v7315_v28 = vld [vmem:[#allocation12_spill] sm:$0xff] }
 0x469   : > { %4487 = vmatmul.msk.bf16.gmra.mxu0 %vm253_vm5, %v6270_v45  ;;  %v3566_v44 = vpop.f32.mrf.mxu3 }
 0x46a   : > { %v3642_v17 = vadd.f32 %v3566_v44, %v3500_v42  ;;  %4506 = vmatmul.msk.bf16.gmra.mxu1 %vm253_vm5, %v7297_v54 }
 0x46b   : > { %4431 = vmatmul.msk.bf16.gmra.mxu2 %vm253_vm5, %v7312_v40 }
 0x46c   : > { %v6778_v60 = vadd.f32 %v3718_v3, %v3642_v17 }
 0x46e   : > { %v3427_v50 = vpop.f32.mrf.mxu2  ;;  %4459 = vmatmul.msk.bf16.gmra.mxu3 %vm253_vm5, %v7313_v9  ;;  %v3723_v55 = vpop.f32.mrf.mxu0 }
 0x46f   : > { %v3501_v14 = vadd.f32 %v3427_v50, %v6620_v20  ;;  %v3315_v46 = vpop.f32.mrf.mxu1 }
 0x470   : > { %v6784_v45 = vadd.f32 %v3315_v46, %v6606_v32  ;;  %v7314_v32 = vld [vmem:[#allocation14_spill] sm:$0xff] }
 0x471   : > { %v3569_v56 = vpop.f32.mrf.mxu3 }
 0x472   : > { %v3643_v36 = vadd.f32 %v3569_v56, %v3501_v14 }
 0x474   : > { %v6786_v10 = vadd.f32 %v3721_v8, %v3643_v36  ;;  %v7316_v36 = vld [vmem:[#allocation21_spill] sm:$0xff] }
 0x476   : > { %v3429_v54 = vpop.f32.mrf.mxu2 }
 0x477   : > { %v3502_v23 = vadd.f32 %v3429_v54, %v6635_v5  ;;  %v3318_v6 = vpop.f32.mrf.mxu1 }
 0x478   : > { %v6790_v29 = vadd.f32 %v3318_v6, %v6615_v24  ;;  %v7319_v6 = vld [vmem:[#allocation18_spill] sm:$0xff] }
 0x479   : > { %4488 = vmatmul.msk.bf16.gmra.mxu0 %vm253_vm5, %v6297_v38  ;;  %v3571_v20 = vpop.f32.mrf.mxu3  ;;  %v3726_v38 = vpop.f32.mrf.mxu0 }
 0x47a   : > { %v3644_v3 = vadd.f32 %v3571_v20, %v3502_v23  ;;  %4507 = vmatmul.msk.bf16.gmra.mxu1 %vm253_vm5, %v7299_v22 }
 0x47b   : > { %4432 = vmatmul.msk.bf16.gmra.mxu2 %vm253_vm5, %v7314_v32 }
 0x47c   : > { %v6798_v21 = vadd.f32 %v3723_v55, %v3644_v3  ;;  %v7317_v55 = vld [vmem:[#allocation11_spill] sm:$0xff] }
 0x47e   : > { %v3432_v42 = vpop.f32.mrf.mxu2  ;;  %4460 = vmatmul.msk.bf16.gmra.mxu3 %vm253_vm5, %v7315_v28  ;;  %v6852_v28 = vld [vmem:[#allocation3 + $0x1a0] sm:$0xff] }
 0x47f   : > { %v3503_v24 = vadd.f32 %v3432_v42, %v6642_v25  ;;  %v3320_v5 = vpop.f32.mrf.mxu1  ;;  %v6850_v42 = vld [vmem:[#allocation3 + $0x198] sm:$0xff] }
 0x480   : > { %v6804_v44 = vadd.f32 %v3320_v5, %v6628_v59 }
 0x481   : > { %v3574_v17 = vpop.f32.mrf.mxu3  ;;  %v3728_v59 = vpop.f32.mrf.mxu0 }
 0x482   : > { %v3645_v8 = vadd.f32 %v3574_v17, %v3503_v24  ;;  %v3675_v24 = vrot.slane %v6852_v28, 1 }
 0x484   : > { %v6806_v50 = vadd.f32 %v3726_v38, %v3645_v8 }
 0x486   : > { %v3434_v22 = vpop.f32.mrf.mxu2 }
 0x487   : > { %v3504_v9 = vadd.f32 %v3434_v22, %v6657_v1  ;;  %v3323_v14 = vpop.f32.mrf.mxu1 }
 0x488   : > { %v6810_v46 = vadd.f32 %v3323_v14, %v6637_v12  ;;  %v7322_v14 = vld [vmem:[#allocation22_spill] sm:$0xff] }
 0x489   : > { %4489 = vmatmul.msk.bf16.gmra.mxu0 %vm253_vm5, %v6333_v7  ;;  %v3576_v25 = vpop.f32.mrf.mxu3 }
 0x48a   : > { %v3646_v56 = vadd.f32 %v3576_v25, %v3504_v9  ;;  %4508 = vmatmul.msk.bf16.gmra.mxu1 %vm253_vm5, %v7301_v43  ;;  %v7318_v43 = vld [vmem:[#allocation17_spill] sm:$0xff] }
 0x48b   : > { %4433 = vmatmul.msk.bf16.gmra.mxu2 %vm253_vm5, %v7316_v36 }
 0x48c   : > { %v6818_v54 = vadd.f32 %v3728_v59, %v3646_v56 }
 0x48e   : > { %4461 = vmatmul.msk.bf16.gmra.mxu3 %vm253_vm5, %v7317_v55 }
 0x48f   : > { %v3325_v1 = vpop.f32.mrf.mxu1 }
 0x490   : > { %v6823_v12 = vadd.f32 %v3325_v1, %v6650_v13 }
 0x497   : > { %v3328_v23 = vpop.f32.mrf.mxu1 }
 0x498   : > { %v6826_v7 = vadd.f32 %v3328_v23, %v6659_v57 }
 0x499   : > { %4490 = vmatmul.msk.bf16.gmra.mxu0 %vm253_vm5, %v6368_v37  ;;  %v7320_v37 = vld [vmem:[#allocation19_spill] sm:$0xff] }
 0x49a   : > { %4509 = vmatmul.msk.bf16.gmra.mxu1 %vm253_vm5, %v7303_v62  ;;  %v6848_v62 = vld [vmem:[#allocation3 + $0x1a8] sm:$0x3] }
 0x49b   : > { %4434 = vmatmul.msk.bf16.gmra.mxu2 %vm253_vm5, %v7318_v43 }
 0x49e   : > { %4462 = vmatmul.msk.bf16.gmra.mxu3 %vm253_vm5, %v7319_v6 }
 0x49f   : > { %v3330_v20 = vpop.f32.mrf.mxu1 }
 0x4a0   : > { %v6837_v13 = vadd.f32 %v3330_v20, %v6672_v58  ;;  %v7321_v58 = vld [vmem:[#allocation23_spill] sm:$0xff] }
 0x4a7   : > { %v3333_v3 = vpop.f32.mrf.mxu1 }
 0x4a8   : > { %v6840_v57 = vadd.f32 %v3333_v3, %v6681_v53  ;;  %v3674_v53 = vrot.slane %v6850_v42, 1 }
 0x4a9   : > { %4491 = vmatmul.msk.bf16.gmra.mxu0 %vm253_vm5, %v6405_v18  ;;  %v3677_v18 = vrot.slane %v6848_v62, 1 }
 0x4aa   : > { %4510 = vmatmul.msk.bf16.gmra.mxu1 %vm253_vm5, %v7305_v2  ;;  %v3676_v38 = vsel %vm668_vm3, %v3674_v53, %v3675_v24 }
 0x4ab   : > { %4435 = vmatmul.msk.bf16.gmra.mxu2 %vm253_vm5, %v7320_v37  ;;  %v3678_v17 = vsel %vm668_vm3, %v3675_v24, %v3677_v18 }
 0x4ac   : > { %v3681_v8 = vpack.c.bf16 %v3678_v17, %v3676_v38 }
 0x4ae   : > { %4463 = vmatmul.msk.bf16.gmra.mxu3 %vm253_vm5, %v7321_v58 }
 0x4af   : > { %v3335_v5 = vpop.f32.mrf.mxu1 }
 0x4b0   : > { %v6860_v2 = vadd.f32 %v3335_v5, %v6694_v41  ;;  %v3529_v41 = vpack.c.bf16 %v6852_v28, %v6850_v42 }
 0x4b7   : > { %v3338_v22 = vpop.f32.mrf.mxu1 }
 0x4b8   : > { %v6865_v9 = vadd.f32 %v3338_v22, %v6703_v26 }
 0x4b9   : > { %4492 = vmatmul.msk.bf16.gmra.mxu0 %vm253_vm5, %v3681_v8 }
 0x4ba   : > { %4511 = vmatmul.msk.bf16.gmra.mxu1 %vm253_vm5, %v7307_v52 }
 0x4bb   : > { %4436 = vmatmul.msk.bf16.gmra.mxu2 %vm253_vm5, %v7322_v14 }
 0x4be   : > { %4464 = vmatmul.msk.bf16.gmra.mxu3 %vm253_vm5, %v3529_v41 }
 0x4bf   : > { %v3340_v25 = vpop.f32.mrf.mxu1 }
 0x4c0   : > { %v6876_v56 = vadd.f32 %v3340_v25, %v6716_v61 }
 0x4c7   : > { %v3343_v59 = vpop.f32.mrf.mxu1 }
 0x4c8   : > { %v6879_v26 = vadd.f32 %v3343_v59, %v6725_v4 }
 0x4ca   : > { %4512 = vmatmul.msk.bf16.gmra.mxu1 %vm253_vm5, %v6191_v16  ;;  %v3437_v16 = vpop.f32.mrf.mxu2 }
 0x4cf   : > { %v3345_v52 = vpop.f32.mrf.mxu1 }
 0x4d0   : > { %v6884_v55 = vadd.f32 %v3345_v52, %v6738_v34  ;;  %v3579_v34 = vpop.f32.mrf.mxu3 }
 0x4d2   : > { %v3439_v3 = vpop.f32.mrf.mxu2 }
 0x4d7   : > { %v3860_v1 = vpop.f32.mrf.mxu1 }
 0x4d8   : > { %v3940_v23 = vadd.f32 %v3860_v1, %v6746_v15  ;;  %v3731_v15 = vpop.f32.mrf.mxu0  ;;  %v3581_v24 = vpop.f32.mrf.mxu3 }
 0x4da   : > { %v3972_v6 = vmax.f32 %v3940_v23, 0.0  ;;  %4513 = vmatmul.msk.bf16.gmra.mxu1 %vm253_vm5, %v6218_v39  ;;  %v3442_v38 = vpop.f32.mrf.mxu2 }
 0x4dc   : > { %4004 = vst.msk [vmem:[%s6892_s20] sm:$0xff] %vm253_vm5, %v3972_v6 }
 0x4df   : > { %v3862_v61 = vpop.f32.mrf.mxu1 }
 0x4e0   : > { %v3941_v4 = vadd.f32 %v3862_v61, %v6758_v33  ;;  %v3733_v33 = vpop.f32.mrf.mxu0  ;;  %v3584_v8 = vpop.f32.mrf.mxu3 }
 0x4e2   : > { %v3973_v20 = vmax.f32 %v3941_v4, 0.0 }
 0x4e4   : > { %4005 = vst.msk [vmem:[%s6892_s20 + $0x8] sm:$0xff] %vm253_vm5, %v3973_v20 }
 0x4e7   : > { %v3865_v58 = vpop.f32.mrf.mxu1 }
 0x4e8   : > { %v3942_v39 = vadd.f32 %v3865_v58, %v6766_v31  ;;  %v3736_v41 = vpop.f32.mrf.mxu0  ;;  %v3586_v59 = vpop.f32.mrf.mxu3 }
 0x4ea   : > { %v3974_v53 = vmax.f32 %v3942_v39, 0.0  ;;  %4514 = vmatmul.msk.bf16.gmra.mxu1 %vm253_vm5, %v7312_v40  ;;  %v3444_v40 = vpop.f32.mrf.mxu2 }
 0x4ec   : > { %4006 = vst.msk [vmem:[%s6892_s20 + $0x10] sm:$0xff] %vm253_vm5, %v3974_v53 }
 0x4ef   : > { %v3867_v18 = vpop.f32.mrf.mxu1 }
 0x4f0   : > { %v3943_v5 = vadd.f32 %v3867_v18, %v6778_v60  ;;  %v3738_v23 = vpop.f32.mrf.mxu0  ;;  %v3589_v4 = vpop.f32.mrf.mxu3 }
 0x4f2   : > { %v3975_v17 = vmax.f32 %v3943_v5, 0.0  ;;  %v3447_v6 = vpop.f32.mrf.mxu2 }
 0x4f4   : > { %4007 = vst.msk [vmem:[%s6892_s20 + $0x18] sm:$0xff] %vm253_vm5, %v3975_v17 }
 0x4f7   : > { %v3870_v22 = vpop.f32.mrf.mxu1 }
 0x4f8   : > { %v3944_v31 = vadd.f32 %v3870_v22, %v6786_v10  ;;  %v3741_v58 = vpop.f32.mrf.mxu0  ;;  %v3591_v17 = vpop.f32.mrf.mxu3 }
 0x4fa   : > { %v3976_v25 = vmax.f32 %v3944_v31, 0.0  ;;  %4515 = vmatmul.msk.bf16.gmra.mxu1 %vm253_vm5, %v7314_v32  ;;  %v3505_v32 = vadd.f32 %v3437_v16, %v6664_v35 }
 0x4fc   : > { %4008 = vst.msk [vmem:[%s6892_s20 + $0x20] sm:$0xff] %vm253_vm5, %v3976_v25  ;;  %v3647_v18 = vadd.f32 %v3579_v34, %v3505_v32  ;;  %v3507_v34 = vadd.f32 %v3442_v38, %v6686_v27  ;;  %v3824_v32 = vrot.slane %v6852_v28, 2 }
 0x4fe   : > { %v3799_v22 = vadd.f32 %v3731_v15, %v3647_v18 }
 0x4ff   : > { %v3872_v60 = vpop.f32.mrf.mxu1 }
 0x500   : > { %v3945_v52 = vadd.f32 %v3872_v60, %v6798_v21  ;;  %v3449_v21 = vpop.f32.mrf.mxu2 }
 0x502   : > { %v3977_v1 = vmax.f32 %v3945_v52, 0.0 }
 0x504   : > { %4009 = vst.msk [vmem:[%s6892_s20 + $0x28] sm:$0xff] %vm253_vm5, %v3977_v1 }
 0x507   : > { %v3875_v10 = vpop.f32.mrf.mxu1 }
 0x508   : > { %v3946_v61 = vadd.f32 %v3875_v10, %v6806_v50  ;;  %v3506_v50 = vadd.f32 %v3439_v3, %v6679_v19  ;;  %v3452_v60 = vpop.f32.mrf.mxu2  ;;  %v3649_v19 = vadd.f32 %v3584_v8, %v3507_v34 }
 0x50a   : > { %v3978_v20 = vmax.f32 %v3946_v61, 0.0  ;;  %4516 = vmatmul.msk.bf16.gmra.mxu1 %vm253_vm5, %v7316_v36  ;;  %v3743_v36 = vpop.f32.mrf.mxu0  ;;  %v3648_v35 = vadd.f32 %v3581_v24, %v3506_v50  ;;  %v3508_v24 = vadd.f32 %v3444_v40, %v6701_v11  ;;  %v3509_v40 = vadd.f32 %v3447_v6, %v6708_v49 }
 0x50c   : > { %4010 = vst.msk [vmem:[%s6892_s20 + $0x30] sm:$0xff] %vm253_vm5, %v3978_v20  ;;  %v3800_v52 = vadd.f32 %v3733_v33, %v3648_v35  ;;  %v3801_v20 = vadd.f32 %v3736_v41, %v3649_v19  ;;  %v3826_v33 = vrot.slane %v6848_v62, 2  ;;  %v3650_v38 = vadd.f32 %v3586_v59, %v3508_v24 }
 0x50e   : > { %v3827_v11 = vsel %vm971_vm4, %v3824_v32, %v3826_v33 }
 0x50f   : > { %v3877_v39 = vpop.f32.mrf.mxu1 }
 0x510   : > { %v3947_v53 = vadd.f32 %v3877_v39, %v6818_v54  ;;  %v3594_v54 = vpop.f32.mrf.mxu3  ;;  %v3454_v61 = vpop.f32.mrf.mxu2 }
 0x511   : > { %v3512_v24 = vadd.f32 %v3454_v61, %v6744_v51 }
 0x512   : > { %v3979_v5 = vmax.f32 %v3947_v53, 0.0  ;;  %v3746_v15 = vpop.f32.mrf.mxu0 }
 0x514   : > { %4011 = vst.msk [vmem:[%s6892_s20 + $0x38] sm:$0xff] %vm253_vm5, %v3979_v5  ;;  %v3802_v5 = vadd.f32 %v3738_v23, %v3650_v38  ;;  %v3511_v23 = vadd.f32 %v3452_v60, %v6730_v0 }
 0x517   : > { %v3880_v31 = vpop.f32.mrf.mxu1 }
 0x518   : > { %v3948_v25 = vadd.f32 %v3880_v31, %v3799_v22  ;;  %v3596_v39 = vpop.f32.mrf.mxu3  ;;  %v3457_v28 = vpop.f32.mrf.mxu2  ;;  %v3651_v22 = vadd.f32 %v3589_v4, %v3509_v40 }
 0x519   : > { %v3513_v60 = vadd.f32 %v3457_v28, %v6750_v48 }
 0x51a   : > { %v3980_v16 = vmax.f32 %v3948_v25, 0.0  ;;  %4517 = vmatmul.msk.bf16.gmra.mxu1 %vm253_vm5, %v7318_v43  ;;  %v3823_v43 = vrot.slane %v6850_v42, 2  ;;  %v3748_v41 = vpop.f32.mrf.mxu0  ;;  %v3803_v35 = vadd.f32 %v3741_v58, %v3651_v22 }
 0x51c   : > { %4012 = vst.msk [vmem:[%s6892_s20 + $0x40] sm:$0xff] %vm253_vm5, %v3980_v16  ;;  %v3825_v18 = vsel %vm971_vm4, %v3823_v43, %v3824_v32  ;;  %v3654_v32 = vadd.f32 %v3596_v39, %v3512_v24 }
 0x51d   : > { %v3830_v42 = vpack.c.bf16 %v3827_v11, %v3825_v18 }
 0x51f   : > { %v3882_v1 = vpop.f32.mrf.mxu1 }
 0x520   : > { %v3949_v10 = vadd.f32 %v3882_v1, %v3800_v52  ;;  %v3599_v59 = vpop.f32.mrf.mxu3  ;;  %v3459_v16 = vpop.f32.mrf.mxu2 }
 0x521   : > { %v3655_v51 = vadd.f32 %v3599_v59, %v3513_v60 }
 0x522   : > { %v3981_v3 = vmax.f32 %v3949_v10, 0.0  ;;  %v3751_v25 = vpop.f32.mrf.mxu0 }
 0x523   : > { %v3807_v18 = vadd.f32 %v3751_v25, %v3655_v51 }
 0x524   : > { %4013 = vst.msk [vmem:[%s6892_s20 + $0x48] sm:$0xff] %vm253_vm5, %v3981_v3 }
 0x527   : > { %v3885_v53 = vpop.f32.mrf.mxu1 }
 0x528   : > { %v3950_v27 = vadd.f32 %v3885_v53, %v3801_v20  ;;  %v3601_v49 = vpop.f32.mrf.mxu3  ;;  %v3462_v58 = vpop.f32.mrf.mxu2 }
 0x52a   : > { %v3982_v8 = vmax.f32 %v3950_v27, 0.0  ;;  %4518 = vmatmul.msk.bf16.gmra.mxu1 %vm253_vm5, %v7320_v37  ;;  %v3510_v37 = vadd.f32 %v3449_v21, %v6723_v63  ;;  %v3753_v19 = vpop.f32.mrf.mxu0  ;;  %v3653_v21 = vadd.f32 %v3594_v54, %v3511_v23  ;;  %v3806_v54 = vadd.f32 %v3748_v41, %v3654_v32 }
 0x52b   : > { %v3515_v41 = vadd.f32 %v3462_v58, %v6770_v47 }
 0x52c   : > { %4014 = vst.msk [vmem:[%s6892_s20 + $0x50] sm:$0xff] %vm253_vm5, %v3982_v8  ;;  %v3652_v1 = vadd.f32 %v3591_v17, %v3510_v37  ;;  %v3805_v20 = vadd.f32 %v3746_v15, %v3653_v21  ;;  %v3514_v8 = vadd.f32 %v3459_v16, %v6764_v30 }
 0x52e   : > { %v3804_v6 = vadd.f32 %v3743_v36, %v3652_v1 }
 0x52f   : > { %v3887_v50 = vpop.f32.mrf.mxu1 }
 0x530   : > { %v3951_v62 = vadd.f32 %v3887_v50, %v3802_v5  ;;  %v3604_v17 = vpop.f32.mrf.mxu3  ;;  %v3464_v36 = vpop.f32.mrf.mxu2  ;;  %v3656_v5 = vadd.f32 %v3601_v49, %v3514_v8 }
 0x531   : > { %v3516_v25 = vadd.f32 %v3464_v36, %v6784_v45 }
 0x532   : > { %v3983_v31 = vmax.f32 %v3951_v62, 0.0  ;;  %v3756_v53 = vpop.f32.mrf.mxu0  ;;  %v3808_v50 = vadd.f32 %v3753_v19, %v3656_v5 }
 0x534   : > { %4015 = vst.msk [vmem:[%s6892_s20 + $0x58] sm:$0xff] %vm253_vm5, %v3983_v31  ;;  %v3657_v31 = vadd.f32 %v3604_v17, %v3515_v41 }
 0x537   : > { %v3890_v34 = vpop.f32.mrf.mxu1 }
 0x538   : > { %v3952_v52 = vadd.f32 %v3890_v34, %v3803_v35  ;;  %v3606_v27 = vpop.f32.mrf.mxu3  ;;  %v3467_v39 = vpop.f32.mrf.mxu2  ;;  %v3809_v35 = vadd.f32 %v3756_v53, %v3657_v31 }
 0x539   : > { %v3658_v47 = vadd.f32 %v3606_v27, %v3516_v25  ;;  %v3517_v23 = vadd.f32 %v3467_v39, %v6790_v29 }
 0x53a   : > { %v3984_v10 = vmax.f32 %v3952_v52, 0.0  ;;  %4519 = vmatmul.msk.bf16.gmra.mxu1 %vm253_vm5, %v7322_v14  ;;  %v3758_v61 = vpop.f32.mrf.mxu0 }
 0x53c   : > { %4016 = vst.msk [vmem:[%s6892_s20 + $0x60] sm:$0xff] %vm253_vm5, %v3984_v10 }
 0x53f   : > { %v3892_v4 = vpop.f32.mrf.mxu1 }
 0x540   : > { %v3953_v63 = vadd.f32 %v3892_v4, %v3804_v6  ;;  %v3609_v40 = vpop.f32.mrf.mxu3  ;;  %v3469_v62 = vpop.f32.mrf.mxu2  ;;  %v3810_v6 = vadd.f32 %v3758_v61, %v3658_v47 }
 0x542   : > { %v3985_v3 = vmax.f32 %v3953_v63, 0.0  ;;  %v3761_v28 = vpop.f32.mrf.mxu0  ;;  %v3659_v63 = vadd.f32 %v3609_v40, %v3517_v23 }
 0x544   : > { %4017 = vst.msk [vmem:[%s6892_s20 + $0x68] sm:$0xff] %vm253_vm5, %v3985_v3  ;;  %v3518_v3 = vadd.f32 %v3469_v62, %v6804_v44  ;;  %v3811_v17 = vadd.f32 %v3761_v28, %v3659_v63 }
 0x547   : > { %v3895_v14 = vpop.f32.mrf.mxu1 }
 0x548   : > { %v3954_v43 = vadd.f32 %v3895_v14, %v3805_v20  ;;  %v3611_v30 = vpop.f32.mrf.mxu3  ;;  %v3472_v1 = vpop.f32.mrf.mxu2 }
 0x54a   : > { %v3986_v0 = vmax.f32 %v3954_v43, 0.0  ;;  %4520 = vmatmul.msk.bf16.gmra.mxu1 %vm253_vm5, %v3830_v42  ;;  %v3763_v34 = vpop.f32.mrf.mxu0  ;;  %v3660_v43 = vadd.f32 %v3611_v30, %v3518_v3 }
 0x54c   : > { %4018 = vst.msk [vmem:[%s6892_s20 + $0x70] sm:$0xff] %vm253_vm5, %v3986_v0  ;;  %v3519_v0 = vadd.f32 %v3472_v1, %v6810_v46  ;;  %v3812_v36 = vadd.f32 %v3763_v34, %v3660_v43 }
 0x54f   : > { %v3897_v33 = vpop.f32.mrf.mxu1 }
 0x550   : > { %v3955_v38 = vadd.f32 %v3897_v33, %v3806_v54  ;;  %v3614_v49 = vpop.f32.mrf.mxu3  ;;  %v3474_v21 = vpop.f32.mrf.mxu2 }
 0x551   : > { %v3661_v33 = vadd.f32 %v3614_v49, %v3519_v0  ;;  %v3520_v51 = vadd.f32 %v3474_v21, %v6823_v12 }
 0x552   : > { %v3987_v15 = vmax.f32 %v3955_v38, 0.0  ;;  %v3766_v58 = vpop.f32.mrf.mxu0 }
 0x554   : > { %4019 = vst.msk [vmem:[%s6892_s20 + $0x78] sm:$0xff] %vm253_vm5, %v3987_v15  ;;  %v3813_v15 = vadd.f32 %v3766_v58, %v3661_v33 }
 0x557   : > { %v3900_v11 = vpop.f32.mrf.mxu1 }
 0x558   : > { %v3956_v42 = vadd.f32 %v3900_v11, %v3807_v18  ;;  %v3616_v24 = vpop.f32.mrf.mxu3  ;;  %v3477_v53 = vpop.f32.mrf.mxu2 }
 0x559   : > { %v3662_v18 = vadd.f32 %v3616_v24, %v3520_v51 }
 0x55a   : > { %v3988_v48 = vmax.f32 %v3956_v42, 0.0  ;;  %v3768_v29 = vpop.f32.mrf.mxu0  ;;  %v3521_v42 = vadd.f32 %v3477_v53, %v6826_v7 }
 0x55b   : > { %v3814_v40 = vadd.f32 %v3768_v29, %v3662_v18 }
 0x55c   : > { %4020 = vst.msk [vmem:[%s6892_s20 + $0x80] sm:$0xff] %vm253_vm5, %v3988_v48 }
 0x55f   : > { %v3902_v59 = vpop.f32.mrf.mxu1 }
 0x560   : > { %v3957_v22 = vadd.f32 %v3902_v59, %v3808_v50  ;;  %v3619_v27 = vpop.f32.mrf.mxu3  ;;  %v3479_v61 = vpop.f32.mrf.mxu2 }
 0x561   : > { %v3663_v50 = vadd.f32 %v3619_v27, %v3521_v42  ;;  %v3522_v59 = vadd.f32 %v3479_v61, %v6837_v13 }
 0x562   : > { %v3989_v37 = vmax.f32 %v3957_v22, 0.0  ;;  %v3771_v38 = vpop.f32.mrf.mxu0 }
 0x563   : > { %v3815_v22 = vadd.f32 %v3771_v38, %v3663_v50 }
 0x564   : > { %4021 = vst.msk [vmem:[%s6892_s20 + $0x88] sm:$0xff] %vm253_vm5, %v3989_v37 }
 0x567   : > { %v3905_v16 = vpop.f32.mrf.mxu1 }
 0x568   : > { %v3958_v52 = vadd.f32 %v3905_v16, %v3809_v35  ;;  %v3621_v46 = vpop.f32.mrf.mxu3  ;;  %v3482_v28 = vpop.f32.mrf.mxu2 }
 0x569   : > { %v3664_v25 = vadd.f32 %v3621_v46, %v3522_v59  ;;  %v3523_v16 = vadd.f32 %v3482_v28, %v6840_v57 }
 0x56a   : > { %v3990_v10 = vmax.f32 %v3958_v52, 0.0  ;;  %v3773_v48 = vpop.f32.mrf.mxu0 }
 0x56b   : > { %v3816_v34 = vadd.f32 %v3773_v48, %v3664_v25 }
 0x56c   : > { %4022 = vst.msk [vmem:[%s6892_s20 + $0x90] sm:$0xff] %vm253_vm5, %v3990_v10 }
 0x56f   : > { %v3907_v4 = vpop.f32.mrf.mxu1 }
 0x570   : > { %v3959_v19 = vadd.f32 %v3907_v4, %v3810_v6  ;;  %v3624_v62 = vpop.f32.mrf.mxu3  ;;  %v3484_v35 = vpop.f32.mrf.mxu2 }
 0x571   : > { %v3665_v10 = vadd.f32 %v3624_v62, %v3523_v16  ;;  %v3524_v6 = vadd.f32 %v3484_v35, %v6860_v2 }
 0x572   : > { %v3991_v45 = vmax.f32 %v3959_v19, 0.0  ;;  %v3776_v30 = vpop.f32.mrf.mxu0 }
 0x573   : > { %v3817_v4 = vadd.f32 %v3776_v30, %v3665_v10 }
 0x574   : > { %4023 = vst.msk [vmem:[%s6892_s20 + $0x98] sm:$0xff] %vm253_vm5, %v3991_v45 }
 0x577   : > { %v3910_v20 = vpop.f32.mrf.mxu1 }
 0x578   : > { %v3960_v14 = vadd.f32 %v3910_v20, %v3811_v17  ;;  %v3626_v52 = vpop.f32.mrf.mxu3  ;;  %v3487_v23 = vpop.f32.mrf.mxu2 }
 0x579   : > { %v3666_v45 = vadd.f32 %v3626_v52, %v3524_v6  ;;  %v3525_v3 = vadd.f32 %v3487_v23, %v6865_v9 }
 0x57a   : > { %v3992_v32 = vmax.f32 %v3960_v14, 0.0  ;;  %v3778_v13 = vpop.f32.mrf.mxu0 }
 0x57b   : > { %v3818_v17 = vadd.f32 %v3778_v13, %v3666_v45 }
 0x57c   : > { %4024 = vst.msk [vmem:[%s6892_s20 + $0xa0] sm:$0xff] %vm253_vm5, %v3992_v32 }
 0x57f   : > { %v3912_v60 = vpop.f32.mrf.mxu1 }
 0x580   : > { %v3961_v54 = vadd.f32 %v3912_v60, %v3812_v36  ;;  %v3629_v58 = vpop.f32.mrf.mxu3  ;;  %v3489_v24 = vpop.f32.mrf.mxu2 }
 0x581   : > { %v3667_v43 = vadd.f32 %v3629_v58, %v3525_v3  ;;  %v3526_v29 = vadd.f32 %v3489_v24, %v6876_v56 }
 0x582   : > { %v3993_v44 = vmax.f32 %v3961_v54, 0.0  ;;  %v3781_v21 = vpop.f32.mrf.mxu0 }
 0x583   : > { %v3819_v53 = vadd.f32 %v3781_v21, %v3667_v43 }
 0x584   : > { %4025 = vst.msk [vmem:[%s6892_s20 + $0xa8] sm:$0xff] %vm253_vm5, %v3993_v44 }
 0x587   : > { %v3915_v39 = vpop.f32.mrf.mxu1 }
 0x588   : > { %v3962_v8 = vadd.f32 %v3915_v39, %v3813_v15  ;;  %v3631_v2 = vpop.f32.mrf.mxu3  ;;  %v3492_v54 = vpop.f32.mrf.mxu2 }
 0x589   : > { %v3668_v27 = vadd.f32 %v3631_v2, %v3526_v29  ;;  %v3527_v44 = vadd.f32 %v3492_v54, %v6879_v26 }
 0x58a   : > { %v3994_v11 = vmax.f32 %v3962_v8, 0.0  ;;  %v3783_v60 = vpop.f32.mrf.mxu0 }
 0x58b   : > { %v3820_v38 = vadd.f32 %v3783_v60, %v3668_v27 }
 0x58c   : > { %4026 = vst.msk [vmem:[%s6892_s20 + $0xb0] sm:$0xff] %vm253_vm5, %v3994_v11 }
 0x58f   : > { %v3917_v5 = vpop.f32.mrf.mxu1 }
 0x590   : > { %v3963_v41 = vadd.f32 %v3917_v5, %v3814_v40  ;;  %v3634_v33 = vpop.f32.mrf.mxu3  ;;  %v3494_v8 = vpop.f32.mrf.mxu2 }
 0x591   : > { %v3669_v56 = vadd.f32 %v3634_v33, %v3527_v44  ;;  %v3528_v11 = vadd.f32 %v3494_v8, %v6884_v55 }
 0x592   : > { %v3995_v12 = vmax.f32 %v3963_v41, 0.0  ;;  %v3786_v61 = vpop.f32.mrf.mxu0 }
 0x593   : > { %v3821_v18 = vadd.f32 %v3786_v61, %v3669_v56 }
 0x594   : > { %4027 = vst.msk [vmem:[%s6892_s20 + $0xb8] sm:$0xff] %vm253_vm5, %v3995_v12 }
 0x597   : > { %v3920_v31 = vpop.f32.mrf.mxu1 }
 0x598   : > { %v3964_v37 = vadd.f32 %v3920_v31, %v3815_v22  ;;  %v3636_v46 = vpop.f32.mrf.mxu3 }
 0x599   : > { %v3670_v26 = vadd.f32 %v3636_v46, %v3528_v11 }
 0x59a   : > { %v3996_v7 = vmax.f32 %v3964_v37, 0.0  ;;  %v3788_v48 = vpop.f32.mrf.mxu0 }
 0x59b   : > { %v3822_v41 = vadd.f32 %v3788_v48, %v3670_v26 }
 0x59c   : > { %4028 = vst.msk [vmem:[%s6892_s20 + $0xc0] sm:$0xff] %vm253_vm5, %v3996_v7 }
 0x59f   : > { %v3922_v1 = vpop.f32.mrf.mxu1 }
 0x5a0   : > { %v3965_v47 = vadd.f32 %v3922_v1, %v3816_v34 }
 0x5a2   : > { %v3997_v49 = vmax.f32 %v3965_v47, 0.0 }
 0x5a4   : > { %4029 = vst.msk [vmem:[%s6892_s20 + $0xc8] sm:$0xff] %vm253_vm5, %v3997_v49 }
 0x5a7   : > { %v3925_v19 = vpop.f32.mrf.mxu1 }
 0x5a8   : > { %v3966_v63 = vadd.f32 %v3925_v19, %v3817_v4 }
 0x5aa   : > { %v3998_v57 = vmax.f32 %v3966_v63, 0.0 }
 0x5ac   : > { %4030 = vst.msk [vmem:[%s6892_s20 + $0xd0] sm:$0xff] %vm253_vm5, %v3998_v57 }
 0x5af   : > { %v3927_v20 = vpop.f32.mrf.mxu1 }
 0x5b0   : > { %v3967_v14 = vadd.f32 %v3927_v20, %v3818_v17 }
 0x5b2   : > { %v3999_v32 = vmax.f32 %v3967_v14, 0.0 }
 0x5b4   : > { %4031 = vst.msk [vmem:[%s6892_s20 + $0xd8] sm:$0xff] %vm253_vm5, %v3999_v32 }
 0x5b7   : > { %v3930_v0 = vpop.f32.mrf.mxu1 }
 0x5b8   : > { %v3968_v36 = vadd.f32 %v3930_v0, %v3819_v53 }
 0x5ba   : > { %v4000_v9 = vmax.f32 %v3968_v36, 0.0 }
 0x5bc   : > { %4032 = vst.msk [vmem:[%s6892_s20 + $0xe0] sm:$0xff] %vm253_vm5, %v4000_v9 }
 0x5bf   : > { %v3932_v51 = vpop.f32.mrf.mxu1 }
 0x5c0   : > { %v3969_v15 = vadd.f32 %v3932_v51, %v3820_v38 }
 0x5c2   : > { %v4001_v39 = vmax.f32 %v3969_v15, 0.0 }
 0x5c4   : > { %4033 = vst.msk [vmem:[%s6892_s20 + $0xe8] sm:$0xff] %vm253_vm5, %v4001_v39 }
 0x5c7   : > { %v3935_v42 = vpop.f32.mrf.mxu1 }
 0x5c8   : > { %v3970_v40 = vadd.f32 %v3935_v42, %v3821_v18 }
 0x5ca   : > { %v4002_v5 = vmax.f32 %v3970_v40, 0.0 }
 0x5cc   : > { %4034 = vst.msk [vmem:[%s6892_s20 + $0xf0] sm:$0xff] %vm253_vm5, %v4002_v5 }
 0x5cf   : > { %v3937_v55 = vpop.f32.mrf.mxu1 }
 0x5d0   : > { %v3971_v28 = vadd.f32 %v3937_v55, %v3822_v41 }
 0x5d2   : > { %v4003_v50 = vmax.f32 %v3971_v28, 0.0 }
 0x5d4   : > { %4035 = vst.msk [vmem:[%s6892_s20 + $0xf8] sm:$0xff] %vm253_vm5, %v4003_v50 }
 0x5d5   : > { %4619 = shalt.err (!%p4616_p3)
}
 0x5d6   : > { %s4657_s12 = smov 128   ;;  %s4658_s13 = smov 8  }
 0x5d7   : > { %4548 = dma.vmem_to_hbm [thread:$0]  (%p4722_p5), %s4050_s29, 4096, %s4052_s30, %s4037_s19, %s4657_s12, %s4657_s12, %s4658_s13  }
 0x5d8 PF: > { %p4554_p4 = scmp.ge.s32.totalorder %s4654_s18, 2  ;;  %s4066_s14 = sand.u32 1, %s4642_s15  }
 0x5d9   : > { %s4067_s20 = scalar_lea.sflag [#allocation5], %s4066_s14 }
 0x5da   : > { %p4551_p7 = pnand %p4554_p4, %p4726_p6 }
 0x5dc   : > { %p4552_p8 = pneg %p4551_p7 }
 0x5de   : > { %4637 = dma.done.wait (%p4552_p8), %s4067_s20, 4096  }
 0x5df   : > { %4639 = vsyncadd (%p4552_p8), %s4067_s20, 4294963200  ;;  %p14_p9 = scmp.ge.s32.totalorder %s4709_s21, 4   ;;  %s7323_s15 = smov %s4646_s16 }
 0x5e0   : > { %s7324_s16 = smov %s4650_s17  ;;  %s7325_s17 = smov %s4720_s24 }
 0x5e1   : > { %s7326_s18 = smov %s4709_s21  ;;  %16 = sbr.rel (!%p14_p9) target bundleno = 3 (0x3), region = 89 }
 0x5e6   :  { %4073 = vsyncpa [#allocation5], 1 }
 0x5e7   :  { %4075 = vsyncpa [#allocation5 + $0x1], 1 }

</bundles_post_ra>
